<compile_context>
chip_gen: v7x
topology: tpu7x:2x2x1
jax: 0.10.0
libtpu: 0.0.40
codegen_flags: <defaults>
</compile_context>

<pallas_src>
import functools
import math

import jax
import jax.numpy as jnp
from jax.experimental import pallas as pl
from jax.experimental.pallas import tpu as pltpu


VMEM_LIMIT = 32 * 1024 * 1024   # safe on v5e(128M)/v6e(128M)/v7x(64M), > v5e default
ROW_TILE = 1024                 # target row tile (sweet spot per measured roofline)


# ------------------------------ small helpers --------------------------------

def _round_up(x, m):
    return ((x + m - 1) // m) * m


def _cdiv(a, b):
    return (a + b - 1) // b


def _divisor_tile(m, target=ROW_TILE):
    """Largest tile <= target that divides m exactly (multiple of 8 if possible)."""
    if m <= target:
        return m
    for t in range(target, 7, -1):
        if m % t == 0 and t % 8 == 0:
            return t
    return m  # TODO(synk): no aligned divisor found -> whole-axis block fallback


def _cparams(*sems):
    return pltpu.CompilerParams(dimension_semantics=sems,
                                vmem_limit_bytes=VMEM_LIMIT)


# ----------------------------- in-kernel helpers ------------------------------

def _erf_approx(x):
    # Abramowitz & Stegun 7.1.26 (max abs err ~1.5e-7), stands in for exact erf.
    a1, a2, a3, a4, a5 = 0.254829592, -0.284496736, 1.421413741, -1.453152027, 1.061405429
    p = 0.3275911
    s = jnp.where(x >= 0.0, 1.0, -1.0)
    z = jnp.abs(x)
    t = 1.0 / (1.0 + p * z)
    poly = ((((a5 * t + a4) * t + a3) * t + a2) * t + a1) * t
    return s * (1.0 - poly * jnp.exp(-z * z))


def _apply_act(y, act):
    if act == "gelu":       # torch.nn.GELU() (erf form)
        return 0.5 * y * (1.0 + _erf_approx(y * 0.7071067811865476))
    if act == "leaky":      # torch.nn.LeakyReLU(negative_slope=0.01)
        return jnp.where(y >= 0.0, y, 0.01 * y)
    return y


# --------------------------------- kernels ------------------------------------

def _conv3_tap_kernel(a_ref, b_ref, w_ref, bias_ref, o_ref, win_ref, *, offs):
    # a/b: adjacent (TR, C) f32 row blocks of the flattened padded volume.
    # win: (2*TR, C) f32 contiguous window; taps are shifted row-slices of it.
    tr = a_ref.shape[0]
    win_ref[0:tr, :] = a_ref[...]
    win_ref[tr:2 * tr, :] = b_ref[...]
    acc = jnp.dot(win_ref[offs[0]:offs[0] + tr, :], w_ref[0],
                  preferred_element_type=jnp.float32)
    for t in range(1, len(offs)):
        off = offs[t]
        acc = acc + jnp.dot(win_ref[off:off + tr, :], w_ref[t],
                            preferred_element_type=jnp.float32)
    o_ref[...] = acc + bias_ref[...]


def _dw3_tap_kernel(a_ref, b_ref, w_ref, bias_ref, o_ref, win_ref, *, offs):
    # Depthwise 3x3x3 conv: 27 shifted elementwise multiply-accumulates (VPU).
    tr = a_ref.shape[0]
    win_ref[0:tr, :] = a_ref[...]
    win_ref[tr:2 * tr, :] = b_ref[...]
    acc = win_ref[offs[0]:offs[0] + tr, :] * w_ref[0]
    for t in range(1, len(offs)):
        off = offs[t]
        acc = acc + win_ref[off:off + tr, :] * w_ref[t]
    o_ref[...] = acc + bias_ref[...]


def _sums_kernel(x_ref, s_ref, ss_ref):
    # Accumulate sum / sum-of-squares over the row-tile axis (output-resident).
    m = pl.program_id(1)
    x = x_ref[0]
    ps = jnp.sum(x, axis=0, keepdims=True)
    pss = jnp.sum(x * x, axis=0, keepdims=True)

    @pl.when(m == 0)
    def _():
        s_ref[0] = ps
        ss_ref[0] = pss

    @pl.when(m > 0)
    def _():
        s_ref[0] = s_ref[0] + ps
        ss_ref[0] = ss_ref[0] + pss


def _affine_kernel(x_ref, sc_ref, sh_ref, o_ref, *, act):
    o_ref[0] = _apply_act(x_ref[0] * sc_ref[0] + sh_ref[0], act)


def _affine_res_kernel(x_ref, sc_ref, sh_ref, r_ref, o_ref, *, act):
    o_ref[0] = _apply_act(x_ref[0] * sc_ref[0] + sh_ref[0] + r_ref[0], act)


def _mednext_fused_kernel(x_ref, sc_ref, sh_ref, w1_ref, b1_ref, w2_ref, b2_ref,
                          r_ref, o_ref):
    # GroupNorm affine -> 1x1 conv + GELU -> 1x1 conv + residual, one HBM pass.
    xn = x_ref[0] * sc_ref[0] + sh_ref[0]
    h = jnp.dot(xn, w1_ref[...], preferred_element_type=jnp.float32) + b1_ref[...]
    h = _apply_act(h, "gelu")
    y = jnp.dot(h, w2_ref[...], preferred_element_type=jnp.float32) + b2_ref[...]
    o_ref[0] = y + r_ref[0]


def _maxpool_kernel(x_ref, o_ref):
    # x block: (1, 2*Ho, 2, Wo, 2*C); d-pair folded into rows, w-pair into lanes.
    c = o_ref.shape[-1]
    ho = o_ref.shape[1]
    v = x_ref[0]
    a = jnp.maximum(v[:ho], v[ho:])                  # pool D
    b = jnp.maximum(a[:, 0], a[:, 1])                # pool H
    o_ref[0] = jnp.maximum(b[..., :c], b[..., c:])   # pool W (lane halves)


# ------------------------------ pallas wrappers --------------------------------

def _conv3_generic(x, wt, bb, cout, kernel):
    """Shared driver for the 3x3x3 'same' stride-1 conv tap-accumulation kernels.

    The padded volume is flattened to rows; output row r gets
    sum_t X[r + off_t] (*|@) W_t.  Valid rows are cropped back afterwards.
    """
    N, D, H, W, C = x.shape
    Dp, Hp, Wp = D + 2, H + 2, W + 2
    PL = Hp * Wp
    R = Dp * PL
    M = N * R

    offs = tuple(kd * PL + kh * Wp + kw
                 for kd in range(3) for kh in range(3) for kw in range(3))
    max_off = offs[-1]

    TR = min(ROW_TILE, _round_up(M, 16))
    TR = max(TR, _round_up(max_off, 16))      # window [off, off+TR) must fit in 2*TR
    n_tiles = _cdiv(M, TR)
    rows = (n_tiles + 1) * TR                 # block i and its neighbour i+1 must exist

    xp = jnp.pad(x, ((0, 0), (1, 1), (1, 1), (1, 1), (0, 0)))
    xf = xp.reshape(M, C).astype(jnp.float32)
    xf = jnp.pad(xf, ((0, rows - M), (0, 0)))

    w_ndim = wt.ndim

    out = pl.pallas_call(
        functools.partial(kernel, offs=offs),
        out_shape=jax.ShapeDtypeStruct((n_tiles * TR, cout), jnp.float32),
        grid=(n_tiles,),
        in_specs=[
            pl.BlockSpec((TR, C), lambda i: (i, 0)),        # tile i
            pl.BlockSpec((TR, C), lambda i: (i + 1, 0)),    # neighbour tile i+1
            pl.BlockSpec(wt.shape, lambda i: (0,) * w_ndim),
            pl.BlockSpec((1, cout), lambda i: (0, 0)),
        ],
        out_specs=pl.BlockSpec((TR, cout), lambda i: (i, 0)),
        scratch_shapes=[pltpu.VMEM((2 * TR, C), jnp.float32)],
        compiler_params=_cparams("parallel"),
    )(xf, xf, wt, bb)

    return out[:M].reshape(N, Dp, Hp, Wp, cout)[:, :D, :H, :W, :]


def conv3x3(x, w, b):
    """nn.Conv3d(kernel=3, stride=1, padding=1); w: (3,3,3,Cin,Cout)."""
    C, Cout = w.shape[3], w.shape[4]
    wt = w.reshape(27, C, Cout).astype(jnp.float32)
    bb = b.reshape(1, Cout).astype(jnp.float32)
    return _conv3_generic(x, wt, bb, Cout, _conv3_tap_kernel)


def dwconv3x3(x, w, b):
    """Depthwise nn.Conv3d(k=3, s=1, p=1, groups=C); w: (3,3,3,C)."""
    C = w.shape[3]
    wt = w.reshape(27, 1, C).astype(jnp.float32)
    bb = b.reshape(1, C).astype(jnp.float32)
    return _conv3_generic(x, wt, bb, C, _dw3_tap_kernel)


def gn_stats(x, gamma, beta, eps=1e-5):
    """GroupNorm(num_groups == C) stats -> per-(n, c) scale & shift (lane-dense)."""
    N, D, H, W, C = x.shape
    Mrow, WC = D * H, W * C
    xr = x.reshape(N, Mrow, WC)
    TRow = _divisor_tile(Mrow)
    s, ss = pl.pallas_call(
        _sums_kernel,
        out_shape=(jax.ShapeDtypeStruct((N, 1, WC), jnp.float32),
                   jax.ShapeDtypeStruct((N, 1, WC), jnp.float32)),
        grid=(N, Mrow // TRow),
        in_specs=[pl.BlockSpec((1, TRow, WC), lambda n, m: (n, m, 0))],
        out_specs=(pl.BlockSpec((1, 1, WC), lambda n, m: (n, 0, 0)),
                   pl.BlockSpec((1, 1, WC), lambda n, m: (n, 0, 0))),
        compiler_params=_cparams("parallel", "arbitrary"),
    )(xr)
    s = s.reshape(N, W, C).sum(axis=1)            # fold the W groups (tiny)
    ss = ss.reshape(N, W, C).sum(axis=1)
    cnt = float(D * H * W)
    mean = s / cnt
    var = ss / cnt - mean * mean
    rstd = jax.lax.rsqrt(var + eps)
    scale = rstd * gamma[None, :]
    shift = beta[None, :] - mean * scale
    return scale, shift                            # (N, C), (N, C)


def group_norm(x, gamma, beta, act="none", residual=None, eps=1e-5):
    """GroupNorm(C groups) + affine (+residual) + activation, lane-dense layout."""
    N, D, H, W, C = x.shape
    scale, shift = gn_stats(x, gamma, beta, eps)
    Mrow, WC = D * H, W * C
    xr = x.reshape(N, Mrow, WC)
    sc = jnp.tile(scale, (1, W)).reshape(N, 1, WC)
    sh = jnp.tile(shift, (1, W)).reshape(N, 1, WC)
    TRow = _divisor_tile(Mrow)

    in_specs = [
        pl.BlockSpec((1, TRow, WC), lambda n, m: (n, m, 0)),
        pl.BlockSpec((1, 1, WC), lambda n, m: (n, 0, 0)),
        pl.BlockSpec((1, 1, WC), lambda n, m: (n, 0, 0)),
    ]
    args = [xr, sc, sh]
    if residual is not None:
        in_specs.append(pl.BlockSpec((1, TRow, WC), lambda n, m: (n, m, 0)))
        args.append(residual.reshape(N, Mrow, WC))
        kern = functools.partial(_affine_res_kernel, act=act)
    else:
        kern = functools.partial(_affine_kernel, act=act)

    y = pl.pallas_call(
        kern,
        out_shape=jax.ShapeDtypeStruct((N, Mrow, WC), jnp.float32),
        grid=(N, Mrow // TRow),
        in_specs=in_specs,
        out_specs=pl.BlockSpec((1, TRow, WC), lambda n, m: (n, m, 0)),
        compiler_params=_cparams("parallel", "parallel"),
    )(*args)
    return y.reshape(N, D, H, W, C)


def maxpool2(x):
    """MaxPool3d(kernel=(2,2,2), stride=2) via non-overlapping blocked windows."""
    N, D, H, W, C = x.shape
    Do, Ho, Wo = D // 2, H // 2, W // 2
    xr = x.reshape(N * Do, 2 * Ho, 2, Wo, 2 * C)     # contiguous (free) reshape
    y = pl.pallas_call(
        _maxpool_kernel,
        out_shape=jax.ShapeDtypeStruct((N * Do, Ho, Wo, C), jnp.float32),
        grid=(N * Do,),
        in_specs=[pl.BlockSpec((1, 2 * Ho, 2, Wo, 2 * C),
                               lambda i: (i, 0, 0, 0, 0))],
        out_specs=pl.BlockSpec((1, Ho, Wo, C), lambda i: (i, 0, 0, 0)),
        compiler_params=_cparams("parallel"),
    )(xr)
    return y.reshape(N, Do, Ho, Wo, C)


# ------------------------------- module blocks ---------------------------------

def mednext_block(x, p):
    """x1 = dwconv(x); x1 = GELU(pw1(norm(x1))); x1 = pw2(x1); return x + x1."""
    N, D, H, W, C = x.shape

    xd = dwconv3x3(x, p["dw"]["w"], p["dw"]["b"])
    scale, shift = gn_stats(xd, p["gn"]["g"], p["gn"]["b"])

    M = D * H * W
    TM = _divisor_tile(M)
    Ce = p["pw1"]["w"].shape[1]
    y = pl.pallas_call(
        _mednext_fused_kernel,
        out_shape=jax.ShapeDtypeStruct((N, M, C), jnp.float32),
        grid=(N, M // TM),
        in_specs=[
            pl.BlockSpec((1, TM, C), lambda n, m: (n, m, 0)),   # dw output
            pl.BlockSpec((1, 1, C), lambda n, m: (n, 0, 0)),    # GN scale
            pl.BlockSpec((1, 1, C), lambda n, m: (n, 0, 0)),    # GN shift
            pl.BlockSpec((C, Ce), lambda n, m: (0, 0)),         # pw1 weight
            pl.BlockSpec((1, Ce), lambda n, m: (0, 0)),         # pw1 bias
            pl.BlockSpec((Ce, C), lambda n, m: (0, 0)),         # pw2 weight
            pl.BlockSpec((1, C), lambda n, m: (0, 0)),          # pw2 bias
            pl.BlockSpec((1, TM, C), lambda n, m: (n, m, 0)),   # residual (x)
        ],
        out_specs=pl.BlockSpec((1, TM, C), lambda n, m: (n, m, 0)),
        compiler_params=_cparams("parallel", "parallel"),
    )(xd.reshape(N, M, C),
      scale[:, None, :], shift[:, None, :],
      p["pw1"]["w"], p["pw1"]["b"].reshape(1, Ce),
      p["pw2"]["w"], p["pw2"]["b"].reshape(1, C),
      x.reshape(N, M, C))
    return y.reshape(N, D, H, W, C)


def unet_res_block(x, p):
    # in_channels == out_channels, stride 1 -> no conv3/norm3 branch
    out = conv3x3(x, p["c1"]["w"], p["c1"]["b"])
    out = group_norm(out, p["n1"]["g"], p["n1"]["b"], act="leaky")
    out = conv3x3(out, p["c2"]["w"], p["c2"]["b"])
    out = group_norm(out, p["n2"]["g"], p["n2"]["b"], act="leaky", residual=x)
    return out


def embeddings_forward(x, params):
    # x: NCDHW (PyTorch layout) -> NDHWC internally
    x = jnp.transpose(x, (0, 2, 3, 4, 1)).astype(jnp.float32)
    x = conv3x3(x, params["stem"]["w"], params["stem"]["b"])
    x1 = conv3x3(x, params["expend1"]["w"], params["expend1"]["b"])
    x = maxpool2(x1)
    for p in params["layer2"]:
        x = mednext_block(x, p)
    x2 = conv3x3(x, params["expend2"]["w"], params["expend2"]["b"])
    x = maxpool2(x2)
    for p in params["layer3"]:
        x = mednext_block(x, p)
    x3 = conv3x3(x, params["expend3"]["w"], params["expend3"]["b"])
    x = maxpool2(x3)
    for p in params["layer4"]:
        x = mednext_block(x, p)
    x4 = conv3x3(x, params["expend4"]["w"], params["expend4"]["b"])
    x = maxpool2(x4)
    for p in params["layer5"]:
        x = mednext_block(x, p)
    x5 = x
    e1 = unet_res_block(x1, params["encoder1"])
    e2 = unet_res_block(x2, params["encoder2"])
    e3 = unet_res_block(x3, params["encoder3"])
    e4 = unet_res_block(x4, params["encoder4"])
    to_nchw = lambda t: jnp.transpose(t, (0, 4, 1, 2, 3))
    return tuple(to_nchw(t) for t in (e1, e2, e3, e4, x5))


# ----------------------------- parameter creation -------------------------------

def _conv_init(key, cin, cout):
    kw, kb = jax.random.split(key)
    bound = 1.0 / math.sqrt(cin * 27)
    return {"w": jax.random.uniform(kw, (3, 3, 3, cin, cout), jnp.float32, -bound, bound),
            "b": jax.random.uniform(kb, (cout,), jnp.float32, -bound, bound)}


def _dw_init(key, c):
    kw, kb = jax.random.split(key)
    bound = 1.0 / math.sqrt(27)
    return {"w": jax.random.uniform(kw, (3, 3, 3, c), jnp.float32, -bound, bound),
            "b": jax.random.uniform(kb, (c,), jnp.float32, -bound, bound)}


def _pw_init(key, cin, cout):
    kw, kb = jax.random.split(key)
    bound = 1.0 / math.sqrt(cin)
    return {"w": jax.random.uniform(kw, (cin, cout), jnp.float32, -bound, bound),
            "b": jax.random.uniform(kb, (cout,), jnp.float32, -bound, bound)}


def _gn_init(c):
    # PyTorch GroupNorm default affine init: weight=1, bias=0
    return {"g": jnp.ones((c,), jnp.float32), "b": jnp.zeros((c,), jnp.float32)}


def _mednext_init(key, c, er):
    k1, k2, k3 = jax.random.split(key, 3)
    return {"dw": _dw_init(k1, c), "gn": _gn_init(c),
            "pw1": _pw_init(k2, c, er * c), "pw2": _pw_init(k3, er * c, c)}


def _unetres_init(key, c):
    k1, k2 = jax.random.split(key)
    return {"c1": _conv_init(k1, c, c), "n1": _gn_init(c),
            "c2": _conv_init(k2, c, c), "n2": _gn_init(c)}


def init_embeddings_params(key, in_channel, channels, depths, exp_r):
    keys = iter(jax.random.split(key, 32))
    p = {}
    p["stem"] = _conv_init(next(keys), in_channel, channels[0])
    p["expend1"] = _conv_init(next(keys), channels[0], channels[1])
    p["expend2"] = _conv_init(next(keys), channels[1], channels[2])
    p["expend3"] = _conv_init(next(keys), channels[2], channels[3])
    p["expend4"] = _conv_init(next(keys), channels[3], channels[4])
    p["layer2"] = [_mednext_init(next(keys), channels[1], exp_r[1]) for _ in range(depths[1])]
    p["layer3"] = [_mednext_init(next(keys), channels[2], exp_r[2]) for _ in range(depths[2])]
    p["layer4"] = [_mednext_init(next(keys), channels[3], exp_r[3]) for _ in range(depths[3])]
    p["layer5"] = [_mednext_init(next(keys), channels[4], exp_r[4]) for _ in range(depths[4])]
    p["encoder1"] = _unetres_init(next(keys), channels[1])
    p["encoder2"] = _unetres_init(next(keys), channels[2])
    p["encoder3"] = _unetres_init(next(keys), channels[3])
    p["encoder4"] = _unetres_init(next(keys), channels[4])
    return p


# ------------------------------------ main ---------------------------------------

if __name__ == "__main__":
    key = jax.random.PRNGKey(0)
    kx, kp, kc = jax.random.split(key, 3)

    # --- micro correctness checks of the conv kernels vs lax references ---
    cin, cout = 8, 16
    xc = jax.random.normal(kc, (1, 4, 6, 5, cin), jnp.float32)
    wc = 0.1 * jax.random.normal(jax.random.PRNGKey(1), (3, 3, 3, cin, cout), jnp.float32)
    bc = 0.1 * jax.random.normal(jax.random.PRNGKey(2), (cout,), jnp.float32)
    ref = jax.lax.conv_general_dilated(
        xc, wc, (1, 1, 1), "SAME",
        dimension_numbers=("NDHWC", "DHWIO", "NDHWC")) + bc
    got = conv3x3(xc, wc, bc)
    assert float(jnp.max(jnp.abs(got - ref))) < 1e-3, "dense conv3x3 mismatch"

    wd = 0.2 * jax.random.normal(jax.random.PRNGKey(3), (3, 3, 3, cin), jnp.float32)
    bd = 0.1 * jax.random.normal(jax.random.PRNGKey(4), (cin,), jnp.float32)
    refd = jax.lax.conv_general_dilated(
        xc, wd[..., None, :], (1, 1, 1), "SAME",
        dimension_numbers=("NDHWC", "DHWIO", "NDHWC"),
        feature_group_count=cin) + bd
    gotd = dwconv3x3(xc, wd, bd)
    assert float(jnp.max(jnp.abs(gotd - refd))) < 1e-3, "depthwise conv3x3 mismatch"

    # --- full forward at a small, structurally-faithful configuration ---
    in_channel = 3
    channels = (8, 16, 16, 24, 32)
    depths = (1, 1, 2, 1, 1)
    exp_r = (2, 2, 2, 2, 2)

    params = init_embeddings_params(kp, in_channel, channels, depths, exp_r)

    # input in PyTorch NCDHW layout: (batch=2, C=3, D=16, H=16, W=16)
    x = jax.random.normal(kx, (2, in_channel, 16, 16, 16), jnp.float32)

    fwd = jax.jit(embeddings_forward)
    outs = jax.block_until_ready(fwd(x, params))

    expected = [
        (2, channels[1], 16, 16, 16),
        (2, channels[2], 8, 8, 8),
        (2, channels[3], 4, 4, 4),
        (2, channels[4], 2, 2, 2),
        (2, channels[4], 1, 1, 1),
    ]
    assert len(outs) == 5
    for o, s in zip(outs, expected):
        assert o.shape == s, (o.shape, s)
        assert bool(jnp.all(jnp.isfinite(o)))
    print("KERNEL_OK")
</pallas_src>

<mosaic_0001>
module attributes {stable_mosaic.version = 11 : i64} {
  func.func @_conv3_tap_kernel(%arg0: i32, %arg1: memref<336x8xf32, #tpu.memory_space<vmem>>, %arg2: memref<336x8xf32, #tpu.memory_space<vmem>>, %arg3: memref<27x8x16xf32, #tpu.memory_space<vmem>>, %arg4: memref<1x16xf32, #tpu.memory_space<vmem>>, %arg5: memref<336x16xf32, #tpu.memory_space<vmem>>, %arg6: memref<672x8xf32, #tpu.memory_space<vmem>>) attributes {dimension_semantics = [#tpu.dimension_semantics<parallel>], iteration_bounds = array<i64: 1>, scalar_prefetch = 0 : i64, scratch_operands = 1 : i64, tpu.core_type = #tpu.core_type<tc>, window_params = [{transform_indices = @transform_0, window_bounds = array<i64: 336, 8>}, {transform_indices = @transform_1, window_bounds = array<i64: 336, 8>}, {pipeline_mode = #tpu.pipeline_mode<synchronous>, transform_indices = @transform_2, window_bounds = array<i64: 27, 8, 16>}, {pipeline_mode = #tpu.pipeline_mode<synchronous>, transform_indices = @transform_3, window_bounds = array<i64: 1, 16>}, {transform_indices = @transform_4, window_bounds = array<i64: 336, 16>}]} {
    %c0 = arith.constant 0 : index
    %c0_0 = arith.constant 0 : index
    %0 = vector.load %arg1[%c0, %c0_0] : memref<336x8xf32, #tpu.memory_space<vmem>>, vector<336x8xf32>
    %c0_1 = arith.constant 0 : index
    %c0_2 = arith.constant 0 : index
    %1 = vector.load %arg6[%c0_1, %c0_2] : memref<672x8xf32, #tpu.memory_space<vmem>>, vector<336x8xf32>
    tpu.vector_store %arg6[%c0_1, %c0_2], %0 {strides = array<i32>} : memref<672x8xf32, #tpu.memory_space<vmem>>, vector<336x8xf32>,
    %c0_3 = arith.constant 0 : index
    %c0_4 = arith.constant 0 : index
    %2 = vector.load %arg2[%c0_3, %c0_4] : memref<336x8xf32, #tpu.memory_space<vmem>>, vector<336x8xf32>
    %c336 = arith.constant 336 : index
    %c0_5 = arith.constant 0 : index
    %3 = vector.load %arg6[%c336, %c0_5] : memref<672x8xf32, #tpu.memory_space<vmem>>, vector<336x8xf32>
    tpu.vector_store %arg6[%c336, %c0_5], %2 {strides = array<i32>} : memref<672x8xf32, #tpu.memory_space<vmem>>, vector<336x8xf32>,
    %c0_6 = arith.constant 0 : index
    %c0_7 = arith.constant 0 : index
    %4 = vector.load %arg6[%c0_6, %c0_7] : memref<672x8xf32, #tpu.memory_space<vmem>>, vector<336x8xf32>
    %c0_8 = arith.constant 0 : index
    %c0_9 = arith.constant 0 : index
    %c0_10 = arith.constant 0 : index
    %5 = vector.load %arg3[%c0_8, %c0_9, %c0_10] : memref<27x8x16xf32, #tpu.memory_space<vmem>>, vector<1x8x16xf32>
    %6 = vector.shape_cast %5 : vector<1x8x16xf32> to vector<8x16xf32>
    %cst = arith.constant dense<0.000000e+00> : vector<336x16xf32>
    %7 = tpu.matmul %4, %6, %cst {dimension_numbers = #tpu.dot_dimension_numbers<[1], [0], [0], [1], [0, 0, 1, 1], [], []>} : vector<336x8xf32>, vector<8x16xf32>, vector<336x16xf32> -> vector<336x16xf32>
    %c1 = arith.constant 1 : index
    %c0_11 = arith.constant 0 : index
    %8 = vector.load %arg6[%c1, %c0_11] : memref<672x8xf32, #tpu.memory_space<vmem>>, vector<336x8xf32>
    %c1_12 = arith.constant 1 : index
    %c0_13 = arith.constant 0 : index
    %c0_14 = arith.constant 0 : index
    %9 = vector.load %arg3[%c1_12, %c0_13, %c0_14] : memref<27x8x16xf32, #tpu.memory_space<vmem>>, vector<1x8x16xf32>
    %10 = vector.shape_cast %9 : vector<1x8x16xf32> to vector<8x16xf32>
    %cst_15 = arith.constant dense<0.000000e+00> : vector<336x16xf32>
    %11 = tpu.matmul %8, %10, %cst_15 {dimension_numbers = #tpu.dot_dimension_numbers<[1], [0], [0], [1], [0, 0, 1, 1], [], []>} : vector<336x8xf32>, vector<8x16xf32>, vector<336x16xf32> -> vector<336x16xf32>
    %12 = arith.addf %7, %11 : vector<336x16xf32>
    %c2 = arith.constant 2 : index
    %c0_16 = arith.constant 0 : index
    %13 = vector.load %arg6[%c2, %c0_16] : memref<672x8xf32, #tpu.memory_space<vmem>>, vector<336x8xf32>
    %c2_17 = arith.constant 2 : index
    %c0_18 = arith.constant 0 : index
    %c0_19 = arith.constant 0 : index
    %14 = vector.load %arg3[%c2_17, %c0_18, %c0_19] : memref<27x8x16xf32, #tpu.memory_space<vmem>>, vector<1x8x16xf32>
    %15 = vector.shape_cast %14 : vector<1x8x16xf32> to vector<8x16xf32>
    %cst_20 = arith.constant dense<0.000000e+00> : vector<336x16xf32>
    %16 = tpu.matmul %13, %15, %cst_20 {dimension_numbers = #tpu.dot_dimension_numbers<[1], [0], [0], [1], [0, 0, 1, 1], [], []>} : vector<336x8xf32>, vector<8x16xf32>, vector<336x16xf32> -> vector<336x16xf32>
    %17 = arith.addf %12, %16 : vector<336x16xf32>
    %c7 = arith.constant 7 : index
    %c0_21 = arith.constant 0 : index
    %18 = vector.load %arg6[%c7, %c0_21] : memref<672x8xf32, #tpu.memory_space<vmem>>, vector<336x8xf32>
    %c3 = arith.constant 3 : index
    %c0_22 = arith.constant 0 : index
    %c0_23 = arith.constant 0 : index
    %19 = vector.load %arg3[%c3, %c0_22, %c0_23] : memref<27x8x16xf32, #tpu.memory_space<vmem>>, vector<1x8x16xf32>
    %20 = vector.shape_cast %19 : vector<1x8x16xf32> to vector<8x16xf32>
    %cst_24 = arith.constant dense<0.000000e+00> : vector<336x16xf32>
    %21 = tpu.matmul %18, %20, %cst_24 {dimension_numbers = #tpu.dot_dimension_numbers<[1], [0], [0], [1], [0, 0, 1, 1], [], []>} : vector<336x8xf32>, vector<8x16xf32>, vector<336x16xf32> -> vector<336x16xf32>
    %22 = arith.addf %17, %21 : vector<336x16xf32>
    %c8 = arith.constant 8 : index
    %c0_25 = arith.constant 0 : index
    %23 = vector.load %arg6[%c8, %c0_25] : memref<672x8xf32, #tpu.memory_space<vmem>>, vector<336x8xf32>
    %c4 = arith.constant 4 : index
    %c0_26 = arith.constant 0 : index
    %c0_27 = arith.constant 0 : index
    %24 = vector.load %arg3[%c4, %c0_26, %c0_27] : memref<27x8x16xf32, #tpu.memory_space<vmem>>, vector<1x8x16xf32>
    %25 = vector.shape_cast %24 : vector<1x8x16xf32> to vector<8x16xf32>
    %cst_28 = arith.constant dense<0.000000e+00> : vector<336x16xf32>
    %26 = tpu.matmul %23, %25, %cst_28 {dimension_numbers = #tpu.dot_dimension_numbers<[1], [0], [0], [1], [0, 0, 1, 1], [], []>} : vector<336x8xf32>, vector<8x16xf32>, vector<336x16xf32> -> vector<336x16xf32>
    %27 = arith.addf %22, %26 : vector<336x16xf32>
    %c9 = arith.constant 9 : index
    %c0_29 = arith.constant 0 : index
    %28 = vector.load %arg6[%c9, %c0_29] : memref<672x8xf32, #tpu.memory_space<vmem>>, vector<336x8xf32>
    %c5 = arith.constant 5 : index
    %c0_30 = arith.constant 0 : index
    %c0_31 = arith.constant 0 : index
    %29 = vector.load %arg3[%c5, %c0_30, %c0_31] : memref<27x8x16xf32, #tpu.memory_space<vmem>>, vector<1x8x16xf32>
    %30 = vector.shape_cast %29 : vector<1x8x16xf32> to vector<8x16xf32>
    %cst_32 = arith.constant dense<0.000000e+00> : vector<336x16xf32>
    %31 = tpu.matmul %28, %30, %cst_32 {dimension_numbers = #tpu.dot_dimension_numbers<[1], [0], [0], [1], [0, 0, 1, 1], [], []>} : vector<336x8xf32>, vector<8x16xf32>, vector<336x16xf32> -> vector<336x16xf32>
    %32 = arith.addf %27, %31 : vector<336x16xf32>
    %c14 = arith.constant 14 : index
    %c0_33 = arith.constant 0 : index
    %33 = vector.load %arg6[%c14, %c0_33] : memref<672x8xf32, #tpu.memory_space<vmem>>, vector<336x8xf32>
    %c6 = arith.constant 6 : index
    %c0_34 = arith.constant 0 : index
    %c0_35 = arith.constant 0 : index
    %34 = vector.load %arg3[%c6, %c0_34, %c0_35] : memref<27x8x16xf32, #tpu.memory_space<vmem>>, vector<1x8x16xf32>
    %35 = vector.shape_cast %34 : vector<1x8x16xf32> to vector<8x16xf32>
    %cst_36 = arith.constant dense<0.000000e+00> : vector<336x16xf32>
    %36 = tpu.matmul %33, %35, %cst_36 {dimension_numbers = #tpu.dot_dimension_numbers<[1], [0], [0], [1], [0, 0, 1, 1], [], []>} : vector<336x8xf32>, vector<8x16xf32>, vector<336x16xf32> -> vector<336x16xf32>
    %37 = arith.addf %32, %36 : vector<336x16xf32>
    %c15 = arith.constant 15 : index
    %c0_37 = arith.constant 0 : index
    %38 = vector.load %arg6[%c15, %c0_37] : memref<672x8xf32, #tpu.memory_space<vmem>>, vector<336x8xf32>
    %c7_38 = arith.constant 7 : index
    %c0_39 = arith.constant 0 : index
    %c0_40 = arith.constant 0 : index
    %39 = vector.load %arg3[%c7_38, %c0_39, %c0_40] : memref<27x8x16xf32, #tpu.memory_space<vmem>>, vector<1x8x16xf32>
    %40 = vector.shape_cast %39 : vector<1x8x16xf32> to vector<8x16xf32>
    %cst_41 = arith.constant dense<0.000000e+00> : vector<336x16xf32>
    %41 = tpu.matmul %38, %40, %cst_41 {dimension_numbers = #tpu.dot_dimension_numbers<[1], [0], [0], [1], [0, 0, 1, 1], [], []>} : vector<336x8xf32>, vector<8x16xf32>, vector<336x16xf32> -> vector<336x16xf32>
    %42 = arith.addf %37, %41 : vector<336x16xf32>
    %c16 = arith.constant 16 : index
    %c0_42 = arith.constant 0 : index
    %43 = vector.load %arg6[%c16, %c0_42] : memref<672x8xf32, #tpu.memory_space<vmem>>, vector<336x8xf32>
    %c8_43 = arith.constant 8 : index
    %c0_44 = arith.constant 0 : index
    %c0_45 = arith.constant 0 : index
    %44 = vector.load %arg3[%c8_43, %c0_44, %c0_45] : memref<27x8x16xf32, #tpu.memory_space<vmem>>, vector<1x8x16xf32>
    %45 = vector.shape_cast %44 : vector<1x8x16xf32> to vector<8x16xf32>
    %cst_46 = arith.constant dense<0.000000e+00> : vector<336x16xf32>
    %46 = tpu.matmul %43, %45, %cst_46 {dimension_numbers = #tpu.dot_dimension_numbers<[1], [0], [0], [1], [0, 0, 1, 1], [], []>} : vector<336x8xf32>, vector<8x16xf32>, vector<336x16xf32> -> vector<336x16xf32>
    %47 = arith.addf %42, %46 : vector<336x16xf32>
    %c56 = arith.constant 56 : index
    %c0_47 = arith.constant 0 : index
    %48 = vector.load %arg6[%c56, %c0_47] : memref<672x8xf32, #tpu.memory_space<vmem>>, vector<336x8xf32>
    %c9_48 = arith.constant 9 : index
    %c0_49 = arith.constant 0 : index
    %c0_50 = arith.constant 0 : index
    %49 = vector.load %arg3[%c9_48, %c0_49, %c0_50] : memref<27x8x16xf32, #tpu.memory_space<vmem>>, vector<1x8x16xf32>
    %50 = vector.shape_cast %49 : vector<1x8x16xf32> to vector<8x16xf32>
    %cst_51 = arith.constant dense<0.000000e+00> : vector<336x16xf32>
    %51 = tpu.matmul %48, %50, %cst_51 {dimension_numbers = #tpu.dot_dimension_numbers<[1], [0], [0], [1], [0, 0, 1, 1], [], []>} : vector<336x8xf32>, vector<8x16xf32>, vector<336x16xf32> -> vector<336x16xf32>
    %52 = arith.addf %47, %51 : vector<336x16xf32>
    %c57 = arith.constant 57 : index
    %c0_52 = arith.constant 0 : index
    %53 = vector.load %arg6[%c57, %c0_52] : memref<672x8xf32, #tpu.memory_space<vmem>>, vector<336x8xf32>
    %c10 = arith.constant 10 : index
    %c0_53 = arith.constant 0 : index
    %c0_54 = arith.constant 0 : index
    %54 = vector.load %arg3[%c10, %c0_53, %c0_54] : memref<27x8x16xf32, #tpu.memory_space<vmem>>, vector<1x8x16xf32>
    %55 = vector.shape_cast %54 : vector<1x8x16xf32> to vector<8x16xf32>
    %cst_55 = arith.constant dense<0.000000e+00> : vector<336x16xf32>
    %56 = tpu.matmul %53, %55, %cst_55 {dimension_numbers = #tpu.dot_dimension_numbers<[1], [0], [0], [1], [0, 0, 1, 1], [], []>} : vector<336x8xf32>, vector<8x16xf32>, vector<336x16xf32> -> vector<336x16xf32>
    %57 = arith.addf %52, %56 : vector<336x16xf32>
    %c58 = arith.constant 58 : index
    %c0_56 = arith.constant 0 : index
    %58 = vector.load %arg6[%c58, %c0_56] : memref<672x8xf32, #tpu.memory_space<vmem>>, vector<336x8xf32>
    %c11 = arith.constant 11 : index
    %c0_57 = arith.constant 0 : index
    %c0_58 = arith.constant 0 : index
    %59 = vector.load %arg3[%c11, %c0_57, %c0_58] : memref<27x8x16xf32, #tpu.memory_space<vmem>>, vector<1x8x16xf32>
    %60 = vector.shape_cast %59 : vector<1x8x16xf32> to vector<8x16xf32>
    %cst_59 = arith.constant dense<0.000000e+00> : vector<336x16xf32>
    %61 = tpu.matmul %58, %60, %cst_59 {dimension_numbers = #tpu.dot_dimension_numbers<[1], [0], [0], [1], [0, 0, 1, 1], [], []>} : vector<336x8xf32>, vector<8x16xf32>, vector<336x16xf32> -> vector<336x16xf32>
    %62 = arith.addf %57, %61 : vector<336x16xf32>
    %c63 = arith.constant 63 : index
    %c0_60 = arith.constant 0 : index
    %63 = vector.load %arg6[%c63, %c0_60] : memref<672x8xf32, #tpu.memory_space<vmem>>, vector<336x8xf32>
    %c12 = arith.constant 12 : index
    %c0_61 = arith.constant 0 : index
    %c0_62 = arith.constant 0 : index
    %64 = vector.load %arg3[%c12, %c0_61, %c0_62] : memref<27x8x16xf32, #tpu.memory_space<vmem>>, vector<1x8x16xf32>
    %65 = vector.shape_cast %64 : vector<1x8x16xf32> to vector<8x16xf32>
    %cst_63 = arith.constant dense<0.000000e+00> : vector<336x16xf32>
    %66 = tpu.matmul %63, %65, %cst_63 {dimension_numbers = #tpu.dot_dimension_numbers<[1], [0], [0], [1], [0, 0, 1, 1], [], []>} : vector<336x8xf32>, vector<8x16xf32>, vector<336x16xf32> -> vector<336x16xf32>
    %67 = arith.addf %62, %66 : vector<336x16xf32>
    %c64 = arith.constant 64 : index
    %c0_64 = arith.constant 0 : index
    %68 = vector.load %arg6[%c64, %c0_64] : memref<672x8xf32, #tpu.memory_space<vmem>>, vector<336x8xf32>
    %c13 = arith.constant 13 : index
    %c0_65 = arith.constant 0 : index
    %c0_66 = arith.constant 0 : index
    %69 = vector.load %arg3[%c13, %c0_65, %c0_66] : memref<27x8x16xf32, #tpu.memory_space<vmem>>, vector<1x8x16xf32>
    %70 = vector.shape_cast %69 : vector<1x8x16xf32> to vector<8x16xf32>
    %cst_67 = arith.constant dense<0.000000e+00> : vector<336x16xf32>
    %71 = tpu.matmul %68, %70, %cst_67 {dimension_numbers = #tpu.dot_dimension_numbers<[1], [0], [0], [1], [0, 0, 1, 1], [], []>} : vector<336x8xf32>, vector<8x16xf32>, vector<336x16xf32> -> vector<336x16xf32>
    %72 = arith.addf %67, %71 : vector<336x16xf32>
    %c65 = arith.constant 65 : index
    %c0_68 = arith.constant 0 : index
    %73 = vector.load %arg6[%c65, %c0_68] : memref<672x8xf32, #tpu.memory_space<vmem>>, vector<336x8xf32>
    %c14_69 = arith.constant 14 : index
    %c0_70 = arith.constant 0 : index
    %c0_71 = arith.constant 0 : index
    %74 = vector.load %arg3[%c14_69, %c0_70, %c0_71] : memref<27x8x16xf32, #tpu.memory_space<vmem>>, vector<1x8x16xf32>
    %75 = vector.shape_cast %74 : vector<1x8x16xf32> to vector<8x16xf32>
    %cst_72 = arith.constant dense<0.000000e+00> : vector<336x16xf32>
    %76 = tpu.matmul %73, %75, %cst_72 {dimension_numbers = #tpu.dot_dimension_numbers<[1], [0], [0], [1], [0, 0, 1, 1], [], []>} : vector<336x8xf32>, vector<8x16xf32>, vector<336x16xf32> -> vector<336x16xf32>
    %77 = arith.addf %72, %76 : vector<336x16xf32>
    %c70 = arith.constant 70 : index
    %c0_73 = arith.constant 0 : index
    %78 = vector.load %arg6[%c70, %c0_73] : memref<672x8xf32, #tpu.memory_space<vmem>>, vector<336x8xf32>
    %c15_74 = arith.constant 15 : index
    %c0_75 = arith.constant 0 : index
    %c0_76 = arith.constant 0 : index
    %79 = vector.load %arg3[%c15_74, %c0_75, %c0_76] : memref<27x8x16xf32, #tpu.memory_space<vmem>>, vector<1x8x16xf32>
    %80 = vector.shape_cast %79 : vector<1x8x16xf32> to vector<8x16xf32>
    %cst_77 = arith.constant dense<0.000000e+00> : vector<336x16xf32>
    %81 = tpu.matmul %78, %80, %cst_77 {dimension_numbers = #tpu.dot_dimension_numbers<[1], [0], [0], [1], [0, 0, 1, 1], [], []>} : vector<336x8xf32>, vector<8x16xf32>, vector<336x16xf32> -> vector<336x16xf32>
    %82 = arith.addf %77, %81 : vector<336x16xf32>
    %c71 = arith.constant 71 : index
    %c0_78 = arith.constant 0 : index
    %83 = vector.load %arg6[%c71, %c0_78] : memref<672x8xf32, #tpu.memory_space<vmem>>, vector<336x8xf32>
    %c16_79 = arith.constant 16 : index
    %c0_80 = arith.constant 0 : index
    %c0_81 = arith.constant 0 : index
    %84 = vector.load %arg3[%c16_79, %c0_80, %c0_81] : memref<27x8x16xf32, #tpu.memory_space<vmem>>, vector<1x8x16xf32>
    %85 = vector.shape_cast %84 : vector<1x8x16xf32> to vector<8x16xf32>
    %cst_82 = arith.constant dense<0.000000e+00> : vector<336x16xf32>
    %86 = tpu.matmul %83, %85, %cst_82 {dimension_numbers = #tpu.dot_dimension_numbers<[1], [0], [0], [1], [0, 0, 1, 1], [], []>} : vector<336x8xf32>, vector<8x16xf32>, vector<336x16xf32> -> vector<336x16xf32>
    %87 = arith.addf %82, %86 : vector<336x16xf32>
    %c72 = arith.constant 72 : index
    %c0_83 = arith.constant 0 : index
    %88 = vector.load %arg6[%c72, %c0_83] : memref<672x8xf32, #tpu.memory_space<vmem>>, vector<336x8xf32>
    %c17 = arith.constant 17 : index
    %c0_84 = arith.constant 0 : index
    %c0_85 = arith.constant 0 : index
    %89 = vector.load %arg3[%c17, %c0_84, %c0_85] : memref<27x8x16xf32, #tpu.memory_space<vmem>>, vector<1x8x16xf32>
    %90 = vector.shape_cast %89 : vector<1x8x16xf32> to vector<8x16xf32>
    %cst_86 = arith.constant dense<0.000000e+00> : vector<336x16xf32>
    %91 = tpu.matmul %88, %90, %cst_86 {dimension_numbers = #tpu.dot_dimension_numbers<[1], [0], [0], [1], [0, 0, 1, 1], [], []>} : vector<336x8xf32>, vector<8x16xf32>, vector<336x16xf32> -> vector<336x16xf32>
    %92 = arith.addf %87, %91 : vector<336x16xf32>
    %c112 = arith.constant 112 : index
    %c0_87 = arith.constant 0 : index
    %93 = vector.load %arg6[%c112, %c0_87] : memref<672x8xf32, #tpu.memory_space<vmem>>, vector<336x8xf32>
    %c18 = arith.constant 18 : index
    %c0_88 = arith.constant 0 : index
    %c0_89 = arith.constant 0 : index
    %94 = vector.load %arg3[%c18, %c0_88, %c0_89] : memref<27x8x16xf32, #tpu.memory_space<vmem>>, vector<1x8x16xf32>
    %95 = vector.shape_cast %94 : vector<1x8x16xf32> to vector<8x16xf32>
    %cst_90 = arith.constant dense<0.000000e+00> : vector<336x16xf32>
    %96 = tpu.matmul %93, %95, %cst_90 {dimension_numbers = #tpu.dot_dimension_numbers<[1], [0], [0], [1], [0, 0, 1, 1], [], []>} : vector<336x8xf32>, vector<8x16xf32>, vector<336x16xf32> -> vector<336x16xf32>
    %97 = arith.addf %92, %96 : vector<336x16xf32>
    %c113 = arith.constant 113 : index
    %c0_91 = arith.constant 0 : index
    %98 = vector.load %arg6[%c113, %c0_91] : memref<672x8xf32, #tpu.memory_space<vmem>>, vector<336x8xf32>
    %c19 = arith.constant 19 : index
    %c0_92 = arith.constant 0 : index
    %c0_93 = arith.constant 0 : index
    %99 = vector.load %arg3[%c19, %c0_92, %c0_93] : memref<27x8x16xf32, #tpu.memory_space<vmem>>, vector<1x8x16xf32>
    %100 = vector.shape_cast %99 : vector<1x8x16xf32> to vector<8x16xf32>
    %cst_94 = arith.constant dense<0.000000e+00> : vector<336x16xf32>
    %101 = tpu.matmul %98, %100, %cst_94 {dimension_numbers = #tpu.dot_dimension_numbers<[1], [0], [0], [1], [0, 0, 1, 1], [], []>} : vector<336x8xf32>, vector<8x16xf32>, vector<336x16xf32> -> vector<336x16xf32>
    %102 = arith.addf %97, %101 : vector<336x16xf32>
    %c114 = arith.constant 114 : index
    %c0_95 = arith.constant 0 : index
    %103 = vector.load %arg6[%c114, %c0_95] : memref<672x8xf32, #tpu.memory_space<vmem>>, vector<336x8xf32>
    %c20 = arith.constant 20 : index
    %c0_96 = arith.constant 0 : index
    %c0_97 = arith.constant 0 : index
    %104 = vector.load %arg3[%c20, %c0_96, %c0_97] : memref<27x8x16xf32, #tpu.memory_space<vmem>>, vector<1x8x16xf32>
    %105 = vector.shape_cast %104 : vector<1x8x16xf32> to vector<8x16xf32>
    %cst_98 = arith.constant dense<0.000000e+00> : vector<336x16xf32>
    %106 = tpu.matmul %103, %105, %cst_98 {dimension_numbers = #tpu.dot_dimension_numbers<[1], [0], [0], [1], [0, 0, 1, 1], [], []>} : vector<336x8xf32>, vector<8x16xf32>, vector<336x16xf32> -> vector<336x16xf32>
    %107 = arith.addf %102, %106 : vector<336x16xf32>
    %c119 = arith.constant 119 : index
    %c0_99 = arith.constant 0 : index
    %108 = vector.load %arg6[%c119, %c0_99] : memref<672x8xf32, #tpu.memory_space<vmem>>, vector<336x8xf32>
    %c21 = arith.constant 21 : index
    %c0_100 = arith.constant 0 : index
    %c0_101 = arith.constant 0 : index
    %109 = vector.load %arg3[%c21, %c0_100, %c0_101] : memref<27x8x16xf32, #tpu.memory_space<vmem>>, vector<1x8x16xf32>
    %110 = vector.shape_cast %109 : vector<1x8x16xf32> to vector<8x16xf32>
    %cst_102 = arith.constant dense<0.000000e+00> : vector<336x16xf32>
    %111 = tpu.matmul %108, %110, %cst_102 {dimension_numbers = #tpu.dot_dimension_numbers<[1], [0], [0], [1], [0, 0, 1, 1], [], []>} : vector<336x8xf32>, vector<8x16xf32>, vector<336x16xf32> -> vector<336x16xf32>
    %112 = arith.addf %107, %111 : vector<336x16xf32>
    %c120 = arith.constant 120 : index
    %c0_103 = arith.constant 0 : index
    %113 = vector.load %arg6[%c120, %c0_103] : memref<672x8xf32, #tpu.memory_space<vmem>>, vector<336x8xf32>
    %c22 = arith.constant 22 : index
    %c0_104 = arith.constant 0 : index
    %c0_105 = arith.constant 0 : index
    %114 = vector.load %arg3[%c22, %c0_104, %c0_105] : memref<27x8x16xf32, #tpu.memory_space<vmem>>, vector<1x8x16xf32>
    %115 = vector.shape_cast %114 : vector<1x8x16xf32> to vector<8x16xf32>
    %cst_106 = arith.constant dense<0.000000e+00> : vector<336x16xf32>
    %116 = tpu.matmul %113, %115, %cst_106 {dimension_numbers = #tpu.dot_dimension_numbers<[1], [0], [0], [1], [0, 0, 1, 1], [], []>} : vector<336x8xf32>, vector<8x16xf32>, vector<336x16xf32> -> vector<336x16xf32>
    %117 = arith.addf %112, %116 : vector<336x16xf32>
    %c121 = arith.constant 121 : index
    %c0_107 = arith.constant 0 : index
    %118 = vector.load %arg6[%c121, %c0_107] : memref<672x8xf32, #tpu.memory_space<vmem>>, vector<336x8xf32>
    %c23 = arith.constant 23 : index
    %c0_108 = arith.constant 0 : index
    %c0_109 = arith.constant 0 : index
    %119 = vector.load %arg3[%c23, %c0_108, %c0_109] : memref<27x8x16xf32, #tpu.memory_space<vmem>>, vector<1x8x16xf32>
    %120 = vector.shape_cast %119 : vector<1x8x16xf32> to vector<8x16xf32>
    %cst_110 = arith.constant dense<0.000000e+00> : vector<336x16xf32>
    %121 = tpu.matmul %118, %120, %cst_110 {dimension_numbers = #tpu.dot_dimension_numbers<[1], [0], [0], [1], [0, 0, 1, 1], [], []>} : vector<336x8xf32>, vector<8x16xf32>, vector<336x16xf32> -> vector<336x16xf32>
    %122 = arith.addf %117, %121 : vector<336x16xf32>
    %c126 = arith.constant 126 : index
    %c0_111 = arith.constant 0 : index
    %123 = vector.load %arg6[%c126, %c0_111] : memref<672x8xf32, #tpu.memory_space<vmem>>, vector<336x8xf32>
    %c24 = arith.constant 24 : index
    %c0_112 = arith.constant 0 : index
    %c0_113 = arith.constant 0 : index
    %124 = vector.load %arg3[%c24, %c0_112, %c0_113] : memref<27x8x16xf32, #tpu.memory_space<vmem>>, vector<1x8x16xf32>
    %125 = vector.shape_cast %124 : vector<1x8x16xf32> to vector<8x16xf32>
    %cst_114 = arith.constant dense<0.000000e+00> : vector<336x16xf32>
    %126 = tpu.matmul %123, %125, %cst_114 {dimension_numbers = #tpu.dot_dimension_numbers<[1], [0], [0], [1], [0, 0, 1, 1], [], []>} : vector<336x8xf32>, vector<8x16xf32>, vector<336x16xf32> -> vector<336x16xf32>
    %127 = arith.addf %122, %126 : vector<336x16xf32>
    %c127 = arith.constant 127 : index
    %c0_115 = arith.constant 0 : index
    %128 = vector.load %arg6[%c127, %c0_115] : memref<672x8xf32, #tpu.memory_space<vmem>>, vector<336x8xf32>
    %c25 = arith.constant 25 : index
    %c0_116 = arith.constant 0 : index
    %c0_117 = arith.constant 0 : index
    %129 = vector.load %arg3[%c25, %c0_116, %c0_117] : memref<27x8x16xf32, #tpu.memory_space<vmem>>, vector<1x8x16xf32>
    %130 = vector.shape_cast %129 : vector<1x8x16xf32> to vector<8x16xf32>
    %cst_118 = arith.constant dense<0.000000e+00> : vector<336x16xf32>
    %131 = tpu.matmul %128, %130, %cst_118 {dimension_numbers = #tpu.dot_dimension_numbers<[1], [0], [0], [1], [0, 0, 1, 1], [], []>} : vector<336x8xf32>, vector<8x16xf32>, vector<336x16xf32> -> vector<336x16xf32>
    %132 = arith.addf %127, %131 : vector<336x16xf32>
    %c128 = arith.constant 128 : index
    %c0_119 = arith.constant 0 : index
    %133 = vector.load %arg6[%c128, %c0_119] : memref<672x8xf32, #tpu.memory_space<vmem>>, vector<336x8xf32>
    %c26 = arith.constant 26 : index
    %c0_120 = arith.constant 0 : index
    %c0_121 = arith.constant 0 : index
    %134 = vector.load %arg3[%c26, %c0_120, %c0_121] : memref<27x8x16xf32, #tpu.memory_space<vmem>>, vector<1x8x16xf32>
    %135 = vector.shape_cast %134 : vector<1x8x16xf32> to vector<8x16xf32>
    %cst_122 = arith.constant dense<0.000000e+00> : vector<336x16xf32>
    %136 = tpu.matmul %133, %135, %cst_122 {dimension_numbers = #tpu.dot_dimension_numbers<[1], [0], [0], [1], [0, 0, 1, 1], [], []>} : vector<336x8xf32>, vector<8x16xf32>, vector<336x16xf32> -> vector<336x16xf32>
    %137 = arith.addf %132, %136 : vector<336x16xf32>
    %c0_123 = arith.constant 0 : index
    %c0_124 = arith.constant 0 : index
    %138 = vector.load %arg4[%c0_123, %c0_124] : memref<1x16xf32, #tpu.memory_space<vmem>>, vector<1x16xf32>
    %139 = vector.broadcast %138 : vector<1x16xf32> to vector<336x16xf32>
    %140 = arith.addf %137, %139 : vector<336x16xf32>
    %c0_125 = arith.constant 0 : index
    %c0_126 = arith.constant 0 : index
    %141 = vector.load %arg5[%c0_125, %c0_126] : memref<336x16xf32, #tpu.memory_space<vmem>>, vector<336x16xf32>
    tpu.vector_store %arg5[%c0_125, %c0_126], %140 {strides = array<i32>} : memref<336x16xf32, #tpu.memory_space<vmem>>, vector<336x16xf32>,
    return
  }
  func.func @transform_0(%arg0: i32) -> (i32, i32) {
    %c0_i32 = arith.constant 0 : i32
    %c0_i32_0 = arith.constant 0 : i32
    return %arg0, %c0_i32 : i32, i32
  }
  func.func @transform_1(%arg0: i32) -> (i32, i32) {
    %c1_i32 = arith.constant 1 : i32
    %0 = arith.addi %arg0, %c1_i32 : i32
    %c0_i32 = arith.constant 0 : i32
    %c0_i32_0 = arith.constant 0 : i32
    return %0, %c0_i32 : i32, i32
  }
  func.func @transform_2(%arg0: i32) -> (i32, i32, i32) {
    %c0_i32 = arith.constant 0 : i32
    %c0_i32_0 = arith.constant 0 : i32
    %c0_i32_1 = arith.constant 0 : i32
    %c0_i32_2 = arith.constant 0 : i32
    return %c0_i32, %c0_i32_0, %c0_i32_1 : i32, i32, i32
  }
  func.func @transform_3(%arg0: i32) -> (i32, i32) {
    %c0_i32 = arith.constant 0 : i32
    %c0_i32_0 = arith.constant 0 : i32
    %c0_i32_1 = arith.constant 0 : i32
    return %c0_i32, %c0_i32_0 : i32, i32
  }
  func.func @transform_4(%arg0: i32) -> (i32, i32) {
    %c0_i32 = arith.constant 0 : i32
    %c0_i32_0 = arith.constant 0 : i32
    return %arg0, %c0_i32 : i32, i32
  }
}

</mosaic_0001>

<bundles_post_ra>
// kernel: tpu_custom_call.1
= control target key start
LH: loop header
LB: loop body
LE: loop exit
PB: predicated region body
PF: predicated region fallthrough
CT: control target
= control target key end

     0   :  { %vm81_vm0 = vcmask 64512   ;;  %vm13321_vm1 = vcmask 130048   ;;  %s21339_s2 = inlined_call_operand.vmem [shape: f32[27,8,16], index: 2, kind: input, shape index: {}]   ;;  %s21340_s0 = inlined_call_operand.vmem [shape: f32[672,8], index: 0, kind: input, shape index: {}]   ;;  %s21341_s1 = inlined_call_operand.vmem [shape: f32[672,8], index: 1, kind: input, shape index: {}]   ;;  %s21342_s3 = inlined_call_operand.vmem [shape: f32[1,16], index: 3, kind: input, shape index: {}]   ;;  %s21343_s4 = inlined_call_operand.vmem [shape: f32[336,16], index: 4, kind: output, shape index: {}]  }
   0x1   :  { %v13974_v0 = vld [vmem:[%s21339_s2 + $0x68] sm:$0xff]  ;;  %v39_v2 = vld [vmem:[%s21340_s0] sm:$0xff]  ;;  %v14017_v5 = vld [vmem:[%s21339_s2 + $0x70] sm:$0xff] }
   0x2   :  { %v13416_v1 = vld [vmem:[%s21339_s2 + $0x8] sm:$0xff]  ;;  %16583 = vmatprep.subr.mxu0 %v13974_v0  ;;  %82 = vst.msk [vmem:[#allocation2] sm:$0xff] %vm81_vm0, %v39_v2  ;;  %v47_v4 = vld [vmem:[%s21340_s0 + $0x40] sm:$0xff]  ;;  %v41_v6 = vld [vmem:[%s21340_s0 + $0x10] sm:$0xff] }
   0x3   :  { %15738 = vmatprep.subr.mxu1 %v13416_v1  ;;  %v40_v3 = vld [vmem:[%s21340_s0 + $0x8] sm:$0xff]  ;;  %16584 = vmatpush3.msra.mxu0 %v13974_v0  ;;  %90 = vst.msk [vmem:[#allocation2 + $0x40] sm:$0xff] %vm81_vm0, %v47_v4  ;;  %v42_v8 = vld [vmem:[%s21340_s0 + $0x18] sm:$0xff]  ;;  %84 = vst.msk [vmem:[#allocation2 + $0x10] sm:$0xff] %vm81_vm0, %v41_v6 }
   0x4   :  { %15739 = vmatpush3.msra.mxu1 %v13416_v1  ;;  %83 = vst.msk [vmem:[#allocation2 + $0x8] sm:$0xff] %vm81_vm0, %v40_v3  ;;  %v48_v7 = vld [vmem:[%s21340_s0 + $0x48] sm:$0xff]  ;;  %16648 = vmatprep.subr.mxu0 %v14017_v5  ;;  %85 = vst.msk [vmem:[#allocation2 + $0x18] sm:$0xff] %vm81_vm0, %v42_v8  ;;  %v250_v9 = vld [vmem:[%s21339_s2] sm:$0xff] }
   0x5   :  { %91 = vst.msk [vmem:[#allocation2 + $0x48] sm:$0xff] %vm81_vm0, %v48_v7  ;;  %v49_v10 = vld [vmem:[%s21340_s0 + $0x50] sm:$0xff]  ;;  %v43_v11 = vld [vmem:[%s21340_s0 + $0x20] sm:$0xff]  ;;  %15803 = vmatprep.subr.mxu1 %v250_v9  ;;  %v50_v12 = vld [vmem:[%s21340_s0 + $0x58] sm:$0xff] }
   0x6   :  { %92 = vst.msk [vmem:[#allocation2 + $0x50] sm:$0xff] %vm81_vm0, %v49_v10  ;;  %86 = vst.msk [vmem:[#allocation2 + $0x20] sm:$0xff] %vm81_vm0, %v43_v11  ;;  %v44_v13 = vld [vmem:[%s21340_s0 + $0x28] sm:$0xff]  ;;  %v51_v14 = vld [vmem:[%s21340_s0 + $0x60] sm:$0xff] }
   0x7   :  { %93 = vst.msk [vmem:[#allocation2 + $0x58] sm:$0xff] %vm81_vm0, %v50_v12  ;;  %87 = vst.msk [vmem:[#allocation2 + $0x28] sm:$0xff] %vm81_vm0, %v44_v13  ;;  %v45_v15 = vld [vmem:[%s21340_s0 + $0x30] sm:$0xff]  ;;  %v52_v16 = vld [vmem:[%s21340_s0 + $0x68] sm:$0xff] }
   0x8   :  { %94 = vst.msk [vmem:[#allocation2 + $0x60] sm:$0xff] %vm81_vm0, %v51_v14  ;;  %v46_v17 = vld [vmem:[%s21340_s0 + $0x38] sm:$0xff]  ;;  %88 = vst.msk [vmem:[#allocation2 + $0x30] sm:$0xff] %vm81_vm0, %v45_v15  ;;  %v53_v18 = vld [vmem:[%s21340_s0 + $0x70] sm:$0xff] }
   0x9   :  { %95 = vst.msk [vmem:[#allocation2 + $0x68] sm:$0xff] %vm81_vm0, %v52_v16  ;;  %89 = vst.msk [vmem:[#allocation2 + $0x38] sm:$0xff] %vm81_vm0, %v46_v17  ;;  %v54_v19 = vld [vmem:[%s21340_s0 + $0x78] sm:$0xff]  ;;  %v55_v20 = vld [vmem:[%s21340_s0 + $0x80] sm:$0xff] }
   0xa   :  { %96 = vst.msk [vmem:[#allocation2 + $0x70] sm:$0xff] %vm81_vm0, %v53_v18  ;;  %97 = vst.msk [vmem:[#allocation2 + $0x78] sm:$0xff] %vm81_vm0, %v54_v19  ;;  %v56_v21 = vld [vmem:[%s21340_s0 + $0x88] sm:$0xff]  ;;  %v57_v22 = vld [vmem:[%s21340_s0 + $0x90] sm:$0xff] }
   0xb   :  { %98 = vst.msk [vmem:[#allocation2 + $0x80] sm:$0xff] %vm81_vm0, %v55_v20  ;;  %v58_v23 = vld [vmem:[%s21340_s0 + $0x98] sm:$0xff]  ;;  %99 = vst.msk [vmem:[#allocation2 + $0x88] sm:$0xff] %vm81_vm0, %v56_v21  ;;  %v59_v24 = vld [vmem:[%s21340_s0 + $0xa0] sm:$0xff] }
   0xc   :  { %100 = vst.msk [vmem:[#allocation2 + $0x90] sm:$0xff] %vm81_vm0, %v57_v22  ;;  %101 = vst.msk [vmem:[#allocation2 + $0x98] sm:$0xff] %vm81_vm0, %v58_v23  ;;  %v60_v25 = vld [vmem:[%s21340_s0 + $0xa8] sm:$0xff]  ;;  %v61_v26 = vld [vmem:[%s21340_s0 + $0xb0] sm:$0xff] }
   0xd   :  { %v251_v27 = vld [vmem:[#allocation2 + $0x1] sm:$0xff]  ;;  %102 = vst.msk [vmem:[#allocation2 + $0xa0] sm:$0xff] %vm81_vm0, %v59_v24  ;;  %103 = vst.msk [vmem:[#allocation2 + $0xa8] sm:$0xff] %vm81_vm0, %v60_v25  ;;  %v62_v29 = vld [vmem:[%s21340_s0 + $0xb8] sm:$0xff] }
   0xe   :  { %v18714_v28 = vld [vmem:[#allocation2 + $0x40] sm:$0xff]  ;;  %104 = vst.msk [vmem:[#allocation2 + $0xb0] sm:$0xff] %vm81_vm0, %v61_v26  ;;  %15740 = vmatprep.mubr.msk.f32.mxu1 %vm81_vm0, %v251_v27  ;;  %v252_v30 = vld [vmem:[#allocation2 + $0x9] sm:$0xff]  ;;  %v253_v32 = vld [vmem:[#allocation2 + $0x11] sm:$0xff] }
   0xf   :  { %16585 = vmatprep.mubr.msk.f32.mxu0 %vm81_vm0, %v18714_v28  ;;  %v18725_v31 = vld [vmem:[#allocation2 + $0x48] sm:$0xff]  ;;  %105 = vst.msk [vmem:[#allocation2 + $0xb8] sm:$0xff] %vm81_vm0, %v62_v29  ;;  %15741 = vmatmul.mubr.msk.f32.vlgmr.msra.gmra.mrb[0].mxu1 %vm81_vm0, %v252_v30  ;;  %v18731_v33 = vld [vmem:[#allocation2 + $0x50] sm:$0xff]  ;;  %v254_v34 = vld [vmem:[#allocation2 + $0x19] sm:$0xff] }
  0x10   :  { %16586 = vmatmul.mubr.msk.f32.vlgmr.msra.gmra.mrb[0].mxu0 %vm81_vm0, %v18725_v31  ;;  %15743 = vmatprep.mubr.msk.f32.mxu1 %vm81_vm0, %v253_v32  ;;  %v18734_v35 = vld [vmem:[#allocation2 + $0x58] sm:$0xff]  ;;  %v255_v36 = vld [vmem:[#allocation2 + $0x21] sm:$0xff]  ;;  %v256_v38 = vld [vmem:[#allocation2 + $0x29] sm:$0xff] }
  0x11   :  { %16649 = vmatpush3.msra.mxu0 %v14017_v5  ;;  %16588 = vmatprep.mubr.msk.f32.mxu0 %vm81_vm0, %v18731_v33  ;;  %v18738_v37 = vld [vmem:[#allocation2 + $0x60] sm:$0xff]  ;;  %v18746_v39 = vld [vmem:[#allocation2 + $0x68] sm:$0xff]  ;;  %v257_v40 = vld [vmem:[#allocation2 + $0x31] sm:$0xff] }
  0x12   :  { %15804 = vmatpush3.msra.mxu1 %v250_v9  ;;  %v18748_v41 = vld [vmem:[#allocation2 + $0x70] sm:$0xff]  ;;  %v18753_v42 = vld [vmem:[#allocation2 + $0x41] sm:$0xff]  ;;  %v258_v43 = vld [vmem:[#allocation2 + $0x39] sm:$0xff] }
  0x13   :  { %15744 = vmatmul.mubr.msk.f32.gmra.mrb[2].mxu1 %vm81_vm0, %v254_v34  ;;  %v18758_v44 = vld [vmem:[#allocation2 + $0x78] sm:$0xff]  ;;  %v63_v45 = vld [vmem:[%s21340_s0 + $0xc0] sm:$0xff]  ;;  %v64_v47 = vld [vmem:[%s21340_s0 + $0xc8] sm:$0xff] }
  0x14   :  { %16589 = vmatmul.mubr.msk.f32.gmra.mrb[2].mxu0 %vm81_vm0, %v18734_v35  ;;  %15746 = vmatprep.mubr.msk.f32.mxu1 %vm81_vm0, %v255_v36  ;;  %v18763_v46 = vld [vmem:[#allocation2 + $0x80] sm:$0xff]  ;;  %106 = vst.msk [vmem:[#allocation2 + $0xc0] sm:$0xff] %vm81_vm0, %v63_v45  ;;  %v65_v48 = vld [vmem:[%s21340_s0 + $0xd0] sm:$0xff]  ;;  %v18774_v50 = vld [vmem:[#allocation2 + $0x88] sm:$0xff] }
  0x15   :  { %16591 = vmatprep.mubr.msk.f32.mxu0 %vm81_vm0, %v18738_v37  ;;  %v18772_v49 = vld [vmem:[#allocation2 + $0x49] sm:$0xff]  ;;  %107 = vst.msk [vmem:[#allocation2 + $0xc8] sm:$0xff] %vm81_vm0, %v64_v47  ;;  %108 = vst.msk [vmem:[#allocation2 + $0xd0] sm:$0xff] %vm81_vm0, %v65_v48  ;;  %v66_v51 = vld [vmem:[%s21340_s0 + $0xd8] sm:$0xff] }
  0x16   :  { %v18784_v52 = vld [vmem:[#allocation2 + $0x51] sm:$0xff]  ;;  %109 = vst.msk [vmem:[#allocation2 + $0xd8] sm:$0xff] %vm81_vm0, %v66_v51  ;;  %v67_v53 = vld [vmem:[%s21340_s0 + $0xe0] sm:$0xff]  ;;  %v68_v54 = vld [vmem:[%s21340_s0 + $0xe8] sm:$0xff] }
  0x17   :  { %15747 = vmatmul.mubr.msk.f32.gmra.mrb[4].mxu1 %vm81_vm0, %v256_v38  ;;  %v18797_v55 = vld [vmem:[#allocation2 + $0x90] sm:$0xff]  ;;  %110 = vst.msk [vmem:[#allocation2 + $0xe0] sm:$0xff] %vm81_vm0, %v67_v53  ;;  %111 = vst.msk [vmem:[#allocation2 + $0xe8] sm:$0xff] %vm81_vm0, %v68_v54  ;;  %v18804_v56 = vld [vmem:[%s21339_s2 + $0x78] sm:$0xff] }
  0x18   :  { %16592 = vmatmul.mubr.msk.f32.gmra.mrb[4].mxu0 %vm81_vm0, %v18746_v39  ;;  %15749 = vmatprep.mubr.msk.f32.mxu1 %vm81_vm0, %v257_v40  ;;  %v69_v57 = vld [vmem:[%s21340_s0 + $0xf0] sm:$0xff]  ;;  %v70_v58 = vld [vmem:[%s21340_s0 + $0xf8] sm:$0xff]  ;;  %v71_v59 = vld [vmem:[%s21340_s0 + $0x100] sm:$0xff] }
  0x19   :  { %16594 = vmatprep.mubr.msk.f32.mxu0 %vm81_vm0, %v18748_v41  ;;  %16713 = vmatprep.subr.mxu0 %v18804_v56  ;;  %112 = vst.msk [vmem:[#allocation2 + $0xf0] sm:$0xff] %vm81_vm0, %v69_v57  ;;  %v72_v60 = vld [vmem:[%s21340_s0 + $0x108] sm:$0xff]  ;;  %113 = vst.msk [vmem:[#allocation2 + $0xf8] sm:$0xff] %vm81_vm0, %v70_v58  ;;  %v73_v61 = vld [vmem:[%s21340_s0 + $0x110] sm:$0xff] }
  0x1a   :  { %114 = vst.msk [vmem:[#allocation2 + $0x100] sm:$0xff] %vm81_vm0, %v71_v59  ;;  %115 = vst.msk [vmem:[#allocation2 + $0x108] sm:$0xff] %vm81_vm0, %v72_v60  ;;  %v74_v62 = vld [vmem:[%s21340_s0 + $0x118] sm:$0xff]  ;;  %v75_v63 = vld [vmem:[%s21340_s0 + $0x120] sm:$0xff] }
  0x1b   :  { %15750 = vmatmul.mubr.msk.f32.gmra.mrb[6].mxu1 %vm81_vm0, %v258_v43  ;;  %116 = vst.msk [vmem:[#allocation2 + $0x110] sm:$0xff] %vm81_vm0, %v73_v61  ;;  %117 = vst.msk [vmem:[#allocation2 + $0x118] sm:$0xff] %vm81_vm0, %v74_v62  ;;  %v76_v0 = vld [vmem:[%s21340_s0 + $0x128] sm:$0xff]  ;;  %v77_v1 = vld [vmem:[%s21340_s0 + $0x130] sm:$0xff] }
  0x1c   :  { %16595 = vmatmul.mubr.msk.f32.gmra.mrb[6].mxu0 %vm81_vm0, %v18758_v44  ;;  %15752 = vmatprep.mubr.msk.f32.mxu1 %vm81_vm0, %v18753_v42  ;;  %118 = vst.msk [vmem:[#allocation2 + $0x120] sm:$0xff] %vm81_vm0, %v75_v63  ;;  %v78_v2 = vld [vmem:[%s21340_s0 + $0x138] sm:$0xff]  ;;  %119 = vst.msk [vmem:[#allocation2 + $0x128] sm:$0xff] %vm81_vm0, %v76_v0  ;;  %v79_v5 = vld [vmem:[%s21340_s0 + $0x140] sm:$0xff] }
  0x1d   :  { %16597 = vmatprep.mubr.msk.f32.mxu0 %vm81_vm0, %v18763_v46  ;;  %v18852_v3 = vld [vmem:[#allocation2 + $0x59] sm:$0xff]  ;;  %120 = vst.msk [vmem:[#allocation2 + $0x130] sm:$0xff] %vm81_vm0, %v77_v1  ;;  %121 = vst.msk [vmem:[#allocation2 + $0x138] sm:$0xff] %vm81_vm0, %v78_v2  ;;  %v18862_v6 = vld [vmem:[#allocation2 + $0x61] sm:$0xff] }
  0x1e   :  { %v18854_v4 = vld [vmem:[#allocation2 + $0x98] sm:$0xff]  ;;  %v18864_v7 = vld [vmem:[#allocation2 + $0xa0] sm:$0xff]  ;;  %122 = vst.msk [vmem:[#allocation2 + $0x140] sm:$0xff] %vm81_vm0, %v79_v5  ;;  %v18875_v8 = vld [vmem:[#allocation2 + $0x69] sm:$0xff] }
  0x1f   :  { %15753 = vmatmul.mubr.msk.f32.gmra.mrb[8].mxu1 %vm81_vm0, %v18772_v49  ;;  %v18877_v9 = vld [vmem:[#allocation2 + $0xa8] sm:$0xff]  ;;  %v18882_v11 = vld [vmem:[#allocation2 + $0x71] sm:$0xff]  ;;  %v18891_v13 = vld [vmem:[#allocation2 + $0x79] sm:$0xff] }
  0x20   :  { %16598 = vmatmul.mubr.msk.f32.gmra.mrb[8].mxu0 %vm81_vm0, %v18774_v50  ;;  %15755 = vmatprep.mubr.msk.f32.mxu1 %vm81_vm0, %v18784_v52  ;;  %v80_v10 = vld [vmem:[%s21340_s0 + $0x148] sm:$0xff]  ;;  %v18884_v12 = vld [vmem:[#allocation2 + $0xb0] sm:$0xff]  ;;  %v18893_v14 = vld [vmem:[#allocation2 + $0xb8] sm:$0xff] }
  0x21   :  { %16600 = vmatprep.mubr.msk.f32.mxu0 %vm81_vm0, %v18797_v55  ;;  %123 = vst.msk [vmem:[#allocation2 + $0x148] sm:$0xff] %vm81_vm0, %v80_v10  ;;  %v18895_v15 = vld [vmem:[#allocation2 + $0x81] sm:$0xff]  ;;  %v13374_v17 = vld [vmem:[%s21341_s1 + $0x150] sm:$0xff]  ;;  %v18923_v22 = vld [vmem:[#allocation2 + $0x99] sm:$0xff] }
  0x22   :  { %v18901_v16 = vld [vmem:[#allocation2 + $0xc0] sm:$0xff]  ;;  %166 = vst.msk [vmem:[#allocation2 + $0x150] sm:$0xff] %vm81_vm0, %v13374_v17  ;;  %v18907_v18 = vld [vmem:[#allocation2 + $0x89] sm:$0xff]  ;;  %v18915_v20 = vld [vmem:[#allocation2 + $0x91] sm:$0xff] }
  0x23   :  { %15756 = vmatmul.mubr.msk.f32.gmra.mrb[10].mxu1 %vm81_vm0, %v18852_v3  ;;  %v18909_v19 = vld [vmem:[#allocation2 + $0xc8] sm:$0xff]  ;;  %v18921_v21 = vld [vmem:[#allocation2 + $0xd0] sm:$0xff]  ;;  %v18925_v23 = vld [vmem:[#allocation2 + $0xd8] sm:$0xff] }
  0x24   :  { %16601 = vmatmul.mubr.msk.f32.gmra.mrb[10].mxu0 %vm81_vm0, %v18854_v4  ;;  %15758 = vmatprep.mubr.msk.f32.mxu1 %vm81_vm0, %v18862_v6  ;;  %v18931_v24 = vld [vmem:[#allocation2 + $0xa1] sm:$0xff]  ;;  %v18946_v26 = vld [vmem:[%s21339_s2 + $0x10] sm:$0xff]  ;;  %v13375_v32 = vld [vmem:[%s21341_s1 + $0x158] sm:$0xff] }
  0x25   :  { %16603 = vmatprep.mubr.msk.f32.mxu0 %vm81_vm0, %v18864_v7  ;;  %v18937_v25 = vld [vmem:[#allocation2 + $0xe0] sm:$0xff]  ;;  %v18952_v27 = vld [vmem:[#allocation2 + $0xa9] sm:$0xff]  ;;  %v18956_v30 = vld [vmem:[#allocation2 + $0xb1] sm:$0xff]  ;;  %15868 = vmatprep.subr.mxu1 %v18946_v26  ;;  %167 = vst.msk [vmem:[#allocation2 + $0x158] sm:$0xff] %vm81_vm0, %v13375_v32 }
  0x26   :  { %v18954_v29 = vld [vmem:[#allocation2 + $0xe8] sm:$0xff]  ;;  %v13376_v34 = vld [vmem:[%s21341_s1 + $0x160] sm:$0xff]  ;;  %v13378_v38 = vld [vmem:[%s21341_s1 + $0x170] sm:$0xff] }
  0x27   :  { %15759 = vmatmul.mubr.msk.f32.gmra.mrb[12].mxu1 %vm81_vm0, %v18875_v8  ;;  %v13377_v36 = vld [vmem:[%s21341_s1 + $0x168] sm:$0xff]  ;;  %168 = vst.msk [vmem:[#allocation2 + $0x160] sm:$0xff] %vm81_vm0, %v13376_v34  ;;  %v13379_v40 = vld [vmem:[%s21341_s1 + $0x178] sm:$0xff]  ;;  %v13380_v43 = vld [vmem:[%s21341_s1 + $0x180] sm:$0xff] }
  0x28   :  { %16604 = vmatmul.mubr.msk.f32.gmra.mrb[12].mxu0 %vm81_vm0, %v18877_v9  ;;  %15761 = vmatprep.mubr.msk.f32.mxu1 %vm81_vm0, %v18882_v11  ;;  %169 = vst.msk [vmem:[#allocation2 + $0x168] sm:$0xff] %vm81_vm0, %v13377_v36  ;;  %170 = vst.msk [vmem:[#allocation2 + $0x170] sm:$0xff] %vm81_vm0, %v13378_v38  ;;  %v13381_v45 = vld [vmem:[%s21341_s1 + $0x188] sm:$0xff]  ;;  %v13382_v47 = vld [vmem:[%s21341_s1 + $0x190] sm:$0xff] }
  0x29   :  { %16606 = vmatprep.mubr.msk.f32.mxu0 %vm81_vm0, %v18884_v12  ;;  %171 = vst.msk [vmem:[#allocation2 + $0x178] sm:$0xff] %vm81_vm0, %v13379_v40  ;;  %172 = vst.msk [vmem:[#allocation2 + $0x180] sm:$0xff] %vm81_vm0, %v13380_v43  ;;  %v274_v48 = vld [vmem:[#allocation2 + $0xb9] sm:$0xff]  ;;  %v275_v51 = vld [vmem:[#allocation2 + $0xc1] sm:$0xff] }
  0x2a   :  { %173 = vst.msk [vmem:[#allocation2 + $0x188] sm:$0xff] %vm81_vm0, %v13381_v45  ;;  %174 = vst.msk [vmem:[#allocation2 + $0x190] sm:$0xff] %vm81_vm0, %v13382_v47  ;;  %v19002_v53 = vld [vmem:[%s21339_s2 + $0x80] sm:$0xff]  ;;  %v277_v54 = vld [vmem:[#allocation2 + $0xd1] sm:$0xff] }
  0x2b   :  { %15762 = vmatmul.mubr.msk.f32.gmra.mrb[14].mxu1 %vm81_vm0, %v18891_v13  ;;  %v281_v57 = vld [vmem:[#allocation2 + $0xf1] sm:$0xff]  ;;  %v282_v58 = vld [vmem:[#allocation2 + $0xf9] sm:$0xff]  ;;  %v283_v59 = vld [vmem:[#allocation2 + $0x101] sm:$0xff] }
  0x2c   :  { %16607 = vmatmul.mubr.msk.f32.gmra.mrb[14].mxu0 %vm81_vm0, %v18893_v14  ;;  %15764 = vmatprep.mubr.msk.f32.mxu1 %vm81_vm0, %v18895_v15  ;;  %v284_v60 = vld [vmem:[#allocation2 + $0x109] sm:$0xff]  ;;  %v285_v61 = vld [vmem:[#allocation2 + $0x111] sm:$0xff]  ;;  %v286_v62 = vld [vmem:[#allocation2 + $0x119] sm:$0xff] }
  0x2d   :  { %16609 = vmatprep.mubr.msk.f32.mxu0 %vm81_vm0, %v18901_v16  ;;  %v287_v63 = vld [vmem:[#allocation2 + $0x121] sm:$0xff]  ;;  %v288_v0 = vld [vmem:[#allocation2 + $0x129] sm:$0xff]  ;;  %v289_v1 = vld [vmem:[#allocation2 + $0x131] sm:$0xff] }
  0x2e   :  { %v290_v2 = vld [vmem:[#allocation2 + $0x139] sm:$0xff]  ;;  %v292_v5 = vld [vmem:[#allocation2 + $0x149] sm:$0xff] }
  0x2f   :  { %15765 = vmatmul.mubr.msk.f32.gmra.mrb[16].mxu1 %vm81_vm0, %v18907_v18  ;;  %v210_v10 = vld [vmem:[#allocation2 + $0x10] sm:$0xff]  ;;  %v213_v17 = vld [vmem:[#allocation2 + $0x28] sm:$0xff]  ;;  %v19179_v32 = vld [vmem:[#allocation2 + $0x118] sm:$0xff] }
  0x30   :  { %16610 = vmatmul.mubr.msk.f32.gmra.mrb[16].mxu0 %vm81_vm0, %v18909_v19  ;;  %15767 = vmatprep.mubr.msk.f32.mxu1 %vm81_vm0, %v18915_v20  ;;  %v7441_v34 = vld [vmem:[#allocation2 + $0xae] sm:$0xff]  ;;  %v19181_v36 = vld [vmem:[#allocation2 + $0x120] sm:$0xff]  ;;  %v7442_v38 = vld [vmem:[#allocation2 + $0xb6] sm:$0xff] }
  0x31   :  { %16612 = vmatprep.mubr.msk.f32.mxu0 %vm81_vm0, %v18921_v21  ;;  %v19189_v40 = vld [vmem:[#allocation2 + $0x128] sm:$0xff]  ;;  %v7443_v43 = vld [vmem:[#allocation2 + $0xbe] sm:$0xff]  ;;  %v19191_v45 = vld [vmem:[#allocation2 + $0x130] sm:$0xff] }
  0x32   :  { %v7444_v47 = vld [vmem:[#allocation2 + $0xc6] sm:$0xff] }
  0x33   :  { %15768 = vmatmul.mubr.msk.f32.gmra.mrb[18].mxu1 %vm81_vm0, %v18923_v22 }
  0x34   :  { %16613 = vmatmul.mubr.msk.f32.gmra.mrb[18].mxu0 %vm81_vm0, %v18925_v23  ;;  %15770 = vmatprep.mubr.msk.f32.mxu1 %vm81_vm0, %v18931_v24 }
  0x35   :  { %16615 = vmatprep.mubr.msk.f32.mxu0 %vm81_vm0, %v18937_v25 }
  0x37   :  { %15771 = vmatmul.mubr.msk.f32.gmra.mrb[20].mxu1 %vm81_vm0, %v18952_v27 }
  0x38   :  { %16616 = vmatmul.mubr.msk.f32.gmra.mrb[20].mxu0 %vm81_vm0, %v18954_v29  ;;  %15773 = vmatprep.mubr.msk.f32.mxu1 %vm81_vm0, %v18956_v30 }
  0x39   :  { %16650 = vmatprep.mubr.msk.f32.mxu0 %vm81_vm0, %v18753_v42  ;;  %v276_v42 = vld [vmem:[#allocation2 + $0xc9] sm:$0xff] }
  0x3b   :  { %15774 = vmatmul.mubr.msk.f32.gmra.mrb[22].mxu1 %vm81_vm0, %v274_v48 }
  0x3c   :  { %16651 = vmatmul.mubr.msk.f32.vlgmr.msra.gmra.mrb[0].mxu0 %vm81_vm0, %v18772_v49  ;;  %15776 = vmatprep.mubr.msk.f32.mxu1 %vm81_vm0, %v275_v51  ;;  %v278_v49 = vld [vmem:[#allocation2 + $0xd9] sm:$0xff] }
  0x3d   :  { %16714 = vmatpush3.msra.mxu0 %v18804_v56  ;;  %16653 = vmatprep.mubr.msk.f32.mxu0 %vm81_vm0, %v18784_v52  ;;  %v279_v56 = vld [vmem:[#allocation2 + $0xe1] sm:$0xff]  ;;  %v280_v52 = vld [vmem:[#allocation2 + $0xe9] sm:$0xff] }
  0x3e   :  { %16778 = vmatprep.subr.mxu0 %v19002_v53 }
  0x3f   :  { %15777 = vmatmul.mubr.msk.f32.gmra.mrb[24].mxu1 %vm81_vm0, %v276_v42 }
  0x40   :  { %16654 = vmatmul.mubr.msk.f32.gmra.mrb[2].mxu0 %vm81_vm0, %v18852_v3  ;;  %15779 = vmatprep.mubr.msk.f32.mxu1 %vm81_vm0, %v277_v54  ;;  %v291_v3 = vld [vmem:[#allocation2 + $0x141] sm:$0xff] }
  0x41   :  { %16656 = vmatprep.mubr.msk.f32.mxu0 %vm81_vm0, %v18862_v6  ;;  %v208_v6 = vld [vmem:[#allocation2] sm:$0xff] }
  0x43   :  { %15780 = vmatmul.mubr.msk.f32.gmra.mrb[26].mxu1 %vm81_vm0, %v278_v49 }
  0x44   :  { %16657 = vmatmul.mubr.msk.f32.gmra.mrb[4].mxu0 %vm81_vm0, %v18875_v8  ;;  %15782 = vmatprep.mubr.msk.f32.mxu1 %vm81_vm0, %v279_v56  ;;  %v209_v8 = vld [vmem:[#allocation2 + $0x8] sm:$0xff] }
  0x45   :  { %16659 = vmatprep.mubr.msk.f32.mxu0 %vm81_vm0, %v18882_v11  ;;  %v19065_v11 = vld [vmem:[%s21339_s2 + $0x18] sm:$0xff] }
  0x47   :  { %15783 = vmatmul.mubr.msk.f32.gmra.mrb[28].mxu1 %vm81_vm0, %v280_v52 }
  0x48   :  { %16660 = vmatmul.mubr.msk.f32.gmra.mrb[6].mxu0 %vm81_vm0, %v18891_v13  ;;  %15785 = vmatprep.mubr.msk.f32.mxu1 %vm81_vm0, %v281_v57  ;;  %v211_v13 = vld [vmem:[#allocation2 + $0x18] sm:$0xff] }
  0x49   :  { %16662 = vmatprep.mubr.msk.f32.mxu0 %vm81_vm0, %v18895_v15  ;;  %v212_v15 = vld [vmem:[#allocation2 + $0x20] sm:$0xff] }
  0x4b   :  { %15786 = vmatmul.mubr.msk.f32.gmra.mrb[30].mxu1 %vm81_vm0, %v282_v58 }
  0x4c   :  { %16663 = vmatmul.mubr.msk.f32.gmra.mrb[8].mxu0 %vm81_vm0, %v18907_v18  ;;  %15788 = vmatprep.mubr.msk.f32.mxu1 %vm81_vm0, %v283_v59  ;;  %v214_v18 = vld [vmem:[#allocation2 + $0x30] sm:$0xff] }
  0x4d   :  { %16665 = vmatprep.mubr.msk.f32.mxu0 %vm81_vm0, %v18915_v20  ;;  %v215_v20 = vld [vmem:[#allocation2 + $0x38] sm:$0xff] }
  0x4f   :  { %15789 = vmatmul.mubr.msk.f32.gmra.mrb[32].mxu1 %vm81_vm0, %v284_v60 }
  0x50   :  { %16666 = vmatmul.mubr.msk.f32.gmra.mrb[10].mxu0 %vm81_vm0, %v18923_v22  ;;  %15791 = vmatprep.mubr.msk.f32.mxu1 %vm81_vm0, %v285_v61  ;;  %v7436_v22 = vld [vmem:[#allocation2 + $0x86] sm:$0xff] }
  0x51   :  { %16668 = vmatprep.mubr.msk.f32.mxu0 %vm81_vm0, %v18931_v24  ;;  %v19161_v24 = vld [vmem:[#allocation2 + $0x100] sm:$0xff] }
  0x53   :  { %15792 = vmatmul.mubr.msk.f32.gmra.mrb[34].mxu1 %vm81_vm0, %v286_v62 }
  0x54   :  { %16669 = vmatmul.mubr.msk.f32.gmra.mrb[12].mxu0 %vm81_vm0, %v18952_v27  ;;  %15794 = vmatprep.mubr.msk.f32.mxu1 %vm81_vm0, %v287_v63  ;;  %v7439_v27 = vld [vmem:[#allocation2 + $0x9e] sm:$0xff] }
  0x55   :  { %16671 = vmatprep.mubr.msk.f32.mxu0 %vm81_vm0, %v18956_v30  ;;  %v7440_v30 = vld [vmem:[#allocation2 + $0xa6] sm:$0xff] }
  0x57   :  { %15795 = vmatmul.mubr.msk.f32.gmra.mrb[36].mxu1 %vm81_vm0, %v288_v0 }
  0x58   :  { %16672 = vmatmul.mubr.msk.f32.gmra.mrb[14].mxu0 %vm81_vm0, %v274_v48  ;;  %15797 = vmatprep.mubr.msk.f32.mxu1 %vm81_vm0, %v289_v1  ;;  %v19199_v48 = vld [vmem:[#allocation2 + $0x138] sm:$0xff] }
  0x59   :  { %16674 = vmatprep.mubr.msk.f32.mxu0 %vm81_vm0, %v275_v51  ;;  %v7445_v51 = vld [vmem:[#allocation2 + $0xce] sm:$0xff] }
  0x5b   :  { %15798 = vmatmul.mubr.msk.f32.gmra.mrb[38].mxu1 %vm81_vm0, %v290_v2 }
  0x5c   :  { %16675 = vmatmul.mubr.msk.f32.gmra.mrb[16].mxu0 %vm81_vm0, %v276_v42  ;;  %15800 = vmatprep.mubr.msk.f32.mxu1 %vm81_vm0, %v291_v3  ;;  %v7446_v42 = vld [vmem:[#allocation2 + $0xd6] sm:$0xff] }
  0x5d   :  { %16677 = vmatprep.mubr.msk.f32.mxu0 %vm81_vm0, %v277_v54  ;;  %v19209_v54 = vld [vmem:[#allocation2 + $0x148] sm:$0xff] }
  0x5f   :  { %15801 = vmatmul.mubr.msk.f32.gmra.mrb[40].mxu1 %vm81_vm0, %v292_v5 }
  0x60   :  { %16678 = vmatmul.mubr.msk.f32.gmra.mrb[18].mxu0 %vm81_vm0, %v278_v49  ;;  %15805 = vmatprep.mubr.msk.f32.mxu1 %vm81_vm0, %v208_v6  ;;  %v7447_v49 = vld [vmem:[#allocation2 + $0xde] sm:$0xff]  ;;  %v7454_v6 = vld [vmem:[#allocation2 + $0x116] sm:$0xff] }
  0x61   :  { %16680 = vmatprep.mubr.msk.f32.mxu0 %vm81_vm0, %v279_v56  ;;  %v1097_v56 = vld [vmem:[#allocation2 + $0x2] sm:$0xff] }
  0x63   :  { %15806 = vmatmul.mubr.msk.f32.vlgmr.msra.gmra.mrb[0].mxu1 %vm81_vm0, %v209_v8  ;;  %v1104_v8 = vld [vmem:[#allocation2 + $0x3a] sm:$0xff] }
  0x64   :  { %16681 = vmatmul.mubr.msk.f32.gmra.mrb[20].mxu0 %vm81_vm0, %v280_v52  ;;  %15808 = vmatprep.mubr.msk.f32.mxu1 %vm81_vm0, %v210_v10  ;;  %v7448_v52 = vld [vmem:[#allocation2 + $0xe6] sm:$0xff]  ;;  %v7455_v10 = vld [vmem:[#allocation2 + $0x11e] sm:$0xff] }
  0x65   :  { %16683 = vmatprep.mubr.msk.f32.mxu0 %vm81_vm0, %v281_v57  ;;  %15869 = vmatpush3.msra.mxu1 %v18946_v26  ;;  %v19169_v26 = vld [vmem:[#allocation2 + $0x108] sm:$0xff] }
  0x66   :  { %15933 = vmatprep.subr.mxu1 %v19065_v11  ;;  %v1098_v57 = vld [vmem:[#allocation2 + $0xa] sm:$0xff] }
  0x67   :  { %15809 = vmatmul.mubr.msk.f32.gmra.mrb[2].mxu1 %vm81_vm0, %v211_v13  ;;  %v7456_v13 = vld [vmem:[#allocation2 + $0x126] sm:$0xff] }
  0x68   :  { %16684 = vmatmul.mubr.msk.f32.gmra.mrb[22].mxu0 %vm81_vm0, %v282_v58  ;;  %15811 = vmatprep.mubr.msk.f32.mxu1 %vm81_vm0, %v212_v15  ;;  %v7449_v58 = vld [vmem:[#allocation2 + $0xee] sm:$0xff] }
  0x69   :  { %16686 = vmatprep.mubr.msk.f32.mxu0 %vm81_vm0, %v283_v59  ;;  %v1099_v59 = vld [vmem:[#allocation2 + $0x12] sm:$0xff]  ;;  %v1106_v15 = vld [vmem:[#allocation2 + $0x4a] sm:$0xff] }
  0x6b   :  { %15812 = vmatmul.mubr.msk.f32.gmra.mrb[4].mxu1 %vm81_vm0, %v213_v17  ;;  %v7457_v17 = vld [vmem:[#allocation2 + $0x12e] sm:$0xff] }
  0x6c   :  { %16687 = vmatmul.mubr.msk.f32.gmra.mrb[24].mxu0 %vm81_vm0, %v284_v60  ;;  %15814 = vmatprep.mubr.msk.f32.mxu1 %vm81_vm0, %v214_v18  ;;  %v7450_v60 = vld [vmem:[#allocation2 + $0xf6] sm:$0xff] }
  0x6d   :  { %16689 = vmatprep.mubr.msk.f32.mxu0 %vm81_vm0, %v285_v61  ;;  %v19221_v61 = vld [vmem:[%s21339_s2 + $0x20] sm:$0xff]  ;;  %v1107_v18 = vld [vmem:[#allocation2 + $0x52] sm:$0xff] }
  0x6f   :  { %15815 = vmatmul.mubr.msk.f32.gmra.mrb[6].mxu1 %vm81_vm0, %v215_v20  ;;  %v7458_v20 = vld [vmem:[#allocation2 + $0x136] sm:$0xff] }
  0x70   :  { %16690 = vmatmul.mubr.msk.f32.gmra.mrb[26].mxu0 %vm81_vm0, %v286_v62  ;;  %15817 = vmatprep.mubr.msk.f32.mxu1 %vm81_vm0, %v18714_v28  ;;  %v6975_v28 = vld [vmem:[#allocation2 + $0x151] sm:$0xff]  ;;  %v1100_v62 = vld [vmem:[#allocation2 + $0x1a] sm:$0xff] }
  0x71   :  { %16692 = vmatprep.mubr.msk.f32.mxu0 %vm81_vm0, %v287_v63  ;;  %v7451_v63 = vld [vmem:[#allocation2 + $0xfe] sm:$0xff] }
  0x73   :  { %15818 = vmatmul.mubr.msk.f32.gmra.mrb[8].mxu1 %vm81_vm0, %v18725_v31  ;;  %v6976_v31 = vld [vmem:[#allocation2 + $0x159] sm:$0xff] }
  0x74   :  { %16693 = vmatmul.mubr.msk.f32.gmra.mrb[28].mxu0 %vm81_vm0, %v288_v0  ;;  %15820 = vmatprep.mubr.msk.f32.mxu1 %vm81_vm0, %v18731_v33  ;;  %v6977_v33 = vld [vmem:[#allocation2 + $0x161] sm:$0xff] }
  0x75   :  { %16695 = vmatprep.mubr.msk.f32.mxu0 %vm81_vm0, %v289_v1  ;;  %v1101_v0 = vld [vmem:[#allocation2 + $0x22] sm:$0xff] }
  0x76   :  { %v7452_v1 = vld [vmem:[#allocation2 + $0x106] sm:$0xff] }
  0x77   :  { %15821 = vmatmul.mubr.msk.f32.gmra.mrb[10].mxu1 %vm81_vm0, %v18734_v35  ;;  %v6978_v35 = vld [vmem:[#allocation2 + $0x169] sm:$0xff] }
  0x78   :  { %16696 = vmatmul.mubr.msk.f32.gmra.mrb[30].mxu0 %vm81_vm0, %v290_v2  ;;  %15823 = vmatprep.mubr.msk.f32.mxu1 %vm81_vm0, %v18738_v37  ;;  %v6979_v37 = vld [vmem:[#allocation2 + $0x171] sm:$0xff] }
  0x79   :  { %16698 = vmatprep.mubr.msk.f32.mxu0 %vm81_vm0, %v291_v3  ;;  %v1102_v2 = vld [vmem:[#allocation2 + $0x2a] sm:$0xff] }
  0x7a   :  { %v7453_v3 = vld [vmem:[#allocation2 + $0x10e] sm:$0xff] }
  0x7b   :  { %15824 = vmatmul.mubr.msk.f32.gmra.mrb[12].mxu1 %vm81_vm0, %v18746_v39  ;;  %v6980_v39 = vld [vmem:[#allocation2 + $0x179] sm:$0xff] }
  0x7c   :  { %16699 = vmatmul.mubr.msk.f32.gmra.mrb[32].mxu0 %vm81_vm0, %v292_v5  ;;  %15826 = vmatprep.mubr.msk.f32.mxu1 %vm81_vm0, %v18748_v41  ;;  %v6981_v41 = vld [vmem:[#allocation2 + $0x181] sm:$0xff]  ;;  %v1103_v5 = vld [vmem:[#allocation2 + $0x32] sm:$0xff] }
  0x7d   :  { %16701 = vmatprep.mubr.msk.f32.mxu0 %vm81_vm0, %v6975_v28  ;;  %v1108_v28 = vld [vmem:[#allocation2 + $0x5a] sm:$0xff] }
  0x7f   :  { %15827 = vmatmul.mubr.msk.f32.gmra.mrb[14].mxu1 %vm81_vm0, %v18758_v44  ;;  %v6982_v44 = vld [vmem:[#allocation2 + $0x189] sm:$0xff] }
  0x80   :  { %16702 = vmatmul.mubr.msk.f32.gmra.mrb[34].mxu0 %vm81_vm0, %v6976_v31  ;;  %15829 = vmatprep.mubr.msk.f32.mxu1 %vm81_vm0, %v18763_v46  ;;  %v7428_v46 = vld [vmem:[#allocation2 + $0x46] sm:$0xff]  ;;  %v7459_v31 = vld [vmem:[#allocation2 + $0x13e] sm:$0xff] }
  0x81   :  { %16704 = vmatprep.mubr.msk.f32.mxu0 %vm81_vm0, %v6977_v33  ;;  %v1109_v33 = vld [vmem:[#allocation2 + $0x62] sm:$0xff] }
  0x83   :  { %15830 = vmatmul.mubr.msk.f32.gmra.mrb[16].mxu1 %vm81_vm0, %v18774_v50  ;;  %v7429_v50 = vld [vmem:[#allocation2 + $0x4e] sm:$0xff] }
  0x84   :  { %16705 = vmatmul.mubr.msk.f32.gmra.mrb[36].mxu0 %vm81_vm0, %v6978_v35  ;;  %15832 = vmatprep.mubr.msk.f32.mxu1 %vm81_vm0, %v18797_v55  ;;  %v7430_v55 = vld [vmem:[#allocation2 + $0x56] sm:$0xff]  ;;  %v7460_v35 = vld [vmem:[#allocation2 + $0x146] sm:$0xff] }
  0x85   :  { %16707 = vmatprep.mubr.msk.f32.mxu0 %vm81_vm0, %v6979_v37  ;;  %v1110_v37 = vld [vmem:[#allocation2 + $0x6a] sm:$0xff] }
  0x87   :  { %15833 = vmatmul.mubr.msk.f32.gmra.mrb[18].mxu1 %vm81_vm0, %v18854_v4  ;;  %v19129_v4 = vld [vmem:[%s21339_s2 + $0x88] sm:$0xff] }
  0x88   :  { %16708 = vmatmul.mubr.msk.f32.gmra.mrb[38].mxu0 %vm81_vm0, %v6980_v39  ;;  %15835 = vmatprep.mubr.msk.f32.mxu1 %vm81_vm0, %v18864_v7  ;;  %v7431_v7 = vld [vmem:[#allocation2 + $0x5e] sm:$0xff]  ;;  %v7461_v39 = vld [vmem:[#allocation2 + $0x14e] sm:$0xff] }
  0x89   :  { %16710 = vmatprep.mubr.msk.f32.mxu0 %vm81_vm0, %v6981_v41  ;;  %v1111_v41 = vld [vmem:[#allocation2 + $0x72] sm:$0xff] }
  0x8b   :  { %15836 = vmatmul.mubr.msk.f32.gmra.mrb[20].mxu1 %vm81_vm0, %v18877_v9  ;;  %v7432_v9 = vld [vmem:[#allocation2 + $0x66] sm:$0xff] }
  0x8c   :  { %16711 = vmatmul.mubr.msk.f32.gmra.mrb[40].mxu0 %vm81_vm0, %v6982_v44  ;;  %15838 = vmatprep.mubr.msk.f32.mxu1 %vm81_vm0, %v18884_v12  ;;  %v7433_v12 = vld [vmem:[#allocation2 + $0x6e] sm:$0xff]  ;;  %v7462_v44 = vld [vmem:[#allocation2 + $0x156] sm:$0xff] }
  0x8d   :  { %16715 = vmatprep.mubr.msk.f32.mxu0 %vm81_vm0, %v7428_v46  ;;  %v1112_v46 = vld [vmem:[#allocation2 + $0x7a] sm:$0xff] }
  0x8f   :  { %15839 = vmatmul.mubr.msk.f32.gmra.mrb[22].mxu1 %vm81_vm0, %v18893_v14  ;;  %v7434_v14 = vld [vmem:[#allocation2 + $0x76] sm:$0xff] }
  0x90   :  { %16716 = vmatmul.mubr.msk.f32.vlgmr.msra.gmra.mrb[0].mxu0 %vm81_vm0, %v7429_v50  ;;  %15841 = vmatprep.mubr.msk.f32.mxu1 %vm81_vm0, %v18901_v16  ;;  %v7435_v16 = vld [vmem:[#allocation2 + $0x7e] sm:$0xff] }
  0x91   :  { %16779 = vmatpush3.msra.mxu0 %v19002_v53  ;;  %16718 = vmatprep.mubr.msk.f32.mxu0 %vm81_vm0, %v7430_v55  ;;  %v19201_v53 = vld [vmem:[#allocation2 + $0x140] sm:$0xff] }
  0x92   :  { %16843 = vmatprep.subr.mxu0 %v19129_v4  ;;  %v7463_v50 = vld [vmem:[#allocation2 + $0x15e] sm:$0xff] }
  0x93   :  { %15842 = vmatmul.mubr.msk.f32.gmra.mrb[24].mxu1 %vm81_vm0, %v18909_v19  ;;  %v19151_v19 = vld [vmem:[#allocation2 + $0xf0] sm:$0xff]  ;;  %v1113_v55 = vld [vmem:[#allocation2 + $0x82] sm:$0xff] }
  0x94   :  { %16719 = vmatmul.mubr.msk.f32.gmra.mrb[2].mxu0 %vm81_vm0, %v7431_v7  ;;  %15844 = vmatprep.mubr.msk.f32.mxu1 %vm81_vm0, %v18921_v21  ;;  %v19159_v21 = vld [vmem:[#allocation2 + $0xf8] sm:$0xff]  ;;  %v7464_v7 = vld [vmem:[#allocation2 + $0x166] sm:$0xff] }
  0x95   :  { %16721 = vmatprep.mubr.msk.f32.mxu0 %vm81_vm0, %v7432_v9  ;;  %v1114_v9 = vld [vmem:[#allocation2 + $0x8a] sm:$0xff] }
  0x97   :  { %15845 = vmatmul.mubr.msk.f32.gmra.mrb[26].mxu1 %vm81_vm0, %v18925_v23  ;;  %v7437_v23 = vld [vmem:[#allocation2 + $0x8e] sm:$0xff] }
  0x98   :  { %16722 = vmatmul.mubr.msk.f32.gmra.mrb[4].mxu0 %vm81_vm0, %v7433_v12  ;;  %15847 = vmatprep.mubr.msk.f32.mxu1 %vm81_vm0, %v18937_v25  ;;  %v7438_v25 = vld [vmem:[#allocation2 + $0x96] sm:$0xff]  ;;  %v7465_v12 = vld [vmem:[#allocation2 + $0x16e] sm:$0xff] }
  0x99   :  { %16724 = vmatprep.mubr.msk.f32.mxu0 %vm81_vm0, %v7434_v14  ;;  %v1115_v14 = vld [vmem:[#allocation2 + $0x92] sm:$0xff] }
  0x9b   :  { %15848 = vmatmul.mubr.msk.f32.gmra.mrb[28].mxu1 %vm81_vm0, %v18954_v29  ;;  %v19171_v29 = vld [vmem:[#allocation2 + $0x110] sm:$0xff] }
  0x9c   :  { %16725 = vmatmul.mubr.msk.f32.gmra.mrb[6].mxu0 %vm81_vm0, %v7435_v16  ;;  %15850 = vmatprep.mubr.msk.f32.mxu1 %vm81_vm0, %v19151_v19  ;;  %v7466_v16 = vld [vmem:[#allocation2 + $0x176] sm:$0xff] }
  0x9d   :  { %16727 = vmatprep.mubr.msk.f32.mxu0 %vm81_vm0, %v7436_v22  ;;  %v1116_v22 = vld [vmem:[#allocation2 + $0x9a] sm:$0xff] }
  0x9f   :  { %15851 = vmatmul.mubr.msk.f32.gmra.mrb[30].mxu1 %vm81_vm0, %v19159_v21 }
  0xa0   :  { %16728 = vmatmul.mubr.msk.f32.gmra.mrb[8].mxu0 %vm81_vm0, %v7437_v23  ;;  %15853 = vmatprep.mubr.msk.f32.mxu1 %vm81_vm0, %v19161_v24  ;;  %v7467_v23 = vld [vmem:[#allocation2 + $0x17e] sm:$0xff] }
  0xa1   :  { %16730 = vmatprep.mubr.msk.f32.mxu0 %vm81_vm0, %v7438_v25  ;;  %v1117_v25 = vld [vmem:[#allocation2 + $0xa2] sm:$0xff] }
  0xa3   :  { %15854 = vmatmul.mubr.msk.f32.gmra.mrb[32].mxu1 %vm81_vm0, %v19169_v26 }
  0xa4   :  { %16731 = vmatmul.mubr.msk.f32.gmra.mrb[10].mxu0 %vm81_vm0, %v7439_v27  ;;  %15856 = vmatprep.mubr.msk.f32.mxu1 %vm81_vm0, %v19171_v29  ;;  %v7468_v27 = vld [vmem:[#allocation2 + $0x186] sm:$0xff] }
  0xa5   :  { %16733 = vmatprep.mubr.msk.f32.mxu0 %vm81_vm0, %v7440_v30  ;;  %v1118_v30 = vld [vmem:[#allocation2 + $0xaa] sm:$0xff] }
  0xa7   :  { %15857 = vmatmul.mubr.msk.f32.gmra.mrb[34].mxu1 %vm81_vm0, %v19179_v32 }
  0xa8   :  { %16734 = vmatmul.mubr.msk.f32.gmra.mrb[12].mxu0 %vm81_vm0, %v7441_v34  ;;  %15859 = vmatprep.mubr.msk.f32.mxu1 %vm81_vm0, %v19181_v36  ;;  %v7469_v34 = vld [vmem:[#allocation2 + $0x18e] sm:$0xff] }
  0xa9   :  { %16736 = vmatprep.mubr.msk.f32.mxu0 %vm81_vm0, %v7442_v38  ;;  %v1119_v38 = vld [vmem:[#allocation2 + $0xb2] sm:$0xff] }
  0xab   :  { %15860 = vmatmul.mubr.msk.f32.gmra.mrb[36].mxu1 %vm81_vm0, %v19189_v40 }
  0xac   :  { %16737 = vmatmul.mubr.msk.f32.gmra.mrb[14].mxu0 %vm81_vm0, %v7443_v43  ;;  %15862 = vmatprep.mubr.msk.f32.mxu1 %vm81_vm0, %v19191_v45  ;;  %v19263_v43 = vld [vmem:[#allocation2 + $0x47] sm:$0xff] }
  0xad   :  { %16739 = vmatprep.mubr.msk.f32.mxu0 %vm81_vm0, %v7444_v47  ;;  %v1120_v47 = vld [vmem:[#allocation2 + $0xba] sm:$0xff] }
  0xaf   :  { %15863 = vmatmul.mubr.msk.f32.gmra.mrb[38].mxu1 %vm81_vm0, %v19199_v48 }
  0xb0   :  { %16740 = vmatmul.mubr.msk.f32.gmra.mrb[16].mxu0 %vm81_vm0, %v7445_v51  ;;  %15865 = vmatprep.mubr.msk.f32.mxu1 %vm81_vm0, %v19201_v53  ;;  %v19270_v51 = vld [vmem:[#allocation2 + $0x4f] sm:$0xff] }
  0xb1   :  { %16742 = vmatprep.mubr.msk.f32.mxu0 %vm81_vm0, %v7446_v42  ;;  %v1121_v42 = vld [vmem:[#allocation2 + $0xc2] sm:$0xff] }
  0xb3   :  { %15866 = vmatmul.mubr.msk.f32.gmra.mrb[40].mxu1 %vm81_vm0, %v19209_v54 }
  0xb4   :  { %16743 = vmatmul.mubr.msk.f32.gmra.mrb[18].mxu0 %vm81_vm0, %v7447_v49  ;;  %15870 = vmatprep.mubr.msk.f32.mxu1 %vm81_vm0, %v1097_v56  ;;  %v19272_v49 = vld [vmem:[#allocation2 + $0x57] sm:$0xff] }
  0xb5   :  { %16745 = vmatprep.mubr.msk.f32.mxu0 %vm81_vm0, %v7448_v52  ;;  %v19277_v56 = vld [vmem:[%s21339_s2 + $0x90] sm:$0xff] }
  0xb6   :  { %v1122_v52 = vld [vmem:[#allocation2 + $0xca] sm:$0xff] }
  0xb7   :  { %15871 = vmatmul.mubr.msk.f32.vlgmr.msra.gmra.mrb[0].mxu1 %vm81_vm0, %v1098_v57  ;;  %v19284_v57 = vld [vmem:[#allocation2 + $0x5f] sm:$0xff] }
  0xb8   :  { %16746 = vmatmul.mubr.msk.f32.gmra.mrb[20].mxu0 %vm81_vm0, %v7449_v58  ;;  %15873 = vmatprep.mubr.msk.f32.mxu1 %vm81_vm0, %v1099_v59  ;;  %v1123_v58 = vld [vmem:[#allocation2 + $0xd2] sm:$0xff]  ;;  %v19288_v59 = vld [vmem:[#allocation2 + $0x67] sm:$0xff] }
  0xb9   :  { %16748 = vmatprep.mubr.msk.f32.mxu0 %vm81_vm0, %v7450_v60  ;;  %15934 = vmatpush3.msra.mxu1 %v19065_v11  ;;  %v1105_v11 = vld [vmem:[#allocation2 + $0x42] sm:$0xff]  ;;  %v19297_v60 = vld [vmem:[#allocation2 + $0x6f] sm:$0xff] }
  0xba   :  { %15998 = vmatprep.subr.mxu1 %v19221_v61 }
  0xbb   :  { %15874 = vmatmul.mubr.msk.f32.gmra.mrb[2].mxu1 %vm81_vm0, %v1100_v62  ;;  %v1125_v62 = vld [vmem:[#allocation2 + $0xe2] sm:$0xff] }
  0xbc   :  { %16749 = vmatmul.mubr.msk.f32.gmra.mrb[22].mxu0 %vm81_vm0, %v7451_v63  ;;  %15876 = vmatprep.mubr.msk.f32.mxu1 %vm81_vm0, %v1101_v0  ;;  %v19299_v63 = vld [vmem:[#allocation2 + $0x77] sm:$0xff]  ;;  %v1126_v0 = vld [vmem:[#allocation2 + $0xea] sm:$0xff] }
  0xbd   :  { %16751 = vmatprep.mubr.msk.f32.mxu0 %vm81_vm0, %v7452_v1  ;;  %v19307_v1 = vld [vmem:[#allocation2 + $0x7f] sm:$0xff] }
  0xbf   :  { %15877 = vmatmul.mubr.msk.f32.gmra.mrb[4].mxu1 %vm81_vm0, %v1102_v2  ;;  %v1127_v2 = vld [vmem:[#allocation2 + $0xf2] sm:$0xff] }
  0xc0   :  { %16752 = vmatmul.mubr.msk.f32.gmra.mrb[24].mxu0 %vm81_vm0, %v7453_v3  ;;  %15879 = vmatprep.mubr.msk.f32.mxu1 %vm81_vm0, %v1103_v5  ;;  %v19309_v3 = vld [vmem:[#allocation2 + $0x87] sm:$0xff]  ;;  %v1128_v5 = vld [vmem:[#allocation2 + $0xfa] sm:$0xff] }
  0xc1   :  { %16754 = vmatprep.mubr.msk.f32.mxu0 %vm81_vm0, %v7454_v6  ;;  %v19317_v6 = vld [vmem:[#allocation2 + $0x8f] sm:$0xff] }
  0xc3   :  { %15880 = vmatmul.mubr.msk.f32.gmra.mrb[6].mxu1 %vm81_vm0, %v1104_v8  ;;  %v1129_v8 = vld [vmem:[#allocation2 + $0x102] sm:$0xff] }
  0xc4   :  { %16755 = vmatmul.mubr.msk.f32.gmra.mrb[26].mxu0 %vm81_vm0, %v7455_v10  ;;  %15882 = vmatprep.mubr.msk.f32.mxu1 %vm81_vm0, %v1105_v11  ;;  %v19319_v10 = vld [vmem:[#allocation2 + $0x97] sm:$0xff]  ;;  %v1130_v11 = vld [vmem:[#allocation2 + $0x10a] sm:$0xff] }
  0xc5   :  { %16757 = vmatprep.mubr.msk.f32.mxu0 %vm81_vm0, %v7456_v13  ;;  %v19327_v13 = vld [vmem:[#allocation2 + $0x9f] sm:$0xff] }
  0xc7   :  { %15883 = vmatmul.mubr.msk.f32.gmra.mrb[8].mxu1 %vm81_vm0, %v1106_v15  ;;  %v1131_v15 = vld [vmem:[#allocation2 + $0x112] sm:$0xff] }
  0xc8   :  { %16758 = vmatmul.mubr.msk.f32.gmra.mrb[28].mxu0 %vm81_vm0, %v7457_v17  ;;  %15885 = vmatprep.mubr.msk.f32.mxu1 %vm81_vm0, %v1107_v18  ;;  %v19329_v17 = vld [vmem:[#allocation2 + $0xa7] sm:$0xff]  ;;  %v1132_v18 = vld [vmem:[#allocation2 + $0x11a] sm:$0xff] }
  0xc9   :  { %16760 = vmatprep.mubr.msk.f32.mxu0 %vm81_vm0, %v7458_v20  ;;  %v19337_v20 = vld [vmem:[#allocation2 + $0xaf] sm:$0xff] }
  0xcb   :  { %15886 = vmatmul.mubr.msk.f32.gmra.mrb[10].mxu1 %vm81_vm0, %v1108_v28  ;;  %v1133_v28 = vld [vmem:[#allocation2 + $0x122] sm:$0xff] }
  0xcc   :  { %16761 = vmatmul.mubr.msk.f32.gmra.mrb[30].mxu0 %vm81_vm0, %v7459_v31  ;;  %15888 = vmatprep.mubr.msk.f32.mxu1 %vm81_vm0, %v1109_v33  ;;  %v19339_v31 = vld [vmem:[#allocation2 + $0xb7] sm:$0xff]  ;;  %v1134_v33 = vld [vmem:[#allocation2 + $0x12a] sm:$0xff] }
  0xcd   :  { %16763 = vmatprep.mubr.msk.f32.mxu0 %vm81_vm0, %v7460_v35  ;;  %v19347_v35 = vld [vmem:[#allocation2 + $0xbf] sm:$0xff] }
  0xcf   :  { %15889 = vmatmul.mubr.msk.f32.gmra.mrb[12].mxu1 %vm81_vm0, %v1110_v37  ;;  %v1135_v37 = vld [vmem:[#allocation2 + $0x132] sm:$0xff] }
  0xd0   :  { %16764 = vmatmul.mubr.msk.f32.gmra.mrb[32].mxu0 %vm81_vm0, %v7461_v39  ;;  %15891 = vmatprep.mubr.msk.f32.mxu1 %vm81_vm0, %v1111_v41  ;;  %v19349_v39 = vld [vmem:[#allocation2 + $0xc7] sm:$0xff]  ;;  %v1136_v41 = vld [vmem:[#allocation2 + $0x13a] sm:$0xff] }
  0xd1   :  { %16766 = vmatprep.mubr.msk.f32.mxu0 %vm81_vm0, %v7462_v44  ;;  %v19357_v44 = vld [vmem:[#allocation2 + $0xcf] sm:$0xff] }
  0xd3   :  { %15892 = vmatmul.mubr.msk.f32.gmra.mrb[14].mxu1 %vm81_vm0, %v1112_v46  ;;  %v1137_v46 = vld [vmem:[#allocation2 + $0x142] sm:$0xff] }
  0xd4   :  { %16767 = vmatmul.mubr.msk.f32.gmra.mrb[34].mxu0 %vm81_vm0, %v7463_v50  ;;  %15894 = vmatprep.mubr.msk.f32.mxu1 %vm81_vm0, %v1113_v55  ;;  %v19359_v50 = vld [vmem:[#allocation2 + $0xd7] sm:$0xff]  ;;  %v1138_v55 = vld [vmem:[#allocation2 + $0x14a] sm:$0xff] }
  0xd5   :  { %16769 = vmatprep.mubr.msk.f32.mxu0 %vm81_vm0, %v7464_v7  ;;  %v19367_v7 = vld [vmem:[#allocation2 + $0xdf] sm:$0xff] }
  0xd7   :  { %15895 = vmatmul.mubr.msk.f32.gmra.mrb[16].mxu1 %vm81_vm0, %v1114_v9  ;;  %v1584_v9 = vld [vmem:[#allocation2 + $0x7] sm:$0xff] }
  0xd8   :  { %16770 = vmatmul.mubr.msk.f32.gmra.mrb[36].mxu0 %vm81_vm0, %v7465_v12  ;;  %15897 = vmatprep.mubr.msk.f32.mxu1 %vm81_vm0, %v1115_v14  ;;  %v19369_v12 = vld [vmem:[#allocation2 + $0xe7] sm:$0xff]  ;;  %v1585_v14 = vld [vmem:[#allocation2 + $0xf] sm:$0xff] }
  0xd9   :  { %16772 = vmatprep.mubr.msk.f32.mxu0 %vm81_vm0, %v7466_v16  ;;  %v19377_v16 = vld [vmem:[#allocation2 + $0xef] sm:$0xff] }
  0xdb   :  { %15898 = vmatmul.mubr.msk.f32.gmra.mrb[18].mxu1 %vm81_vm0, %v1116_v22  ;;  %v1586_v22 = vld [vmem:[#allocation2 + $0x17] sm:$0xff] }
  0xdc   :  { %16773 = vmatmul.mubr.msk.f32.gmra.mrb[38].mxu0 %vm81_vm0, %v7467_v23  ;;  %15900 = vmatprep.mubr.msk.f32.mxu1 %vm81_vm0, %v1117_v25  ;;  %v19379_v23 = vld [vmem:[#allocation2 + $0xf7] sm:$0xff]  ;;  %v19387_v25 = vld [vmem:[%s21339_s2 + $0x28] sm:$0xff] }
  0xdd   :  { %16775 = vmatprep.mubr.msk.f32.mxu0 %vm81_vm0, %v7468_v27  ;;  %v1587_v27 = vld [vmem:[#allocation2 + $0x1f] sm:$0xff] }
  0xdf   :  { %15901 = vmatmul.mubr.msk.f32.gmra.mrb[20].mxu1 %vm81_vm0, %v1118_v30  ;;  %v19392_v30 = vld [vmem:[#allocation2 + $0xff] sm:$0xff] }
  0xe0   :  { %16776 = vmatmul.mubr.msk.f32.gmra.mrb[40].mxu0 %vm81_vm0, %v7469_v34  ;;  %15903 = vmatprep.mubr.msk.f32.mxu1 %vm81_vm0, %v1119_v38  ;;  %v1588_v34 = vld [vmem:[#allocation2 + $0x27] sm:$0xff] }
  0xe1   :  { %16780 = vmatprep.mubr.msk.f32.mxu0 %vm81_vm0, %v19263_v43  ;;  %v19395_v38 = vld [vmem:[#allocation2 + $0x107] sm:$0xff] }
  0xe3   :  { %15904 = vmatmul.mubr.msk.f32.gmra.mrb[22].mxu1 %vm81_vm0, %v1120_v47  ;;  %v1589_v47 = vld [vmem:[#allocation2 + $0x2f] sm:$0xff] }
  0xe4   :  { %16781 = vmatmul.mubr.msk.f32.vlgmr.msra.gmra.mrb[0].mxu0 %vm81_vm0, %v19270_v51  ;;  %15906 = vmatprep.mubr.msk.f32.mxu1 %vm81_vm0, %v1121_v42  ;;  %v19404_v42 = vld [vmem:[#allocation2 + $0x10f] sm:$0xff] }
  0xe5   :  { %16844 = vmatpush3.msra.mxu0 %v19129_v4  ;;  %16783 = vmatprep.mubr.msk.f32.mxu0 %vm81_vm0, %v19272_v49  ;;  %v1124_v4 = vld [vmem:[#allocation2 + $0xda] sm:$0xff] }
  0xe6   :  { %16908 = vmatprep.subr.mxu0 %v19277_v56 }
  0xe7   :  { %15907 = vmatmul.mubr.msk.f32.gmra.mrb[24].mxu1 %vm81_vm0, %v1122_v52  ;;  %v1590_v52 = vld [vmem:[#allocation2 + $0x37] sm:$0xff] }
  0xe8   :  { %16784 = vmatmul.mubr.msk.f32.gmra.mrb[2].mxu0 %vm81_vm0, %v19284_v57  ;;  %15909 = vmatprep.mubr.msk.f32.mxu1 %vm81_vm0, %v1123_v58  ;;  %v1591_v58 = vld [vmem:[#allocation2 + $0x3f] sm:$0xff] }
  0xe9   :  { %16786 = vmatprep.mubr.msk.f32.mxu0 %vm81_vm0, %v19288_v59 }
  0xeb   :  { %15910 = vmatmul.mubr.msk.f32.gmra.mrb[26].mxu1 %vm81_vm0, %v1124_v4  ;;  %v19414_v4 = vld [vmem:[#allocation2 + $0x11f] sm:$0xff] }
  0xec   :  { %16787 = vmatmul.mubr.msk.f32.gmra.mrb[4].mxu0 %vm81_vm0, %v19297_v60  ;;  %15912 = vmatprep.mubr.msk.f32.mxu1 %vm81_vm0, %v1125_v62  ;;  %v19416_v62 = vld [vmem:[#allocation2 + $0x127] sm:$0xff] }
  0xed   :  { %16789 = vmatprep.mubr.msk.f32.mxu0 %vm81_vm0, %v19299_v63 }
  0xef   :  { %15913 = vmatmul.mubr.msk.f32.gmra.mrb[28].mxu1 %vm81_vm0, %v1126_v0  ;;  %v19425_v0 = vld [vmem:[#allocation2 + $0x12f] sm:$0xff] }
  0xf0   :  { %16790 = vmatmul.mubr.msk.f32.gmra.mrb[6].mxu0 %vm81_vm0, %v19307_v1  ;;  %15915 = vmatprep.mubr.msk.f32.mxu1 %vm81_vm0, %v1127_v2  ;;  %v19427_v2 = vld [vmem:[#allocation2 + $0x137] sm:$0xff] }
  0xf1   :  { %16792 = vmatprep.mubr.msk.f32.mxu0 %vm81_vm0, %v19309_v3 }
  0xf3   :  { %15916 = vmatmul.mubr.msk.f32.gmra.mrb[30].mxu1 %vm81_vm0, %v1128_v5  ;;  %v19439_v5 = vld [vmem:[#allocation2 + $0x147] sm:$0xff] }
  0xf4   :  { %16793 = vmatmul.mubr.msk.f32.gmra.mrb[8].mxu0 %vm81_vm0, %v19317_v6  ;;  %15918 = vmatprep.mubr.msk.f32.mxu1 %vm81_vm0, %v1129_v8  ;;  %v7951_v8 = vld [vmem:[#allocation2 + $0x167] sm:$0xff] }
  0xf5   :  { %16795 = vmatprep.mubr.msk.f32.mxu0 %vm81_vm0, %v19319_v10 }
  0xf7   :  { %15919 = vmatmul.mubr.msk.f32.gmra.mrb[32].mxu1 %vm81_vm0, %v1130_v11  ;;  %v19487_v11 = vld [vmem:[#allocation2 + $0x58] sm:$0xff] }
  0xf8   :  { %16796 = vmatmul.mubr.msk.f32.gmra.mrb[10].mxu0 %vm81_vm0, %v19327_v13  ;;  %15921 = vmatprep.mubr.msk.f32.mxu1 %vm81_vm0, %v1131_v15  ;;  %v19501_v15 = vld [vmem:[#allocation2 + $0x60] sm:$0xff] }
  0xf9   :  { %16798 = vmatprep.mubr.msk.f32.mxu0 %vm81_vm0, %v19329_v17 }
  0xfb   :  { %15922 = vmatmul.mubr.msk.f32.gmra.mrb[34].mxu1 %vm81_vm0, %v1132_v18  ;;  %v19518_v18 = vld [vmem:[#allocation2 + $0x78] sm:$0xff] }
  0xfc   :  { %16799 = vmatmul.mubr.msk.f32.gmra.mrb[12].mxu0 %vm81_vm0, %v19337_v20  ;;  %15924 = vmatprep.mubr.msk.f32.mxu1 %vm81_vm0, %v1133_v28  ;;  %v19530_v28 = vld [vmem:[#allocation2 + $0x88] sm:$0xff] }
  0xfd   :  { %16801 = vmatprep.mubr.msk.f32.mxu0 %vm81_vm0, %v19339_v31 }
  0xff   :  { %15925 = vmatmul.mubr.msk.f32.gmra.mrb[36].mxu1 %vm81_vm0, %v1134_v33  ;;  %v19542_v33 = vld [vmem:[#allocation2 + $0x98] sm:$0xff] }
 0x100   :  { %16802 = vmatmul.mubr.msk.f32.gmra.mrb[14].mxu0 %vm81_vm0, %v19347_v35  ;;  %15927 = vmatprep.mubr.msk.f32.mxu1 %vm81_vm0, %v1135_v37  ;;  %v19554_v37 = vld [vmem:[#allocation2 + $0xa8] sm:$0xff] }
 0x101   :  { %16804 = vmatprep.mubr.msk.f32.mxu0 %vm81_vm0, %v19349_v39 }
 0x103   :  { %15928 = vmatmul.mubr.msk.f32.gmra.mrb[38].mxu1 %vm81_vm0, %v1136_v41  ;;  %v19568_v41 = vld [vmem:[#allocation2 + $0xb0] sm:$0xff] }
 0x104   :  { %16805 = vmatmul.mubr.msk.f32.gmra.mrb[16].mxu0 %vm81_vm0, %v19357_v44  ;;  %15930 = vmatprep.mubr.msk.f32.mxu1 %vm81_vm0, %v1137_v46  ;;  %v13384_v46 = vld [vmem:[%s21341_s1 + $0x1a0] sm:$0xff] }
 0x105   :  { %16807 = vmatprep.mubr.msk.f32.mxu0 %vm81_vm0, %v19359_v50  ;;  %176 = vst.msk [vmem:[#allocation2 + $0x1a0] sm:$0xff] %vm81_vm0, %v13384_v46  ;;  %v2577_v46 = vld [vmem:[#allocation2 + $0xa1] sm:$0xff] }
 0x107   :  { %15931 = vmatmul.mubr.msk.f32.gmra.mrb[40].mxu1 %vm81_vm0, %v1138_v55  ;;  %v19588_v55 = vld [vmem:[#allocation2 + $0xc0] sm:$0xff] }
 0x108   :  { %16808 = vmatmul.mubr.msk.f32.gmra.mrb[18].mxu0 %vm81_vm0, %v19367_v7  ;;  %15935 = vmatprep.mubr.msk.f32.mxu1 %vm81_vm0, %v1584_v9  ;;  %v13386_v9 = vld [vmem:[%s21341_s1 + $0x1b0] sm:$0xff] }
 0x109   :  { %16810 = vmatprep.mubr.msk.f32.mxu0 %vm81_vm0, %v19369_v12  ;;  %178 = vst.msk [vmem:[#allocation2 + $0x1b0] sm:$0xff] %vm81_vm0, %v13386_v9  ;;  %v2579_v9 = vld [vmem:[#allocation2 + $0xb1] sm:$0xff] }
 0x10b   :  { %15936 = vmatmul.mubr.msk.f32.vlgmr.msra.gmra.mrb[0].mxu1 %vm81_vm0, %v1585_v14  ;;  %v19608_v14 = vld [vmem:[#allocation2 + $0xd0] sm:$0xff] }
 0x10c   :  { %16811 = vmatmul.mubr.msk.f32.gmra.mrb[20].mxu0 %vm81_vm0, %v19377_v16  ;;  %15938 = vmatprep.mubr.msk.f32.mxu1 %vm81_vm0, %v1586_v22  ;;  %v19620_v22 = vld [vmem:[#allocation2 + $0xe0] sm:$0xff] }
 0x10d   :  { %16813 = vmatprep.mubr.msk.f32.mxu0 %vm81_vm0, %v19379_v23  ;;  %15999 = vmatpush3.msra.mxu1 %v19221_v61  ;;  %v19406_v61 = vld [vmem:[#allocation2 + $0x117] sm:$0xff] }
 0x10e   :  { %16063 = vmatprep.subr.mxu1 %v19387_v25 }
 0x10f   :  { %15939 = vmatmul.mubr.msk.f32.gmra.mrb[2].mxu1 %vm81_vm0, %v1587_v27  ;;  %v19622_v27 = vld [vmem:[#allocation2 + $0xe8] sm:$0xff] }
 0x110   :  { %16814 = vmatmul.mubr.msk.f32.gmra.mrb[22].mxu0 %vm81_vm0, %v19392_v30  ;;  %15941 = vmatprep.mubr.msk.f32.mxu1 %vm81_vm0, %v1588_v34  ;;  %v2073_v34 = vld [vmem:[#allocation2 + $0x18] sm:$0xff] }
 0x111   :  { %16816 = vmatprep.mubr.msk.f32.mxu0 %vm81_vm0, %v19395_v38 }
 0x113   :  { %15942 = vmatmul.mubr.msk.f32.gmra.mrb[4].mxu1 %vm81_vm0, %v1589_v47  ;;  %v2074_v47 = vld [vmem:[#allocation2 + $0x20] sm:$0xff] }
 0x114   :  { %16817 = vmatmul.mubr.msk.f32.gmra.mrb[24].mxu0 %vm81_vm0, %v19404_v42  ;;  %15944 = vmatprep.mubr.msk.f32.mxu1 %vm81_vm0, %v1590_v52  ;;  %v2077_v52 = vld [vmem:[#allocation2 + $0x38] sm:$0xff] }
 0x115   :  { %16819 = vmatprep.mubr.msk.f32.mxu0 %vm81_vm0, %v19406_v61 }
 0x117   :  { %15945 = vmatmul.mubr.msk.f32.gmra.mrb[6].mxu1 %vm81_vm0, %v1591_v58  ;;  %v2102_v58 = vld [vmem:[#allocation2 + $0x100] sm:$0xff] }
 0x118   :  { %16820 = vmatmul.mubr.msk.f32.gmra.mrb[26].mxu0 %vm81_vm0, %v19414_v4  ;;  %15947 = vmatprep.mubr.msk.f32.mxu1 %vm81_vm0, %v19263_v43  ;;  %v19437_v43 = vld [vmem:[#allocation2 + $0x13f] sm:$0xff] }
 0x119   :  { %16822 = vmatprep.mubr.msk.f32.mxu0 %vm81_vm0, %v19416_v62 }
 0x11b   :  { %15948 = vmatmul.mubr.msk.f32.gmra.mrb[8].mxu1 %vm81_vm0, %v19270_v51  ;;  %v19449_v51 = vld [vmem:[#allocation2 + $0x14f] sm:$0xff] }
 0x11c   :  { %16823 = vmatmul.mubr.msk.f32.gmra.mrb[28].mxu0 %vm81_vm0, %v19425_v0  ;;  %15950 = vmatprep.mubr.msk.f32.mxu1 %vm81_vm0, %v19272_v49  ;;  %v7949_v49 = vld [vmem:[#allocation2 + $0x157] sm:$0xff] }
 0x11d   :  { %16825 = vmatprep.mubr.msk.f32.mxu0 %vm81_vm0, %v19427_v2 }
 0x11f   :  { %15951 = vmatmul.mubr.msk.f32.gmra.mrb[10].mxu1 %vm81_vm0, %v19284_v57  ;;  %v7950_v57 = vld [vmem:[#allocation2 + $0x15f] sm:$0xff] }
 0x120   :  { %16826 = vmatmul.mubr.msk.f32.gmra.mrb[30].mxu0 %vm81_vm0, %v19437_v43  ;;  %15953 = vmatprep.mubr.msk.f32.mxu1 %vm81_vm0, %v19288_v59  ;;  %v7952_v59 = vld [vmem:[#allocation2 + $0x16f] sm:$0xff] }
 0x121   :  { %16828 = vmatprep.mubr.msk.f32.mxu0 %vm81_vm0, %v19439_v5 }
 0x123   :  { %15954 = vmatmul.mubr.msk.f32.gmra.mrb[12].mxu1 %vm81_vm0, %v19297_v60  ;;  %v7953_v60 = vld [vmem:[#allocation2 + $0x177] sm:$0xff] }
 0x124   :  { %16829 = vmatmul.mubr.msk.f32.gmra.mrb[32].mxu0 %vm81_vm0, %v19449_v51  ;;  %15956 = vmatprep.mubr.msk.f32.mxu1 %vm81_vm0, %v19299_v63  ;;  %v7954_v63 = vld [vmem:[#allocation2 + $0x17f] sm:$0xff] }
 0x125   :  { %16831 = vmatprep.mubr.msk.f32.mxu0 %vm81_vm0, %v7949_v49  ;;  %v13388_v49 = vld [vmem:[%s21341_s1 + $0x1c0] sm:$0xff] }
 0x126   :  { %180 = vst.msk [vmem:[#allocation2 + $0x1c0] sm:$0xff] %vm81_vm0, %v13388_v49  ;;  %v3055_v49 = vld [vmem:[#allocation2 + $0x5e] sm:$0xff] }
 0x127   :  { %15957 = vmatmul.mubr.msk.f32.gmra.mrb[14].mxu1 %vm81_vm0, %v19307_v1  ;;  %v7955_v1 = vld [vmem:[#allocation2 + $0x187] sm:$0xff] }
 0x128   :  { %16832 = vmatmul.mubr.msk.f32.gmra.mrb[34].mxu0 %vm81_vm0, %v7950_v57  ;;  %15959 = vmatprep.mubr.msk.f32.mxu1 %vm81_vm0, %v19309_v3  ;;  %v7956_v3 = vld [vmem:[#allocation2 + $0x18f] sm:$0xff]  ;;  %v2110_v57 = vld [vmem:[#allocation2 + $0x140] sm:$0xff] }
 0x129   :  { %16834 = vmatprep.mubr.msk.f32.mxu0 %vm81_vm0, %v7951_v8  ;;  %v2111_v8 = vld [vmem:[#allocation2 + $0x148] sm:$0xff] }
 0x12b   :  { %15960 = vmatmul.mubr.msk.f32.gmra.mrb[16].mxu1 %vm81_vm0, %v19317_v6  ;;  %v19476_v6 = vld [vmem:[#allocation2 + $0x48] sm:$0xff] }
 0x12c   :  { %16835 = vmatmul.mubr.msk.f32.gmra.mrb[36].mxu0 %vm81_vm0, %v7952_v59  ;;  %15962 = vmatprep.mubr.msk.f32.mxu1 %vm81_vm0, %v19319_v10  ;;  %v19485_v10 = vld [vmem:[#allocation2 + $0x50] sm:$0xff] }
 0x12d   :  { %16837 = vmatprep.mubr.msk.f32.mxu0 %vm81_vm0, %v7953_v60  ;;  %v2558_v59 = vld [vmem:[#allocation2 + $0x9] sm:$0xff]  ;;  %v2559_v60 = vld [vmem:[#allocation2 + $0x11] sm:$0xff] }
 0x12f   :  { %15963 = vmatmul.mubr.msk.f32.gmra.mrb[18].mxu1 %vm81_vm0, %v19327_v13  ;;  %v19492_v13 = vld [vmem:[%s21339_s2 + $0x98] sm:$0xff] }
 0x130   :  { %16838 = vmatmul.mubr.msk.f32.gmra.mrb[38].mxu0 %vm81_vm0, %v7954_v63  ;;  %15965 = vmatprep.mubr.msk.f32.mxu1 %vm81_vm0, %v19329_v17  ;;  %v19505_v17 = vld [vmem:[#allocation2 + $0x68] sm:$0xff]  ;;  %v2560_v63 = vld [vmem:[#allocation2 + $0x19] sm:$0xff] }
 0x131   :  { %16840 = vmatprep.mubr.msk.f32.mxu0 %vm81_vm0, %v7955_v1  ;;  %v19815_v1 = vld [vmem:[%s21339_s2 + $0x38] sm:$0xff] }
 0x133   :  { %15966 = vmatmul.mubr.msk.f32.gmra.mrb[20].mxu1 %vm81_vm0, %v19337_v20  ;;  %v19528_v20 = vld [vmem:[#allocation2 + $0x80] sm:$0xff] }
 0x134   :  { %16841 = vmatmul.mubr.msk.f32.gmra.mrb[40].mxu0 %vm81_vm0, %v7956_v3  ;;  %15968 = vmatprep.mubr.msk.f32.mxu1 %vm81_vm0, %v19339_v31  ;;  %v19540_v31 = vld [vmem:[#allocation2 + $0x90] sm:$0xff]  ;;  %v2561_v3 = vld [vmem:[#allocation2 + $0x21] sm:$0xff] }
 0x135   :  { %16845 = vmatprep.mubr.msk.f32.mxu0 %vm81_vm0, %v19476_v6 }
 0x137   :  { %15969 = vmatmul.mubr.msk.f32.gmra.mrb[22].mxu1 %vm81_vm0, %v19347_v35  ;;  %v19552_v35 = vld [vmem:[#allocation2 + $0xa0] sm:$0xff] }
 0x138   :  { %16846 = vmatmul.mubr.msk.f32.vlgmr.msra.gmra.mrb[0].mxu0 %vm81_vm0, %v19485_v10  ;;  %15971 = vmatprep.mubr.msk.f32.mxu1 %vm81_vm0, %v19349_v39  ;;  %v13383_v39 = vld [vmem:[%s21341_s1 + $0x198] sm:$0xff] }
 0x139   :  { %16909 = vmatpush3.msra.mxu0 %v19277_v56  ;;  %16848 = vmatprep.mubr.msk.f32.mxu0 %vm81_vm0, %v19487_v11  ;;  %v19516_v56 = vld [vmem:[#allocation2 + $0x70] sm:$0xff]  ;;  %175 = vst.msk [vmem:[#allocation2 + $0x198] sm:$0xff] %vm81_vm0, %v13383_v39 }
 0x13a   :  { %16973 = vmatprep.subr.mxu0 %v19492_v13 }
 0x13b   :  { %15972 = vmatmul.mubr.msk.f32.gmra.mrb[24].mxu1 %vm81_vm0, %v19357_v44  ;;  %v19570_v44 = vld [vmem:[#allocation2 + $0xb8] sm:$0xff] }
 0x13c   :  { %16849 = vmatmul.mubr.msk.f32.gmra.mrb[2].mxu0 %vm81_vm0, %v19501_v15  ;;  %15974 = vmatprep.mubr.msk.f32.mxu1 %vm81_vm0, %v19359_v50  ;;  %v13385_v50 = vld [vmem:[%s21341_s1 + $0x1a8] sm:$0xff] }
 0x13d   :  { %16851 = vmatprep.mubr.msk.f32.mxu0 %vm81_vm0, %v19505_v17  ;;  %177 = vst.msk [vmem:[#allocation2 + $0x1a8] sm:$0xff] %vm81_vm0, %v13385_v50 }
 0x13f   :  { %15975 = vmatmul.mubr.msk.f32.gmra.mrb[26].mxu1 %vm81_vm0, %v19367_v7  ;;  %v19590_v7 = vld [vmem:[#allocation2 + $0xc8] sm:$0xff] }
 0x140   :  { %16852 = vmatmul.mubr.msk.f32.gmra.mrb[4].mxu0 %vm81_vm0, %v19516_v56  ;;  %15977 = vmatprep.mubr.msk.f32.mxu1 %vm81_vm0, %v19369_v12  ;;  %v13387_v12 = vld [vmem:[%s21341_s1 + $0x1b8] sm:$0xff] }
 0x141   :  { %16854 = vmatprep.mubr.msk.f32.mxu0 %vm81_vm0, %v19518_v18  ;;  %179 = vst.msk [vmem:[#allocation2 + $0x1b8] sm:$0xff] %vm81_vm0, %v13387_v12  ;;  %v8926_v39 = vld [vmem:[#allocation2 + $0x198] sm:$0xff] }
 0x143   :  { %15978 = vmatmul.mubr.msk.f32.gmra.mrb[28].mxu1 %vm81_vm0, %v19377_v16  ;;  %v19610_v16 = vld [vmem:[#allocation2 + $0xd8] sm:$0xff] }
 0x144   :  { %16855 = vmatmul.mubr.msk.f32.gmra.mrb[6].mxu0 %vm81_vm0, %v19528_v20  ;;  %15980 = vmatprep.mubr.msk.f32.mxu1 %vm81_vm0, %v19379_v23  ;;  %v2071_v23 = vld [vmem:[#allocation2 + $0x8] sm:$0xff] }
 0x145   :  { %16857 = vmatprep.mubr.msk.f32.mxu0 %vm81_vm0, %v19530_v28  ;;  %v8928_v50 = vld [vmem:[#allocation2 + $0x1a8] sm:$0xff] }
 0x147   :  { %15981 = vmatmul.mubr.msk.f32.gmra.mrb[30].mxu1 %vm81_vm0, %v19392_v30  ;;  %v2072_v30 = vld [vmem:[#allocation2 + $0x10] sm:$0xff] }
 0x148   :  { %16858 = vmatmul.mubr.msk.f32.gmra.mrb[8].mxu0 %vm81_vm0, %v19540_v31  ;;  %15983 = vmatprep.mubr.msk.f32.mxu1 %vm81_vm0, %v19395_v38  ;;  %v19637_v38 = vld [vmem:[%s21339_s2 + $0x30] sm:$0xff]  ;;  %v8930_v12 = vld [vmem:[#allocation2 + $0x1b8] sm:$0xff] }
 0x149   :  { %16860 = vmatprep.mubr.msk.f32.mxu0 %vm81_vm0, %v19542_v33 }
 0x14b   :  { %15984 = vmatmul.mubr.msk.f32.gmra.mrb[32].mxu1 %vm81_vm0, %v19404_v42  ;;  %v2075_v42 = vld [vmem:[#allocation2 + $0x28] sm:$0xff] }
 0x14c   :  { %16861 = vmatmul.mubr.msk.f32.gmra.mrb[10].mxu0 %vm81_vm0, %v19552_v35  ;;  %15986 = vmatprep.mubr.msk.f32.mxu1 %vm81_vm0, %v19406_v61  ;;  %v2101_v61 = vld [vmem:[#allocation2 + $0xf8] sm:$0xff] }
 0x14d   :  { %16863 = vmatprep.mubr.msk.f32.mxu0 %vm81_vm0, %v19554_v37 }
 0x14f   :  { %15987 = vmatmul.mubr.msk.f32.gmra.mrb[34].mxu1 %vm81_vm0, %v19414_v4  ;;  %v2103_v4 = vld [vmem:[#allocation2 + $0x108] sm:$0xff] }
 0x150   :  { %16864 = vmatmul.mubr.msk.f32.gmra.mrb[12].mxu0 %vm81_vm0, %v19568_v41  ;;  %15989 = vmatprep.mubr.msk.f32.mxu1 %vm81_vm0, %v19416_v62  ;;  %v2104_v62 = vld [vmem:[#allocation2 + $0x110] sm:$0xff] }
 0x151   :  { %16866 = vmatprep.mubr.msk.f32.mxu0 %vm81_vm0, %v19570_v44 }
 0x153   :  { %15990 = vmatmul.mubr.msk.f32.gmra.mrb[36].mxu1 %vm81_vm0, %v19425_v0  ;;  %v2105_v0 = vld [vmem:[#allocation2 + $0x118] sm:$0xff] }
 0x154   :  { %16867 = vmatmul.mubr.msk.f32.gmra.mrb[14].mxu0 %vm81_vm0, %v19588_v55  ;;  %15992 = vmatprep.mubr.msk.f32.mxu1 %vm81_vm0, %v19427_v2  ;;  %v2106_v2 = vld [vmem:[#allocation2 + $0x120] sm:$0xff] }
 0x155   :  { %16869 = vmatprep.mubr.msk.f32.mxu0 %vm81_vm0, %v19590_v7 }
 0x157   :  { %15993 = vmatmul.mubr.msk.f32.gmra.mrb[38].mxu1 %vm81_vm0, %v19437_v43  ;;  %v2107_v43 = vld [vmem:[#allocation2 + $0x128] sm:$0xff] }
 0x158   :  { %16870 = vmatmul.mubr.msk.f32.gmra.mrb[16].mxu0 %vm81_vm0, %v19608_v14  ;;  %15995 = vmatprep.mubr.msk.f32.mxu1 %vm81_vm0, %v19439_v5  ;;  %v2108_v5 = vld [vmem:[#allocation2 + $0x130] sm:$0xff] }
 0x159   :  { %16872 = vmatprep.mubr.msk.f32.mxu0 %vm81_vm0, %v19610_v16 }
 0x15b   :  { %15996 = vmatmul.mubr.msk.f32.gmra.mrb[40].mxu1 %vm81_vm0, %v19449_v51  ;;  %v2109_v51 = vld [vmem:[#allocation2 + $0x138] sm:$0xff] }
 0x15c   :  { %16873 = vmatmul.mubr.msk.f32.gmra.mrb[18].mxu0 %vm81_vm0, %v19620_v22  ;;  %16000 = vmatprep.mubr.msk.f32.mxu1 %vm81_vm0, %v2071_v23  ;;  %v19873_v23 = vld [vmem:[%s21339_s2 + $0xa8] sm:$0xff] }
 0x15d   :  { %16875 = vmatprep.mubr.msk.f32.mxu0 %vm81_vm0, %v19622_v27 }
 0x15f   :  { %16001 = vmatmul.mubr.msk.f32.vlgmr.msra.gmra.mrb[0].mxu1 %vm81_vm0, %v2072_v30  ;;  %v2584_v30 = vld [vmem:[#allocation2 + $0xd9] sm:$0xff] }
 0x160   :  { %16876 = vmatmul.mubr.msk.f32.gmra.mrb[20].mxu0 %vm81_vm0, %v19151_v19  ;;  %16003 = vmatprep.mubr.msk.f32.mxu1 %vm81_vm0, %v2073_v34  ;;  %v2076_v19 = vld [vmem:[#allocation2 + $0x30] sm:$0xff]  ;;  %v2585_v34 = vld [vmem:[#allocation2 + $0xe1] sm:$0xff] }
 0x161   :  { %16878 = vmatprep.mubr.msk.f32.mxu0 %vm81_vm0, %v19159_v21  ;;  %16064 = vmatpush3.msra.mxu1 %v19387_v25  ;;  %v2078_v21 = vld [vmem:[#allocation2 + $0x40] sm:$0xff]  ;;  %v2100_v25 = vld [vmem:[#allocation2 + $0xf0] sm:$0xff] }
 0x162   :  { %16128 = vmatprep.subr.mxu1 %v19637_v38 }
 0x163   :  { %16004 = vmatmul.mubr.msk.f32.gmra.mrb[2].mxu1 %vm81_vm0, %v2074_v47  ;;  %v2587_v47 = vld [vmem:[#allocation2 + $0xf1] sm:$0xff] }
 0x164   :  { %16879 = vmatmul.mubr.msk.f32.gmra.mrb[22].mxu0 %vm81_vm0, %v19161_v24  ;;  %16006 = vmatprep.mubr.msk.f32.mxu1 %vm81_vm0, %v2075_v42  ;;  %v19679_v24 = vld [vmem:[#allocation2 + $0x150] sm:$0xff]  ;;  %v2588_v42 = vld [vmem:[#allocation2 + $0xf9] sm:$0xff] }
 0x165   :  { %16881 = vmatprep.mubr.msk.f32.mxu0 %vm81_vm0, %v19169_v26  ;;  %v19681_v26 = vld [vmem:[#allocation2 + $0x158] sm:$0xff] }
 0x167   :  { %16007 = vmatmul.mubr.msk.f32.gmra.mrb[4].mxu1 %vm81_vm0, %v2076_v19  ;;  %v2589_v19 = vld [vmem:[#allocation2 + $0x101] sm:$0xff] }
 0x168   :  { %16882 = vmatmul.mubr.msk.f32.gmra.mrb[24].mxu0 %vm81_vm0, %v19171_v29  ;;  %16009 = vmatprep.mubr.msk.f32.mxu1 %vm81_vm0, %v2077_v52  ;;  %v19691_v29 = vld [vmem:[#allocation2 + $0x160] sm:$0xff]  ;;  %v2590_v52 = vld [vmem:[#allocation2 + $0x109] sm:$0xff] }
 0x169   :  { %16884 = vmatprep.mubr.msk.f32.mxu0 %vm81_vm0, %v19179_v32  ;;  %v19693_v32 = vld [vmem:[#allocation2 + $0x168] sm:$0xff] }
 0x16b   :  { %16010 = vmatmul.mubr.msk.f32.gmra.mrb[6].mxu1 %vm81_vm0, %v2078_v21  ;;  %v2591_v21 = vld [vmem:[#allocation2 + $0x111] sm:$0xff] }
 0x16c   :  { %16885 = vmatmul.mubr.msk.f32.gmra.mrb[26].mxu0 %vm81_vm0, %v19181_v36  ;;  %16012 = vmatprep.mubr.msk.f32.mxu1 %vm81_vm0, %v19476_v6  ;;  %v19703_v36 = vld [vmem:[#allocation2 + $0x170] sm:$0xff] }
 0x16d   :  { %16887 = vmatprep.mubr.msk.f32.mxu0 %vm81_vm0, %v19189_v40  ;;  %v19705_v40 = vld [vmem:[#allocation2 + $0x178] sm:$0xff]  ;;  %v2562_v6 = vld [vmem:[#allocation2 + $0x29] sm:$0xff] }
 0x16f   :  { %16013 = vmatmul.mubr.msk.f32.gmra.mrb[8].mxu1 %vm81_vm0, %v19485_v10  ;;  %v2563_v10 = vld [vmem:[#allocation2 + $0x31] sm:$0xff] }
 0x170   :  { %16888 = vmatmul.mubr.msk.f32.gmra.mrb[28].mxu0 %vm81_vm0, %v19191_v45  ;;  %16015 = vmatprep.mubr.msk.f32.mxu1 %vm81_vm0, %v19487_v11  ;;  %v19715_v45 = vld [vmem:[#allocation2 + $0x180] sm:$0xff] }
 0x171   :  { %16890 = vmatprep.mubr.msk.f32.mxu0 %vm81_vm0, %v19199_v48  ;;  %v19717_v48 = vld [vmem:[#allocation2 + $0x188] sm:$0xff]  ;;  %v2564_v11 = vld [vmem:[#allocation2 + $0x39] sm:$0xff] }
 0x173   :  { %16016 = vmatmul.mubr.msk.f32.gmra.mrb[10].mxu1 %vm81_vm0, %v19501_v15  ;;  %v2566_v15 = vld [vmem:[#allocation2 + $0x49] sm:$0xff] }
 0x174   :  { %16891 = vmatmul.mubr.msk.f32.gmra.mrb[30].mxu0 %vm81_vm0, %v19201_v53  ;;  %16018 = vmatprep.mubr.msk.f32.mxu1 %vm81_vm0, %v19505_v17  ;;  %v19727_v53 = vld [vmem:[#allocation2 + $0x190] sm:$0xff] }
 0x175   :  { %16893 = vmatprep.mubr.msk.f32.mxu0 %vm81_vm0, %v19209_v54  ;;  %v19740_v54 = vld [vmem:[%s21339_s2 + $0xa0] sm:$0xff]  ;;  %v2567_v17 = vld [vmem:[#allocation2 + $0x51] sm:$0xff] }
 0x177   :  { %16019 = vmatmul.mubr.msk.f32.gmra.mrb[12].mxu1 %vm81_vm0, %v19516_v56 }
 0x178   :  { %16894 = vmatmul.mubr.msk.f32.gmra.mrb[32].mxu0 %vm81_vm0, %v19679_v24  ;;  %16021 = vmatprep.mubr.msk.f32.mxu1 %vm81_vm0, %v19518_v18 }
 0x179   :  { %16896 = vmatprep.mubr.msk.f32.mxu0 %vm81_vm0, %v19681_v26 }
 0x17b   :  { %16022 = vmatmul.mubr.msk.f32.gmra.mrb[14].mxu1 %vm81_vm0, %v19528_v20 }
 0x17c   :  { %16897 = vmatmul.mubr.msk.f32.gmra.mrb[34].mxu0 %vm81_vm0, %v19691_v29  ;;  %16024 = vmatprep.mubr.msk.f32.mxu1 %vm81_vm0, %v19530_v28 }
 0x17d   :  { %16899 = vmatprep.mubr.msk.f32.mxu0 %vm81_vm0, %v19693_v32 }
 0x17f   :  { %16025 = vmatmul.mubr.msk.f32.gmra.mrb[16].mxu1 %vm81_vm0, %v19540_v31 }
 0x180   :  { %16900 = vmatmul.mubr.msk.f32.gmra.mrb[36].mxu0 %vm81_vm0, %v19703_v36  ;;  %16027 = vmatprep.mubr.msk.f32.mxu1 %vm81_vm0, %v19542_v33 }
 0x181   :  { %16902 = vmatprep.mubr.msk.f32.mxu0 %vm81_vm0, %v19705_v40 }
 0x183   :  { %16028 = vmatmul.mubr.msk.f32.gmra.mrb[18].mxu1 %vm81_vm0, %v19552_v35 }
 0x184   :  { %16903 = vmatmul.mubr.msk.f32.gmra.mrb[38].mxu0 %vm81_vm0, %v19715_v45  ;;  %16030 = vmatprep.mubr.msk.f32.mxu1 %vm81_vm0, %v19554_v37 }
 0x185   :  { %16905 = vmatprep.mubr.msk.f32.mxu0 %vm81_vm0, %v19717_v48 }
 0x187   :  { %16031 = vmatmul.mubr.msk.f32.gmra.mrb[20].mxu1 %vm81_vm0, %v19568_v41 }
 0x188   :  { %16906 = vmatmul.mubr.msk.f32.gmra.mrb[40].mxu0 %vm81_vm0, %v19727_v53  ;;  %16033 = vmatprep.mubr.msk.f32.mxu1 %vm81_vm0, %v19570_v44 }
 0x189   :  { %16910 = vmatprep.mubr.msk.f32.mxu0 %vm81_vm0, %v19516_v56  ;;  %v2568_v56 = vld [vmem:[#allocation2 + $0x59] sm:$0xff] }
 0x18b   :  { %16034 = vmatmul.mubr.msk.f32.gmra.mrb[22].mxu1 %vm81_vm0, %v19588_v55 }
 0x18c   :  { %16911 = vmatmul.mubr.msk.f32.vlgmr.msra.gmra.mrb[0].mxu0 %vm81_vm0, %v19518_v18  ;;  %16036 = vmatprep.mubr.msk.f32.mxu1 %vm81_vm0, %v19590_v7  ;;  %v2569_v18 = vld [vmem:[#allocation2 + $0x61] sm:$0xff] }
 0x18d   :  { %16974 = vmatpush3.msra.mxu0 %v19492_v13  ;;  %16913 = vmatprep.mubr.msk.f32.mxu0 %vm81_vm0, %v19528_v20  ;;  %v2565_v13 = vld [vmem:[#allocation2 + $0x41] sm:$0xff]  ;;  %v2570_v20 = vld [vmem:[#allocation2 + $0x69] sm:$0xff] }
 0x18e   :  { %17038 = vmatprep.subr.mxu0 %v19740_v54 }
 0x18f   :  { %16037 = vmatmul.mubr.msk.f32.gmra.mrb[24].mxu1 %vm81_vm0, %v19608_v14 }
 0x190   :  { %16914 = vmatmul.mubr.msk.f32.gmra.mrb[2].mxu0 %vm81_vm0, %v19530_v28  ;;  %16039 = vmatprep.mubr.msk.f32.mxu1 %vm81_vm0, %v19610_v16  ;;  %v2571_v28 = vld [vmem:[#allocation2 + $0x71] sm:$0xff] }
 0x191   :  { %16916 = vmatprep.mubr.msk.f32.mxu0 %vm81_vm0, %v19540_v31  ;;  %v2572_v31 = vld [vmem:[#allocation2 + $0x79] sm:$0xff] }
 0x193   :  { %16040 = vmatmul.mubr.msk.f32.gmra.mrb[26].mxu1 %vm81_vm0, %v19620_v22 }
 0x194   :  { %16917 = vmatmul.mubr.msk.f32.gmra.mrb[4].mxu0 %vm81_vm0, %v19542_v33  ;;  %16042 = vmatprep.mubr.msk.f32.mxu1 %vm81_vm0, %v19622_v27  ;;  %v2573_v33 = vld [vmem:[#allocation2 + $0x81] sm:$0xff] }
 0x195   :  { %16919 = vmatprep.mubr.msk.f32.mxu0 %vm81_vm0, %v19552_v35  ;;  %v2574_v35 = vld [vmem:[#allocation2 + $0x89] sm:$0xff] }
 0x197   :  { %16043 = vmatmul.mubr.msk.f32.gmra.mrb[28].mxu1 %vm81_vm0, %v2100_v25 }
 0x198   :  { %16920 = vmatmul.mubr.msk.f32.gmra.mrb[6].mxu0 %vm81_vm0, %v19554_v37  ;;  %16045 = vmatprep.mubr.msk.f32.mxu1 %vm81_vm0, %v2101_v61  ;;  %v2575_v37 = vld [vmem:[#allocation2 + $0x91] sm:$0xff] }
 0x199   :  { %16922 = vmatprep.mubr.msk.f32.mxu0 %vm81_vm0, %v19568_v41  ;;  %v2576_v41 = vld [vmem:[#allocation2 + $0x99] sm:$0xff] }
 0x19b   :  { %16046 = vmatmul.mubr.msk.f32.gmra.mrb[30].mxu1 %vm81_vm0, %v2102_v58 }
 0x19c   :  { %16923 = vmatmul.mubr.msk.f32.gmra.mrb[8].mxu0 %vm81_vm0, %v19570_v44  ;;  %16048 = vmatprep.mubr.msk.f32.mxu1 %vm81_vm0, %v2103_v4  ;;  %v8927_v44 = vld [vmem:[#allocation2 + $0x1a0] sm:$0xff] }
 0x19d   :  { %16925 = vmatprep.mubr.msk.f32.mxu0 %vm81_vm0, %v19588_v55  ;;  %v2578_v55 = vld [vmem:[#allocation2 + $0xa9] sm:$0xff] }
 0x19f   :  { %16049 = vmatmul.mubr.msk.f32.gmra.mrb[32].mxu1 %vm81_vm0, %v2104_v62 }
 0x1a0   :  { %16926 = vmatmul.mubr.msk.f32.gmra.mrb[10].mxu0 %vm81_vm0, %v19590_v7  ;;  %16051 = vmatprep.mubr.msk.f32.mxu1 %vm81_vm0, %v2105_v0  ;;  %v8929_v7 = vld [vmem:[#allocation2 + $0x1b0] sm:$0xff] }
 0x1a1   :  { %16928 = vmatprep.mubr.msk.f32.mxu0 %vm81_vm0, %v19608_v14  ;;  %v2580_v14 = vld [vmem:[#allocation2 + $0xb9] sm:$0xff] }
 0x1a3   :  { %16052 = vmatmul.mubr.msk.f32.gmra.mrb[34].mxu1 %vm81_vm0, %v2106_v2 }
 0x1a4   :  { %16929 = vmatmul.mubr.msk.f32.gmra.mrb[12].mxu0 %vm81_vm0, %v19610_v16  ;;  %16054 = vmatprep.mubr.msk.f32.mxu1 %vm81_vm0, %v2107_v43  ;;  %v2581_v16 = vld [vmem:[#allocation2 + $0xc1] sm:$0xff] }
 0x1a5   :  { %16931 = vmatprep.mubr.msk.f32.mxu0 %vm81_vm0, %v19620_v22  ;;  %v2582_v22 = vld [vmem:[#allocation2 + $0xc9] sm:$0xff] }
 0x1a7   :  { %16055 = vmatmul.mubr.msk.f32.gmra.mrb[36].mxu1 %vm81_vm0, %v2108_v5 }
 0x1a8   :  { %16932 = vmatmul.mubr.msk.f32.gmra.mrb[14].mxu0 %vm81_vm0, %v19622_v27  ;;  %16057 = vmatprep.mubr.msk.f32.mxu1 %vm81_vm0, %v2109_v51  ;;  %v2583_v27 = vld [vmem:[#allocation2 + $0xd1] sm:$0xff] }
 0x1a9   :  { %16934 = vmatprep.mubr.msk.f32.mxu0 %vm81_vm0, %v2100_v25  ;;  %v3047_v25 = vld [vmem:[#allocation2 + $0x1e] sm:$0xff] }
 0x1ab   :  { %16058 = vmatmul.mubr.msk.f32.gmra.mrb[38].mxu1 %vm81_vm0, %v2110_v57 }
 0x1ac   :  { %16935 = vmatmul.mubr.msk.f32.gmra.mrb[16].mxu0 %vm81_vm0, %v2101_v61  ;;  %16060 = vmatprep.mubr.msk.f32.mxu1 %vm81_vm0, %v2111_v8  ;;  %v19922_v61 = vld [vmem:[%s21339_s2 + $0x40] sm:$0xff] }
 0x1ad   :  { %16937 = vmatprep.mubr.msk.f32.mxu0 %vm81_vm0, %v2102_v58  ;;  %v3048_v58 = vld [vmem:[#allocation2 + $0x26] sm:$0xff] }
 0x1af   :  { %16061 = vmatmul.mubr.msk.f32.gmra.mrb[40].mxu1 %vm81_vm0, %v19679_v24 }
 0x1b0   :  { %16938 = vmatmul.mubr.msk.f32.gmra.mrb[18].mxu0 %vm81_vm0, %v2103_v4  ;;  %16065 = vmatprep.mubr.msk.f32.mxu1 %vm81_vm0, %v2558_v59  ;;  %v3049_v4 = vld [vmem:[#allocation2 + $0x2e] sm:$0xff] }
 0x1b1   :  { %16940 = vmatprep.mubr.msk.f32.mxu0 %vm81_vm0, %v2104_v62  ;;  %v3050_v62 = vld [vmem:[#allocation2 + $0x36] sm:$0xff]  ;;  %v9407_v59 = vld [vmem:[#allocation2 + $0x169] sm:$0xff] }
 0x1b3   :  { %16066 = vmatmul.mubr.msk.f32.vlgmr.msra.gmra.mrb[0].mxu1 %vm81_vm0, %v2559_v60  ;;  %v3057_v60 = vld [vmem:[#allocation2 + $0x6e] sm:$0xff] }
 0x1b4   :  { %16941 = vmatmul.mubr.msk.f32.gmra.mrb[20].mxu0 %vm81_vm0, %v2105_v0  ;;  %16068 = vmatprep.mubr.msk.f32.mxu1 %vm81_vm0, %v2560_v63  ;;  %v3051_v0 = vld [vmem:[#allocation2 + $0x3e] sm:$0xff]  ;;  %v9408_v63 = vld [vmem:[#allocation2 + $0x171] sm:$0xff] }
 0x1b5   :  { %16943 = vmatprep.mubr.msk.f32.mxu0 %vm81_vm0, %v2106_v2  ;;  %16129 = vmatpush3.msra.mxu1 %v19637_v38  ;;  %v2586_v38 = vld [vmem:[#allocation2 + $0xe9] sm:$0xff] }
 0x1b6   :  { %16193 = vmatprep.subr.mxu1 %v19815_v1  ;;  %v3052_v2 = vld [vmem:[#allocation2 + $0x46] sm:$0xff] }
 0x1b7   :  { %16069 = vmatmul.mubr.msk.f32.gmra.mrb[2].mxu1 %vm81_vm0, %v2561_v3  ;;  %v9409_v3 = vld [vmem:[#allocation2 + $0x179] sm:$0xff] }
 0x1b8   :  { %16944 = vmatmul.mubr.msk.f32.gmra.mrb[22].mxu0 %vm81_vm0, %v2107_v43  ;;  %16071 = vmatprep.mubr.msk.f32.mxu1 %vm81_vm0, %v2562_v6  ;;  %v3053_v43 = vld [vmem:[#allocation2 + $0x4e] sm:$0xff]  ;;  %v3059_v6 = vld [vmem:[#allocation2 + $0x7e] sm:$0xff] }
 0x1b9   :  { %16946 = vmatprep.mubr.msk.f32.mxu0 %vm81_vm0, %v2108_v5  ;;  %v3054_v5 = vld [vmem:[#allocation2 + $0x56] sm:$0xff] }
 0x1bb   :  { %16072 = vmatmul.mubr.msk.f32.gmra.mrb[4].mxu1 %vm81_vm0, %v2563_v10  ;;  %v9410_v10 = vld [vmem:[#allocation2 + $0x181] sm:$0xff] }
 0x1bc   :  { %16947 = vmatmul.mubr.msk.f32.gmra.mrb[24].mxu0 %vm81_vm0, %v2109_v51  ;;  %16074 = vmatprep.mubr.msk.f32.mxu1 %vm81_vm0, %v2564_v11  ;;  %v9405_v51 = vld [vmem:[#allocation2 + $0x159] sm:$0xff]  ;;  %v3060_v11 = vld [vmem:[#allocation2 + $0x86] sm:$0xff] }
 0x1bd   :  { %16949 = vmatprep.mubr.msk.f32.mxu0 %vm81_vm0, %v2110_v57  ;;  %v9406_v57 = vld [vmem:[#allocation2 + $0x161] sm:$0xff] }
 0x1bf   :  { %16075 = vmatmul.mubr.msk.f32.gmra.mrb[6].mxu1 %vm81_vm0, %v2565_v13  ;;  %v9411_v13 = vld [vmem:[#allocation2 + $0x189] sm:$0xff] }
 0x1c0   :  { %16950 = vmatmul.mubr.msk.f32.gmra.mrb[26].mxu0 %vm81_vm0, %v2111_v8  ;;  %16077 = vmatprep.mubr.msk.f32.mxu1 %vm81_vm0, %v2566_v15  ;;  %v3056_v8 = vld [vmem:[#allocation2 + $0x66] sm:$0xff]  ;;  %v3061_v15 = vld [vmem:[#allocation2 + $0x8e] sm:$0xff] }
 0x1c1   :  { %16952 = vmatprep.mubr.msk.f32.mxu0 %vm81_vm0, %v19679_v24  ;;  %v2592_v24 = vld [vmem:[#allocation2 + $0x119] sm:$0xff] }
 0x1c3   :  { %16078 = vmatmul.mubr.msk.f32.gmra.mrb[8].mxu1 %vm81_vm0, %v2567_v17  ;;  %v9412_v17 = vld [vmem:[#allocation2 + $0x191] sm:$0xff] }
 0x1c4   :  { %16953 = vmatmul.mubr.msk.f32.gmra.mrb[28].mxu0 %vm81_vm0, %v19681_v26  ;;  %16080 = vmatprep.mubr.msk.f32.mxu1 %vm81_vm0, %v2568_v56  ;;  %v2593_v26 = vld [vmem:[#allocation2 + $0x121] sm:$0xff]  ;;  %v3062_v56 = vld [vmem:[#allocation2 + $0x96] sm:$0xff] }
 0x1c5   :  { %16955 = vmatprep.mubr.msk.f32.mxu0 %vm81_vm0, %v19691_v29  ;;  %v2594_v29 = vld [vmem:[#allocation2 + $0x129] sm:$0xff] }
 0x1c7   :  { %16081 = vmatmul.mubr.msk.f32.gmra.mrb[10].mxu1 %vm81_vm0, %v2569_v18  ;;  %v9413_v18 = vld [vmem:[#allocation2 + $0x199] sm:$0xff] }
 0x1c8   :  { %16956 = vmatmul.mubr.msk.f32.gmra.mrb[30].mxu0 %vm81_vm0, %v19693_v32  ;;  %16083 = vmatprep.mubr.msk.f32.mxu1 %vm81_vm0, %v2570_v20  ;;  %v2595_v32 = vld [vmem:[#allocation2 + $0x131] sm:$0xff]  ;;  %v3063_v20 = vld [vmem:[#allocation2 + $0x9e] sm:$0xff] }
 0x1c9   :  { %16958 = vmatprep.mubr.msk.f32.mxu0 %vm81_vm0, %v19703_v36  ;;  %v2596_v36 = vld [vmem:[#allocation2 + $0x139] sm:$0xff] }
 0x1cb   :  { %16084 = vmatmul.mubr.msk.f32.gmra.mrb[12].mxu1 %vm81_vm0, %v2571_v28 }
 0x1cc   :  { %16959 = vmatmul.mubr.msk.f32.gmra.mrb[32].mxu0 %vm81_vm0, %v19705_v40  ;;  %16086 = vmatprep.mubr.msk.f32.mxu1 %vm81_vm0, %v2572_v31  ;;  %v2597_v40 = vld [vmem:[#allocation2 + $0x141] sm:$0xff] }
 0x1cd   :  { %16961 = vmatprep.mubr.msk.f32.mxu0 %vm81_vm0, %v19715_v45  ;;  %v2598_v45 = vld [vmem:[#allocation2 + $0x149] sm:$0xff] }
 0x1cf   :  { %16087 = vmatmul.mubr.msk.f32.gmra.mrb[14].mxu1 %vm81_vm0, %v2573_v33 }
 0x1d0   :  { %16962 = vmatmul.mubr.msk.f32.gmra.mrb[34].mxu0 %vm81_vm0, %v19717_v48  ;;  %16089 = vmatprep.mubr.msk.f32.mxu1 %vm81_vm0, %v2574_v35  ;;  %v2599_v48 = vld [vmem:[#allocation2 + $0x151] sm:$0xff] }
 0x1d1   :  { %16964 = vmatprep.mubr.msk.f32.mxu0 %vm81_vm0, %v19727_v53  ;;  %v3045_v53 = vld [vmem:[#allocation2 + $0xe] sm:$0xff] }
 0x1d3   :  { %16090 = vmatmul.mubr.msk.f32.gmra.mrb[16].mxu1 %vm81_vm0, %v2575_v37 }
 0x1d4   :  { %16965 = vmatmul.mubr.msk.f32.gmra.mrb[36].mxu0 %vm81_vm0, %v8926_v39  ;;  %16092 = vmatprep.mubr.msk.f32.mxu1 %vm81_vm0, %v2576_v41  ;;  %v3066_v39 = vld [vmem:[#allocation2 + $0xb6] sm:$0xff] }
 0x1d5   :  { %16967 = vmatprep.mubr.msk.f32.mxu0 %vm81_vm0, %v8927_v44  ;;  %v3067_v44 = vld [vmem:[#allocation2 + $0xbe] sm:$0xff] }
 0x1d7   :  { %16093 = vmatmul.mubr.msk.f32.gmra.mrb[18].mxu1 %vm81_vm0, %v2577_v46 }
 0x1d8   :  { %16968 = vmatmul.mubr.msk.f32.gmra.mrb[38].mxu0 %vm81_vm0, %v8928_v50  ;;  %16095 = vmatprep.mubr.msk.f32.mxu1 %vm81_vm0, %v2578_v55  ;;  %v3068_v50 = vld [vmem:[#allocation2 + $0xc6] sm:$0xff] }
 0x1d9   :  { %16970 = vmatprep.mubr.msk.f32.mxu0 %vm81_vm0, %v8929_v7  ;;  %v3069_v7 = vld [vmem:[#allocation2 + $0xce] sm:$0xff] }
 0x1db   :  { %16096 = vmatmul.mubr.msk.f32.gmra.mrb[20].mxu1 %vm81_vm0, %v2579_v9 }
 0x1dc   :  { %16971 = vmatmul.mubr.msk.f32.gmra.mrb[40].mxu0 %vm81_vm0, %v8930_v12  ;;  %16098 = vmatprep.mubr.msk.f32.mxu1 %vm81_vm0, %v2580_v14  ;;  %v19971_v12 = vld [vmem:[%s21339_s2 + $0xb0] sm:$0xff] }
 0x1dd   :  { %16975 = vmatprep.mubr.msk.f32.mxu0 %vm81_vm0, %v2571_v28  ;;  %v9414_v28 = vld [vmem:[#allocation2 + $0x1a1] sm:$0xff] }
 0x1df   :  { %16099 = vmatmul.mubr.msk.f32.gmra.mrb[22].mxu1 %vm81_vm0, %v2581_v16 }
 0x1e0   :  { %16976 = vmatmul.mubr.msk.f32.vlgmr.msra.gmra.mrb[0].mxu0 %vm81_vm0, %v2572_v31  ;;  %16101 = vmatprep.mubr.msk.f32.mxu1 %vm81_vm0, %v2582_v22  ;;  %v3064_v31 = vld [vmem:[#allocation2 + $0xa6] sm:$0xff] }
 0x1e1   :  { %17039 = vmatpush3.msra.mxu0 %v19740_v54  ;;  %16978 = vmatprep.mubr.msk.f32.mxu0 %vm81_vm0, %v2573_v33  ;;  %v3046_v54 = vld [vmem:[#allocation2 + $0x16] sm:$0xff]  ;;  %v9415_v33 = vld [vmem:[#allocation2 + $0x1a9] sm:$0xff] }
 0x1e2   :  { %17103 = vmatprep.subr.mxu0 %v19873_v23 }
 0x1e3   :  { %16102 = vmatmul.mubr.msk.f32.gmra.mrb[24].mxu1 %vm81_vm0, %v2583_v27 }
 0x1e4   :  { %16979 = vmatmul.mubr.msk.f32.gmra.mrb[2].mxu0 %vm81_vm0, %v2574_v35  ;;  %16104 = vmatprep.mubr.msk.f32.mxu1 %vm81_vm0, %v2584_v30  ;;  %v3065_v35 = vld [vmem:[#allocation2 + $0xae] sm:$0xff] }
 0x1e5   :  { %16981 = vmatprep.mubr.msk.f32.mxu0 %vm81_vm0, %v2575_v37  ;;  %v9416_v37 = vld [vmem:[#allocation2 + $0x1b1] sm:$0xff] }
 0x1e7   :  { %16105 = vmatmul.mubr.msk.f32.gmra.mrb[26].mxu1 %vm81_vm0, %v2585_v34 }
 0x1e8   :  { %16982 = vmatmul.mubr.msk.f32.gmra.mrb[4].mxu0 %vm81_vm0, %v2576_v41  ;;  %16107 = vmatprep.mubr.msk.f32.mxu1 %vm81_vm0, %v2586_v38  ;;  %v9417_v41 = vld [vmem:[#allocation2 + $0x1b9] sm:$0xff] }
 0x1e9   :  { %16984 = vmatprep.mubr.msk.f32.mxu0 %vm81_vm0, %v2577_v46  ;;  %v9863_v46 = vld [vmem:[#allocation2 + $0x72] sm:$0xff] }
 0x1eb   :  { %16108 = vmatmul.mubr.msk.f32.gmra.mrb[28].mxu1 %vm81_vm0, %v2587_v47 }
 0x1ec   :  { %16985 = vmatmul.mubr.msk.f32.gmra.mrb[6].mxu0 %vm81_vm0, %v2578_v55  ;;  %16110 = vmatprep.mubr.msk.f32.mxu1 %vm81_vm0, %v2588_v42  ;;  %v9864_v55 = vld [vmem:[#allocation2 + $0x7a] sm:$0xff] }
 0x1ed   :  { %16987 = vmatprep.mubr.msk.f32.mxu0 %vm81_vm0, %v2579_v9  ;;  %v9865_v9 = vld [vmem:[#allocation2 + $0x82] sm:$0xff] }
 0x1ef   :  { %16111 = vmatmul.mubr.msk.f32.gmra.mrb[30].mxu1 %vm81_vm0, %v2589_v19 }
 0x1f0   :  { %16988 = vmatmul.mubr.msk.f32.gmra.mrb[8].mxu0 %vm81_vm0, %v2580_v14  ;;  %16113 = vmatprep.mubr.msk.f32.mxu1 %vm81_vm0, %v2590_v52  ;;  %v3070_v14 = vld [vmem:[#allocation2 + $0xd6] sm:$0xff] }
 0x1f1   :  { %16990 = vmatprep.mubr.msk.f32.mxu0 %vm81_vm0, %v2581_v16  ;;  %v9866_v16 = vld [vmem:[#allocation2 + $0x8a] sm:$0xff] }
 0x1f3   :  { %16114 = vmatmul.mubr.msk.f32.gmra.mrb[32].mxu1 %vm81_vm0, %v2591_v21 }
 0x1f4   :  { %16991 = vmatmul.mubr.msk.f32.gmra.mrb[10].mxu0 %vm81_vm0, %v2582_v22  ;;  %16116 = vmatprep.mubr.msk.f32.mxu1 %vm81_vm0, %v2592_v24  ;;  %v3071_v22 = vld [vmem:[#allocation2 + $0xde] sm:$0xff] }
 0x1f5   :  { %16993 = vmatprep.mubr.msk.f32.mxu0 %vm81_vm0, %v2583_v27  ;;  %v9867_v27 = vld [vmem:[#allocation2 + $0x92] sm:$0xff] }
 0x1f7   :  { %16117 = vmatmul.mubr.msk.f32.gmra.mrb[34].mxu1 %vm81_vm0, %v2593_v26 }
 0x1f8   :  { %16994 = vmatmul.mubr.msk.f32.gmra.mrb[12].mxu0 %vm81_vm0, %v2584_v30  ;;  %16119 = vmatprep.mubr.msk.f32.mxu1 %vm81_vm0, %v2594_v29  ;;  %v3072_v30 = vld [vmem:[#allocation2 + $0xe6] sm:$0xff] }
 0x1f9   :  { %16996 = vmatprep.mubr.msk.f32.mxu0 %vm81_vm0, %v2585_v34  ;;  %v3073_v34 = vld [vmem:[#allocation2 + $0xee] sm:$0xff] }
 0x1fb   :  { %16120 = vmatmul.mubr.msk.f32.gmra.mrb[36].mxu1 %vm81_vm0, %v2595_v32 }
 0x1fc   :  { %16997 = vmatmul.mubr.msk.f32.gmra.mrb[14].mxu0 %vm81_vm0, %v2586_v38  ;;  %16122 = vmatprep.mubr.msk.f32.mxu1 %vm81_vm0, %v2596_v36  ;;  %v9869_v38 = vld [vmem:[#allocation2 + $0xa2] sm:$0xff] }
 0x1fd   :  { %16999 = vmatprep.mubr.msk.f32.mxu0 %vm81_vm0, %v2587_v47  ;;  %v3074_v47 = vld [vmem:[#allocation2 + $0xf6] sm:$0xff] }
 0x1ff   :  { %16123 = vmatmul.mubr.msk.f32.gmra.mrb[38].mxu1 %vm81_vm0, %v2597_v40 }
 0x200   :  { %17000 = vmatmul.mubr.msk.f32.gmra.mrb[16].mxu0 %vm81_vm0, %v2588_v42  ;;  %16125 = vmatprep.mubr.msk.f32.mxu1 %vm81_vm0, %v2598_v45  ;;  %v9870_v42 = vld [vmem:[#allocation2 + $0xaa] sm:$0xff] }
 0x201   :  { %17002 = vmatprep.mubr.msk.f32.mxu0 %vm81_vm0, %v2589_v19  ;;  %v3075_v19 = vld [vmem:[#allocation2 + $0xfe] sm:$0xff] }
 0x203   :  { %16126 = vmatmul.mubr.msk.f32.gmra.mrb[40].mxu1 %vm81_vm0, %v2599_v48 }
 0x204   :  { %17003 = vmatmul.mubr.msk.f32.gmra.mrb[18].mxu0 %vm81_vm0, %v2590_v52  ;;  %16130 = vmatprep.mubr.msk.f32.mxu1 %vm81_vm0, %v3045_v53  ;;  %v9871_v52 = vld [vmem:[#allocation2 + $0xb2] sm:$0xff]  ;;  %v9876_v53 = vld [vmem:[#allocation2 + $0xda] sm:$0xff] }
 0x205   :  { %17005 = vmatprep.mubr.msk.f32.mxu0 %vm81_vm0, %v2591_v21  ;;  %v3076_v21 = vld [vmem:[#allocation2 + $0x106] sm:$0xff] }
 0x207   :  { %16131 = vmatmul.mubr.msk.f32.vlgmr.msra.gmra.mrb[0].mxu1 %vm81_vm0, %v3046_v54  ;;  %v3081_v54 = vld [vmem:[#allocation2 + $0x12e] sm:$0xff] }
 0x208   :  { %17006 = vmatmul.mubr.msk.f32.gmra.mrb[20].mxu0 %vm81_vm0, %v2592_v24  ;;  %16133 = vmatprep.mubr.msk.f32.mxu1 %vm81_vm0, %v3047_v25  ;;  %v9872_v24 = vld [vmem:[#allocation2 + $0xba] sm:$0xff]  ;;  %v9877_v25 = vld [vmem:[#allocation2 + $0xe2] sm:$0xff] }
 0x209   :  { %17008 = vmatprep.mubr.msk.f32.mxu0 %vm81_vm0, %v2593_v26  ;;  %16194 = vmatpush3.msra.mxu1 %v19815_v1  ;;  %v3058_v1 = vld [vmem:[#allocation2 + $0x76] sm:$0xff]  ;;  %v3077_v26 = vld [vmem:[#allocation2 + $0x10e] sm:$0xff] }
 0x20a   :  { %16258 = vmatprep.subr.mxu1 %v19922_v61 }
 0x20b   :  { %16134 = vmatmul.mubr.msk.f32.gmra.mrb[2].mxu1 %vm81_vm0, %v3048_v58  ;;  %v3082_v58 = vld [vmem:[#allocation2 + $0x136] sm:$0xff] }
 0x20c   :  { %17009 = vmatmul.mubr.msk.f32.gmra.mrb[22].mxu0 %vm81_vm0, %v2594_v29  ;;  %16136 = vmatprep.mubr.msk.f32.mxu1 %vm81_vm0, %v3049_v4  ;;  %v9873_v29 = vld [vmem:[#allocation2 + $0xc2] sm:$0xff]  ;;  %v9878_v4 = vld [vmem:[#allocation2 + $0xea] sm:$0xff] }
 0x20d   :  { %17011 = vmatprep.mubr.msk.f32.mxu0 %vm81_vm0, %v2595_v32  ;;  %v3078_v32 = vld [vmem:[#allocation2 + $0x116] sm:$0xff] }
 0x20f   :  { %16137 = vmatmul.mubr.msk.f32.gmra.mrb[4].mxu1 %vm81_vm0, %v3050_v62  ;;  %v3083_v62 = vld [vmem:[#allocation2 + $0x13e] sm:$0xff] }
 0x210   :  { %17012 = vmatmul.mubr.msk.f32.gmra.mrb[24].mxu0 %vm81_vm0, %v2596_v36  ;;  %16139 = vmatprep.mubr.msk.f32.mxu1 %vm81_vm0, %v3051_v0  ;;  %v9874_v36 = vld [vmem:[#allocation2 + $0xca] sm:$0xff]  ;;  %v9879_v0 = vld [vmem:[#allocation2 + $0xf2] sm:$0xff] }
 0x211   :  { %17014 = vmatprep.mubr.msk.f32.mxu0 %vm81_vm0, %v2597_v40  ;;  %v3079_v40 = vld [vmem:[#allocation2 + $0x11e] sm:$0xff] }
 0x213   :  { %16140 = vmatmul.mubr.msk.f32.gmra.mrb[6].mxu1 %vm81_vm0, %v3052_v2  ;;  %v3084_v2 = vld [vmem:[#allocation2 + $0x146] sm:$0xff] }
 0x214   :  { %17015 = vmatmul.mubr.msk.f32.gmra.mrb[26].mxu0 %vm81_vm0, %v2598_v45  ;;  %16142 = vmatprep.mubr.msk.f32.mxu1 %vm81_vm0, %v3053_v43  ;;  %v9875_v45 = vld [vmem:[#allocation2 + $0xd2] sm:$0xff]  ;;  %v9880_v43 = vld [vmem:[#allocation2 + $0xfa] sm:$0xff] }
 0x215   :  { %17017 = vmatprep.mubr.msk.f32.mxu0 %vm81_vm0, %v2599_v48  ;;  %v3080_v48 = vld [vmem:[#allocation2 + $0x126] sm:$0xff] }
 0x217   :  { %16143 = vmatmul.mubr.msk.f32.gmra.mrb[8].mxu1 %vm81_vm0, %v3054_v5  ;;  %v3085_v5 = vld [vmem:[#allocation2 + $0x14e] sm:$0xff] }
 0x218   :  { %17018 = vmatmul.mubr.msk.f32.gmra.mrb[28].mxu0 %vm81_vm0, %v9405_v51  ;;  %16145 = vmatprep.mubr.msk.f32.mxu1 %vm81_vm0, %v3055_v49  ;;  %v9881_v51 = vld [vmem:[#allocation2 + $0x102] sm:$0xff]  ;;  %v3086_v49 = vld [vmem:[#allocation2 + $0x156] sm:$0xff] }
 0x219   :  { %17020 = vmatprep.mubr.msk.f32.mxu0 %vm81_vm0, %v9406_v57  ;;  %v9882_v57 = vld [vmem:[#allocation2 + $0x10a] sm:$0xff] }
 0x21b   :  { %16146 = vmatmul.mubr.msk.f32.gmra.mrb[10].mxu1 %vm81_vm0, %v3056_v8  ;;  %v3532_v8 = vld [vmem:[#allocation2 + $0xf] sm:$0xff] }
 0x21c   :  { %17021 = vmatmul.mubr.msk.f32.gmra.mrb[30].mxu0 %vm81_vm0, %v9407_v59  ;;  %16148 = vmatprep.mubr.msk.f32.mxu1 %vm81_vm0, %v3057_v60  ;;  %v9883_v59 = vld [vmem:[#allocation2 + $0x112] sm:$0xff] }
 0x21d   :  { %17023 = vmatprep.mubr.msk.f32.mxu0 %vm81_vm0, %v9408_v63  ;;  %v3533_v60 = vld [vmem:[#allocation2 + $0x17] sm:$0xff] }
 0x21e   :  { %v9884_v63 = vld [vmem:[#allocation2 + $0x11a] sm:$0xff] }
 0x21f   :  { %16149 = vmatmul.mubr.msk.f32.gmra.mrb[12].mxu1 %vm81_vm0, %v3058_v1  ;;  %v3534_v1 = vld [vmem:[#allocation2 + $0x1f] sm:$0xff] }
 0x220   :  { %17024 = vmatmul.mubr.msk.f32.gmra.mrb[32].mxu0 %vm81_vm0, %v9409_v3  ;;  %16151 = vmatprep.mubr.msk.f32.mxu1 %vm81_vm0, %v3059_v6  ;;  %v9885_v3 = vld [vmem:[#allocation2 + $0x122] sm:$0xff] }
 0x221   :  { %17026 = vmatprep.mubr.msk.f32.mxu0 %vm81_vm0, %v9410_v10  ;;  %v20020_v6 = vld [vmem:[%s21339_s2 + $0x48] sm:$0xff] }
 0x222   :  { %v3535_v10 = vld [vmem:[#allocation2 + $0x27] sm:$0xff] }
 0x223   :  { %16152 = vmatmul.mubr.msk.f32.gmra.mrb[14].mxu1 %vm81_vm0, %v3060_v11  ;;  %v9886_v11 = vld [vmem:[#allocation2 + $0x12a] sm:$0xff] }
 0x224   :  { %17027 = vmatmul.mubr.msk.f32.gmra.mrb[34].mxu0 %vm81_vm0, %v9411_v13  ;;  %16154 = vmatprep.mubr.msk.f32.mxu1 %vm81_vm0, %v3061_v15  ;;  %v3536_v13 = vld [vmem:[#allocation2 + $0x2f] sm:$0xff] }
 0x225   :  { %17029 = vmatprep.mubr.msk.f32.mxu0 %vm81_vm0, %v9412_v17  ;;  %v9887_v15 = vld [vmem:[#allocation2 + $0x132] sm:$0xff] }
 0x226   :  { %v3537_v17 = vld [vmem:[#allocation2 + $0x37] sm:$0xff] }
 0x227   :  { %16155 = vmatmul.mubr.msk.f32.gmra.mrb[16].mxu1 %vm81_vm0, %v3062_v56  ;;  %v9888_v56 = vld [vmem:[#allocation2 + $0x13a] sm:$0xff] }
 0x228   :  { %17030 = vmatmul.mubr.msk.f32.gmra.mrb[36].mxu0 %vm81_vm0, %v9413_v18  ;;  %16157 = vmatprep.mubr.msk.f32.mxu1 %vm81_vm0, %v3063_v20  ;;  %v3538_v18 = vld [vmem:[#allocation2 + $0x3f] sm:$0xff] }
 0x229   :  { %17032 = vmatprep.mubr.msk.f32.mxu0 %vm81_vm0, %v9414_v28  ;;  %v9889_v20 = vld [vmem:[#allocation2 + $0x142] sm:$0xff]  ;;  %v9890_v28 = vld [vmem:[#allocation2 + $0x14a] sm:$0xff] }
 0x22b   :  { %16158 = vmatmul.mubr.msk.f32.gmra.mrb[18].mxu1 %vm81_vm0, %v3064_v31  ;;  %v3540_v31 = vld [vmem:[#allocation2 + $0x4f] sm:$0xff] }
 0x22c   :  { %17033 = vmatmul.mubr.msk.f32.gmra.mrb[38].mxu0 %vm81_vm0, %v9415_v33  ;;  %16160 = vmatprep.mubr.msk.f32.mxu1 %vm81_vm0, %v3065_v35  ;;  %v9891_v33 = vld [vmem:[#allocation2 + $0x152] sm:$0xff] }
 0x22d   :  { %17035 = vmatprep.mubr.msk.f32.mxu0 %vm81_vm0, %v9416_v37  ;;  %v3541_v35 = vld [vmem:[#allocation2 + $0x57] sm:$0xff] }
 0x22e   :  { %v9892_v37 = vld [vmem:[#allocation2 + $0x15a] sm:$0xff] }
 0x22f   :  { %16161 = vmatmul.mubr.msk.f32.gmra.mrb[20].mxu1 %vm81_vm0, %v3066_v39  ;;  %v3542_v39 = vld [vmem:[#allocation2 + $0x5f] sm:$0xff] }
 0x230   :  { %17036 = vmatmul.mubr.msk.f32.gmra.mrb[40].mxu0 %vm81_vm0, %v9417_v41  ;;  %16163 = vmatprep.mubr.msk.f32.mxu1 %vm81_vm0, %v3067_v44  ;;  %v9893_v41 = vld [vmem:[#allocation2 + $0x162] sm:$0xff] }
 0x231   :  { %17040 = vmatprep.mubr.msk.f32.mxu0 %vm81_vm0, %v9863_v46  ;;  %v3543_v44 = vld [vmem:[#allocation2 + $0x67] sm:$0xff] }
 0x232   :  { %v9894_v46 = vld [vmem:[#allocation2 + $0x16a] sm:$0xff] }
 0x233   :  { %16164 = vmatmul.mubr.msk.f32.gmra.mrb[22].mxu1 %vm81_vm0, %v3068_v50  ;;  %v3544_v50 = vld [vmem:[#allocation2 + $0x6f] sm:$0xff] }
 0x234   :  { %17041 = vmatmul.mubr.msk.f32.vlgmr.msra.gmra.mrb[0].mxu0 %vm81_vm0, %v9864_v55  ;;  %16166 = vmatprep.mubr.msk.f32.mxu1 %vm81_vm0, %v3069_v7  ;;  %v9895_v55 = vld [vmem:[#allocation2 + $0x172] sm:$0xff] }
 0x235   :  { %17104 = vmatpush3.msra.mxu0 %v19873_v23  ;;  %17043 = vmatprep.mubr.msk.f32.mxu0 %vm81_vm0, %v9865_v9  ;;  %v9868_v23 = vld [vmem:[#allocation2 + $0x9a] sm:$0xff] }
 0x236   :  { %17168 = vmatprep.subr.mxu0 %v19971_v12  ;;  %v3545_v7 = vld [vmem:[#allocation2 + $0x77] sm:$0xff] }
 0x237   :  { %16167 = vmatmul.mubr.msk.f32.gmra.mrb[24].mxu1 %vm81_vm0, %v3070_v14  ;;  %v9896_v9 = vld [vmem:[#allocation2 + $0x17a] sm:$0xff] }
 0x238   :  { %17044 = vmatmul.mubr.msk.f32.gmra.mrb[2].mxu0 %vm81_vm0, %v9866_v16  ;;  %16169 = vmatprep.mubr.msk.f32.mxu1 %vm81_vm0, %v3071_v22  ;;  %v3546_v14 = vld [vmem:[#allocation2 + $0x7f] sm:$0xff]  ;;  %v3547_v22 = vld [vmem:[#allocation2 + $0x87] sm:$0xff] }
 0x239   :  { %17046 = vmatprep.mubr.msk.f32.mxu0 %vm81_vm0, %v9867_v27  ;;  %v9897_v16 = vld [vmem:[#allocation2 + $0x182] sm:$0xff]  ;;  %v9898_v27 = vld [vmem:[#allocation2 + $0x18a] sm:$0xff] }
 0x23b   :  { %16170 = vmatmul.mubr.msk.f32.gmra.mrb[26].mxu1 %vm81_vm0, %v3072_v30  ;;  %v3548_v30 = vld [vmem:[#allocation2 + $0x8f] sm:$0xff] }
 0x23c   :  { %17047 = vmatmul.mubr.msk.f32.gmra.mrb[4].mxu0 %vm81_vm0, %v9868_v23  ;;  %16172 = vmatprep.mubr.msk.f32.mxu1 %vm81_vm0, %v3073_v34  ;;  %v9899_v23 = vld [vmem:[#allocation2 + $0x192] sm:$0xff] }
 0x23d   :  { %17049 = vmatprep.mubr.msk.f32.mxu0 %vm81_vm0, %v9869_v38  ;;  %v3549_v34 = vld [vmem:[#allocation2 + $0x97] sm:$0xff] }
 0x23e   :  { %v9900_v38 = vld [vmem:[#allocation2 + $0x19a] sm:$0xff] }
 0x23f   :  { %16173 = vmatmul.mubr.msk.f32.gmra.mrb[28].mxu1 %vm81_vm0, %v3074_v47  ;;  %v3550_v47 = vld [vmem:[#allocation2 + $0x9f] sm:$0xff] }
 0x240   :  { %17050 = vmatmul.mubr.msk.f32.gmra.mrb[6].mxu0 %vm81_vm0, %v9870_v42  ;;  %16175 = vmatprep.mubr.msk.f32.mxu1 %vm81_vm0, %v3075_v19  ;;  %v9901_v42 = vld [vmem:[#allocation2 + $0x1a2] sm:$0xff] }
 0x241   :  { %17052 = vmatprep.mubr.msk.f32.mxu0 %vm81_vm0, %v9871_v52  ;;  %v3551_v19 = vld [vmem:[#allocation2 + $0xa7] sm:$0xff] }
 0x242   :  { %v9902_v52 = vld [vmem:[#allocation2 + $0x1aa] sm:$0xff] }
 0x243   :  { %16176 = vmatmul.mubr.msk.f32.gmra.mrb[30].mxu1 %vm81_vm0, %v3076_v21  ;;  %v3552_v21 = vld [vmem:[#allocation2 + $0xaf] sm:$0xff] }
 0x244   :  { %17053 = vmatmul.mubr.msk.f32.gmra.mrb[8].mxu0 %vm81_vm0, %v9872_v24  ;;  %16178 = vmatprep.mubr.msk.f32.mxu1 %vm81_vm0, %v3077_v26  ;;  %v9903_v24 = vld [vmem:[#allocation2 + $0x1b2] sm:$0xff] }
 0x245   :  { %17055 = vmatprep.mubr.msk.f32.mxu0 %vm81_vm0, %v9873_v29  ;;  %v3553_v26 = vld [vmem:[#allocation2 + $0xb7] sm:$0xff] }
 0x246   :  { %v9904_v29 = vld [vmem:[#allocation2 + $0x1ba] sm:$0xff] }
 0x247   :  { %16179 = vmatmul.mubr.msk.f32.gmra.mrb[32].mxu1 %vm81_vm0, %v3078_v32  ;;  %v3554_v32 = vld [vmem:[#allocation2 + $0xbf] sm:$0xff] }
 0x248   :  { %17056 = vmatmul.mubr.msk.f32.gmra.mrb[10].mxu0 %vm81_vm0, %v9874_v36  ;;  %16181 = vmatprep.mubr.msk.f32.mxu1 %vm81_vm0, %v3079_v40  ;;  %v3555_v36 = vld [vmem:[#allocation2 + $0xc7] sm:$0xff]  ;;  %v3556_v40 = vld [vmem:[#allocation2 + $0xcf] sm:$0xff] }
 0x249   :  { %17058 = vmatprep.mubr.msk.f32.mxu0 %vm81_vm0, %v9875_v45  ;;  %v20069_v45 = vld [vmem:[%s21339_s2 + $0xb8] sm:$0xff] }
 0x24b   :  { %16182 = vmatmul.mubr.msk.f32.gmra.mrb[34].mxu1 %vm81_vm0, %v3080_v48  ;;  %v3557_v48 = vld [vmem:[#allocation2 + $0xd7] sm:$0xff] }
 0x24c   :  { %17059 = vmatmul.mubr.msk.f32.gmra.mrb[12].mxu0 %vm81_vm0, %v9876_v53  ;;  %16184 = vmatprep.mubr.msk.f32.mxu1 %vm81_vm0, %v3081_v54  ;;  %v3558_v53 = vld [vmem:[#allocation2 + $0xdf] sm:$0xff]  ;;  %v3559_v54 = vld [vmem:[#allocation2 + $0xe7] sm:$0xff] }
 0x24d   :  { %17061 = vmatprep.mubr.msk.f32.mxu0 %vm81_vm0, %v9877_v25  ;;  %v3560_v25 = vld [vmem:[#allocation2 + $0xef] sm:$0xff] }
 0x24f   :  { %16185 = vmatmul.mubr.msk.f32.gmra.mrb[36].mxu1 %vm81_vm0, %v3082_v58  ;;  %v3562_v58 = vld [vmem:[#allocation2 + $0xff] sm:$0xff] }
 0x250   :  { %17062 = vmatmul.mubr.msk.f32.gmra.mrb[14].mxu0 %vm81_vm0, %v9878_v4  ;;  %16187 = vmatprep.mubr.msk.f32.mxu1 %vm81_vm0, %v3083_v62  ;;  %v3563_v4 = vld [vmem:[#allocation2 + $0x107] sm:$0xff]  ;;  %v3564_v62 = vld [vmem:[#allocation2 + $0x10f] sm:$0xff] }
 0x251   :  { %17064 = vmatprep.mubr.msk.f32.mxu0 %vm81_vm0, %v9879_v0  ;;  %v3565_v0 = vld [vmem:[#allocation2 + $0x117] sm:$0xff] }
 0x253   :  { %16188 = vmatmul.mubr.msk.f32.gmra.mrb[38].mxu1 %vm81_vm0, %v3084_v2  ;;  %v3566_v2 = vld [vmem:[#allocation2 + $0x11f] sm:$0xff] }
 0x254   :  { %17065 = vmatmul.mubr.msk.f32.gmra.mrb[16].mxu0 %vm81_vm0, %v9880_v43  ;;  %16190 = vmatprep.mubr.msk.f32.mxu1 %vm81_vm0, %v3085_v5  ;;  %v3567_v43 = vld [vmem:[#allocation2 + $0x127] sm:$0xff]  ;;  %v3568_v5 = vld [vmem:[#allocation2 + $0x12f] sm:$0xff] }
 0x255   :  { %17067 = vmatprep.mubr.msk.f32.mxu0 %vm81_vm0, %v9881_v51  ;;  %v3569_v51 = vld [vmem:[#allocation2 + $0x137] sm:$0xff] }
 0x257   :  { %16191 = vmatmul.mubr.msk.f32.gmra.mrb[40].mxu1 %vm81_vm0, %v3086_v49  ;;  %v3570_v49 = vld [vmem:[#allocation2 + $0x13f] sm:$0xff] }
 0x258   :  { %17068 = vmatmul.mubr.msk.f32.gmra.mrb[18].mxu0 %vm81_vm0, %v9882_v57  ;;  %16195 = vmatprep.mubr.msk.f32.mxu1 %vm81_vm0, %v3532_v8  ;;  %v3571_v57 = vld [vmem:[#allocation2 + $0x147] sm:$0xff]  ;;  %v3572_v8 = vld [vmem:[#allocation2 + $0x14f] sm:$0xff] }
 0x259   :  { %17070 = vmatprep.mubr.msk.f32.mxu0 %vm81_vm0, %v9883_v59  ;;  %v3573_v59 = vld [vmem:[#allocation2 + $0x157] sm:$0xff] }
 0x25b   :  { %16196 = vmatmul.mubr.msk.f32.vlgmr.msra.gmra.mrb[0].mxu1 %vm81_vm0, %v3533_v60  ;;  %v4019_v60 = vld [vmem:[#allocation2 + $0x10] sm:$0xff] }
 0x25c   :  { %17071 = vmatmul.mubr.msk.f32.gmra.mrb[20].mxu0 %vm81_vm0, %v9884_v63  ;;  %16198 = vmatprep.mubr.msk.f32.mxu1 %vm81_vm0, %v3534_v1  ;;  %v4020_v63 = vld [vmem:[#allocation2 + $0x18] sm:$0xff]  ;;  %v4021_v1 = vld [vmem:[#allocation2 + $0x20] sm:$0xff] }
 0x25d   :  { %17073 = vmatprep.mubr.msk.f32.mxu0 %vm81_vm0, %v9885_v3  ;;  %16259 = vmatpush3.msra.mxu1 %v19922_v61  ;;  %v3539_v61 = vld [vmem:[#allocation2 + $0x47] sm:$0xff]  ;;  %v20118_v3 = vld [vmem:[%s21339_s2 + $0x50] sm:$0xff] }
 0x25e   :  { %16323 = vmatprep.subr.mxu1 %v20020_v6 }
 0x25f   :  { %16199 = vmatmul.mubr.msk.f32.gmra.mrb[2].mxu1 %vm81_vm0, %v3535_v10  ;;  %v4022_v10 = vld [vmem:[#allocation2 + $0x28] sm:$0xff] }
 0x260   :  { %17074 = vmatmul.mubr.msk.f32.gmra.mrb[22].mxu0 %vm81_vm0, %v9886_v11  ;;  %16201 = vmatprep.mubr.msk.f32.mxu1 %vm81_vm0, %v3536_v13  ;;  %v4023_v11 = vld [vmem:[#allocation2 + $0x30] sm:$0xff]  ;;  %v20128_v13 = vld [vmem:[#allocation2 + $0x38] sm:$0xff] }
 0x261   :  { %17076 = vmatprep.mubr.msk.f32.mxu0 %vm81_vm0, %v9887_v15  ;;  %v20130_v15 = vld [vmem:[#allocation2 + $0x40] sm:$0xff] }
 0x263   :  { %16202 = vmatmul.mubr.msk.f32.gmra.mrb[4].mxu1 %vm81_vm0, %v3537_v17  ;;  %v20140_v17 = vld [vmem:[#allocation2 + $0x50] sm:$0xff] }
 0x264   :  { %17077 = vmatmul.mubr.msk.f32.gmra.mrb[24].mxu0 %vm81_vm0, %v9888_v56  ;;  %16204 = vmatprep.mubr.msk.f32.mxu1 %vm81_vm0, %v3538_v18  ;;  %v20148_v56 = vld [vmem:[#allocation2 + $0x58] sm:$0xff] }
 0x265   :  { %17079 = vmatprep.mubr.msk.f32.mxu0 %vm81_vm0, %v9889_v20  ;;  %v10379_v18 = vld [vmem:[#allocation2 + $0x15f] sm:$0xff] }
 0x266   :  { %v20150_v20 = vld [vmem:[#allocation2 + $0x60] sm:$0xff] }
 0x267   :  { %16205 = vmatmul.mubr.msk.f32.gmra.mrb[6].mxu1 %vm81_vm0, %v3539_v61  ;;  %v10380_v61 = vld [vmem:[#allocation2 + $0x167] sm:$0xff] }
 0x268   :  { %17080 = vmatmul.mubr.msk.f32.gmra.mrb[26].mxu0 %vm81_vm0, %v9890_v28  ;;  %16207 = vmatprep.mubr.msk.f32.mxu1 %vm81_vm0, %v3540_v31  ;;  %v20158_v28 = vld [vmem:[#allocation2 + $0x68] sm:$0xff] }
 0x269   :  { %17082 = vmatprep.mubr.msk.f32.mxu0 %vm81_vm0, %v9891_v33  ;;  %v10381_v31 = vld [vmem:[#allocation2 + $0x16f] sm:$0xff] }
 0x26a   :  { %v20160_v33 = vld [vmem:[#allocation2 + $0x70] sm:$0xff] }
 0x26b   :  { %16208 = vmatmul.mubr.msk.f32.gmra.mrb[8].mxu1 %vm81_vm0, %v3541_v35  ;;  %v10382_v35 = vld [vmem:[#allocation2 + $0x177] sm:$0xff] }
 0x26c   :  { %17083 = vmatmul.mubr.msk.f32.gmra.mrb[28].mxu0 %vm81_vm0, %v9892_v37  ;;  %16210 = vmatprep.mubr.msk.f32.mxu1 %vm81_vm0, %v3542_v39  ;;  %v20168_v37 = vld [vmem:[#allocation2 + $0x78] sm:$0xff] }
 0x26d   :  { %17085 = vmatprep.mubr.msk.f32.mxu0 %vm81_vm0, %v9893_v41  ;;  %v10383_v39 = vld [vmem:[#allocation2 + $0x17f] sm:$0xff] }
 0x26e   :  { %v20170_v41 = vld [vmem:[#allocation2 + $0x80] sm:$0xff] }
 0x26f   :  { %16211 = vmatmul.mubr.msk.f32.gmra.mrb[10].mxu1 %vm81_vm0, %v3543_v44  ;;  %v10384_v44 = vld [vmem:[#allocation2 + $0x187] sm:$0xff] }
 0x270   :  { %17086 = vmatmul.mubr.msk.f32.gmra.mrb[30].mxu0 %vm81_vm0, %v9894_v46  ;;  %16213 = vmatprep.mubr.msk.f32.mxu1 %vm81_vm0, %v3544_v50  ;;  %v20178_v46 = vld [vmem:[#allocation2 + $0x88] sm:$0xff] }
 0x271   :  { %17088 = vmatprep.mubr.msk.f32.mxu0 %vm81_vm0, %v9895_v55  ;;  %v10385_v50 = vld [vmem:[#allocation2 + $0x18f] sm:$0xff] }
 0x272   :  { %v20180_v55 = vld [vmem:[#allocation2 + $0x90] sm:$0xff] }
 0x273   :  { %16214 = vmatmul.mubr.msk.f32.gmra.mrb[12].mxu1 %vm81_vm0, %v3545_v7 }
 0x274   :  { %17089 = vmatmul.mubr.msk.f32.gmra.mrb[32].mxu0 %vm81_vm0, %v9896_v9  ;;  %16216 = vmatprep.mubr.msk.f32.mxu1 %vm81_vm0, %v3546_v14  ;;  %v20188_v9 = vld [vmem:[#allocation2 + $0x98] sm:$0xff] }
 0x275   :  { %17091 = vmatprep.mubr.msk.f32.mxu0 %vm81_vm0, %v9897_v16  ;;  %v20190_v16 = vld [vmem:[#allocation2 + $0xa0] sm:$0xff] }
 0x277   :  { %16217 = vmatmul.mubr.msk.f32.gmra.mrb[14].mxu1 %vm81_vm0, %v3547_v22 }
 0x278   :  { %17092 = vmatmul.mubr.msk.f32.gmra.mrb[34].mxu0 %vm81_vm0, %v9898_v27  ;;  %16219 = vmatprep.mubr.msk.f32.mxu1 %vm81_vm0, %v3548_v30  ;;  %v20198_v27 = vld [vmem:[#allocation2 + $0xa8] sm:$0xff] }
 0x279   :  { %17094 = vmatprep.mubr.msk.f32.mxu0 %vm81_vm0, %v9899_v23  ;;  %v20200_v23 = vld [vmem:[#allocation2 + $0xb0] sm:$0xff] }
 0x27b   :  { %16220 = vmatmul.mubr.msk.f32.gmra.mrb[16].mxu1 %vm81_vm0, %v3549_v34 }
 0x27c   :  { %17095 = vmatmul.mubr.msk.f32.gmra.mrb[36].mxu0 %vm81_vm0, %v9900_v38  ;;  %16222 = vmatprep.mubr.msk.f32.mxu1 %vm81_vm0, %v3550_v47  ;;  %v20208_v38 = vld [vmem:[#allocation2 + $0xb8] sm:$0xff] }
 0x27d   :  { %17097 = vmatprep.mubr.msk.f32.mxu0 %vm81_vm0, %v9901_v42  ;;  %v20210_v42 = vld [vmem:[#allocation2 + $0xc0] sm:$0xff] }
 0x27f   :  { %16223 = vmatmul.mubr.msk.f32.gmra.mrb[18].mxu1 %vm81_vm0, %v3551_v19 }
 0x280   :  { %17098 = vmatmul.mubr.msk.f32.gmra.mrb[38].mxu0 %vm81_vm0, %v9902_v52  ;;  %16225 = vmatprep.mubr.msk.f32.mxu1 %vm81_vm0, %v3552_v21  ;;  %v20221_v52 = vld [vmem:[#allocation2 + $0xd0] sm:$0xff] }
 0x281   :  { %17100 = vmatprep.mubr.msk.f32.mxu0 %vm81_vm0, %v9903_v24  ;;  %v20235_v24 = vld [vmem:[#allocation2 + $0xd8] sm:$0xff] }
 0x283   :  { %16226 = vmatmul.mubr.msk.f32.gmra.mrb[20].mxu1 %vm81_vm0, %v3553_v26 }
 0x284   :  { %17101 = vmatmul.mubr.msk.f32.gmra.mrb[40].mxu0 %vm81_vm0, %v9904_v29  ;;  %16228 = vmatprep.mubr.msk.f32.mxu1 %vm81_vm0, %v3554_v32  ;;  %v20250_v29 = vld [vmem:[#allocation2 + $0xe8] sm:$0xff] }
 0x285   :  { %17105 = vmatprep.mubr.msk.f32.mxu0 %vm81_vm0, %v3545_v7  ;;  %v10386_v7 = vld [vmem:[#allocation2 + $0x197] sm:$0xff] }
 0x287   :  { %16229 = vmatmul.mubr.msk.f32.gmra.mrb[22].mxu1 %vm81_vm0, %v3555_v36 }
 0x288   :  { %17106 = vmatmul.mubr.msk.f32.vlgmr.msra.gmra.mrb[0].mxu0 %vm81_vm0, %v3546_v14  ;;  %16231 = vmatprep.mubr.msk.f32.mxu1 %vm81_vm0, %v3556_v40  ;;  %v10387_v14 = vld [vmem:[#allocation2 + $0x19f] sm:$0xff] }
 0x289   :  { %17169 = vmatpush3.msra.mxu0 %v19971_v12  ;;  %17108 = vmatprep.mubr.msk.f32.mxu0 %vm81_vm0, %v3547_v22  ;;  %v3561_v12 = vld [vmem:[#allocation2 + $0xf7] sm:$0xff]  ;;  %v10388_v22 = vld [vmem:[#allocation2 + $0x1a7] sm:$0xff] }
 0x28a   :  { %17233 = vmatprep.subr.mxu0 %v20069_v45 }
 0x28b   :  { %16232 = vmatmul.mubr.msk.f32.gmra.mrb[24].mxu1 %vm81_vm0, %v3557_v48 }
 0x28c   :  { %17109 = vmatmul.mubr.msk.f32.gmra.mrb[2].mxu0 %vm81_vm0, %v3548_v30  ;;  %16234 = vmatprep.mubr.msk.f32.mxu1 %vm81_vm0, %v3558_v53  ;;  %v10389_v30 = vld [vmem:[#allocation2 + $0x1af] sm:$0xff] }
 0x28d   :  { %17111 = vmatprep.mubr.msk.f32.mxu0 %vm81_vm0, %v3549_v34  ;;  %v10390_v34 = vld [vmem:[#allocation2 + $0x1b7] sm:$0xff] }
 0x28f   :  { %16235 = vmatmul.mubr.msk.f32.gmra.mrb[26].mxu1 %vm81_vm0, %v3559_v54 }
 0x290   :  { %17112 = vmatmul.mubr.msk.f32.gmra.mrb[4].mxu0 %vm81_vm0, %v3550_v47  ;;  %16237 = vmatprep.mubr.msk.f32.mxu1 %vm81_vm0, %v3560_v25  ;;  %v10391_v47 = vld [vmem:[#allocation2 + $0x1bf] sm:$0xff] }
 0x291   :  { %17114 = vmatprep.mubr.msk.f32.mxu0 %vm81_vm0, %v3551_v19  ;;  %v20219_v19 = vld [vmem:[#allocation2 + $0xc8] sm:$0xff] }
 0x293   :  { %16238 = vmatmul.mubr.msk.f32.gmra.mrb[28].mxu1 %vm81_vm0, %v3561_v12 }
 0x294   :  { %17115 = vmatmul.mubr.msk.f32.gmra.mrb[6].mxu0 %vm81_vm0, %v3552_v21  ;;  %16240 = vmatprep.mubr.msk.f32.mxu1 %vm81_vm0, %v3562_v58  ;;  %v20226_v21 = vld [vmem:[%s21339_s2 + $0xc0] sm:$0xff] }
 0x295   :  { %17117 = vmatprep.mubr.msk.f32.mxu0 %vm81_vm0, %v3553_v26  ;;  %v20239_v26 = vld [vmem:[#allocation2 + $0xe0] sm:$0xff] }
 0x297   :  { %16241 = vmatmul.mubr.msk.f32.gmra.mrb[30].mxu1 %vm81_vm0, %v3563_v4 }
 0x298   :  { %17118 = vmatmul.mubr.msk.f32.gmra.mrb[8].mxu0 %vm81_vm0, %v3554_v32  ;;  %16243 = vmatprep.mubr.msk.f32.mxu1 %vm81_vm0, %v3564_v62  ;;  %v20252_v32 = vld [vmem:[#allocation2 + $0xf0] sm:$0xff] }
 0x299   :  { %17120 = vmatprep.mubr.msk.f32.mxu0 %vm81_vm0, %v3555_v36  ;;  %v20262_v36 = vld [vmem:[#allocation2 + $0xf8] sm:$0xff] }
 0x29b   :  { %16244 = vmatmul.mubr.msk.f32.gmra.mrb[32].mxu1 %vm81_vm0, %v3565_v0 }
 0x29c   :  { %17121 = vmatmul.mubr.msk.f32.gmra.mrb[10].mxu0 %vm81_vm0, %v3556_v40  ;;  %16246 = vmatprep.mubr.msk.f32.mxu1 %vm81_vm0, %v3566_v2  ;;  %v20264_v40 = vld [vmem:[#allocation2 + $0x100] sm:$0xff] }
 0x29d   :  { %17123 = vmatprep.mubr.msk.f32.mxu0 %vm81_vm0, %v3557_v48  ;;  %v20276_v48 = vld [vmem:[#allocation2 + $0x110] sm:$0xff] }
 0x29f   :  { %16247 = vmatmul.mubr.msk.f32.gmra.mrb[34].mxu1 %vm81_vm0, %v3567_v43 }
 0x2a0   :  { %17124 = vmatmul.mubr.msk.f32.gmra.mrb[12].mxu0 %vm81_vm0, %v3558_v53  ;;  %16249 = vmatprep.mubr.msk.f32.mxu1 %vm81_vm0, %v3568_v5  ;;  %v20286_v53 = vld [vmem:[#allocation2 + $0x118] sm:$0xff] }
 0x2a1   :  { %17126 = vmatprep.mubr.msk.f32.mxu0 %vm81_vm0, %v3559_v54  ;;  %v20288_v54 = vld [vmem:[#allocation2 + $0x120] sm:$0xff] }
 0x2a3   :  { %16250 = vmatmul.mubr.msk.f32.gmra.mrb[36].mxu1 %vm81_vm0, %v3569_v51 }
 0x2a4   :  { %17127 = vmatmul.mubr.msk.f32.gmra.mrb[14].mxu0 %vm81_vm0, %v3560_v25  ;;  %16252 = vmatprep.mubr.msk.f32.mxu1 %vm81_vm0, %v3570_v49  ;;  %v20298_v25 = vld [vmem:[#allocation2 + $0x128] sm:$0xff] }
 0x2a5   :  { %17129 = vmatprep.mubr.msk.f32.mxu0 %vm81_vm0, %v3561_v12  ;;  %v20300_v12 = vld [vmem:[#allocation2 + $0x130] sm:$0xff] }
 0x2a7   :  { %16253 = vmatmul.mubr.msk.f32.gmra.mrb[38].mxu1 %vm81_vm0, %v3571_v57 }
 0x2a8   :  { %17130 = vmatmul.mubr.msk.f32.gmra.mrb[16].mxu0 %vm81_vm0, %v3562_v58  ;;  %16255 = vmatprep.mubr.msk.f32.mxu1 %vm81_vm0, %v3572_v8  ;;  %v20310_v58 = vld [vmem:[#allocation2 + $0x138] sm:$0xff] }
 0x2a9   :  { %17132 = vmatprep.mubr.msk.f32.mxu0 %vm81_vm0, %v3563_v4  ;;  %v20312_v4 = vld [vmem:[#allocation2 + $0x140] sm:$0xff] }
 0x2ab   :  { %16256 = vmatmul.mubr.msk.f32.gmra.mrb[40].mxu1 %vm81_vm0, %v3573_v59 }
 0x2ac   :  { %17133 = vmatmul.mubr.msk.f32.gmra.mrb[18].mxu0 %vm81_vm0, %v3564_v62  ;;  %16260 = vmatprep.mubr.msk.f32.mxu1 %vm81_vm0, %v4019_v60  ;;  %v13389_v62 = vld [vmem:[%s21341_s1 + $0x1c8] sm:$0xff] }
 0x2ad   :  { %17135 = vmatprep.mubr.msk.f32.mxu0 %vm81_vm0, %v3565_v0  ;;  %181 = vst.msk [vmem:[#allocation2 + $0x1c8] sm:$0xff] %vm81_vm0, %v13389_v62  ;;  %v20326_v0 = vld [vmem:[#allocation2 + $0x148] sm:$0xff]  ;;  %v11360_v62 = vld [vmem:[#allocation2 + $0x199] sm:$0xff] }
 0x2ae   :  { %v10871_v60 = vld [vmem:[#allocation2 + $0x188] sm:$0xff] }
 0x2af   :  { %16261 = vmatmul.mubr.msk.f32.vlgmr.msra.gmra.mrb[0].mxu1 %vm81_vm0, %v4020_v63  ;;  %v10872_v63 = vld [vmem:[#allocation2 + $0x190] sm:$0xff] }
 0x2b0   :  { %17136 = vmatmul.mubr.msk.f32.gmra.mrb[20].mxu0 %vm81_vm0, %v3566_v2  ;;  %16263 = vmatprep.mubr.msk.f32.mxu1 %vm81_vm0, %v4021_v1  ;;  %v20328_v2 = vld [vmem:[#allocation2 + $0x150] sm:$0xff]  ;;  %v10873_v1 = vld [vmem:[#allocation2 + $0x198] sm:$0xff] }
 0x2b1   :  { %17138 = vmatprep.mubr.msk.f32.mxu0 %vm81_vm0, %v3567_v43  ;;  %16324 = vmatpush3.msra.mxu1 %v20020_v6  ;;  %v20138_v6 = vld [vmem:[#allocation2 + $0x48] sm:$0xff]  ;;  %v20338_v43 = vld [vmem:[#allocation2 + $0x158] sm:$0xff] }
 0x2b2   :  { %16388 = vmatprep.subr.mxu1 %v20118_v3 }
 0x2b3   :  { %16264 = vmatmul.mubr.msk.f32.gmra.mrb[2].mxu1 %vm81_vm0, %v4022_v10  ;;  %v10875_v10 = vld [vmem:[#allocation2 + $0x1a8] sm:$0xff] }
 0x2b4   :  { %17139 = vmatmul.mubr.msk.f32.gmra.mrb[22].mxu0 %vm81_vm0, %v3568_v5  ;;  %16266 = vmatprep.mubr.msk.f32.mxu1 %vm81_vm0, %v4023_v11  ;;  %v20355_v5 = vld [vmem:[%s21339_s2 + $0x58] sm:$0xff]  ;;  %v10876_v11 = vld [vmem:[#allocation2 + $0x1b0] sm:$0xff] }
 0x2b5   :  { %17141 = vmatprep.mubr.msk.f32.mxu0 %vm81_vm0, %v3569_v51  ;;  %v20387_v51 = vld [vmem:[#allocation2 + $0x160] sm:$0xff] }
 0x2b7   :  { %16267 = vmatmul.mubr.msk.f32.gmra.mrb[4].mxu1 %vm81_vm0, %v20128_v13 }
 0x2b8   :  { %17142 = vmatmul.mubr.msk.f32.gmra.mrb[24].mxu0 %vm81_vm0, %v3570_v49  ;;  %16269 = vmatprep.mubr.msk.f32.mxu1 %vm81_vm0, %v20130_v15  ;;  %v20389_v49 = vld [vmem:[#allocation2 + $0x168] sm:$0xff] }
 0x2b9   :  { %17144 = vmatprep.mubr.msk.f32.mxu0 %vm81_vm0, %v3571_v57  ;;  %v20399_v57 = vld [vmem:[#allocation2 + $0x170] sm:$0xff] }
 0x2bb   :  { %16270 = vmatmul.mubr.msk.f32.gmra.mrb[6].mxu1 %vm81_vm0, %v20138_v6 }
 0x2bc   :  { %17145 = vmatmul.mubr.msk.f32.gmra.mrb[26].mxu0 %vm81_vm0, %v3572_v8  ;;  %16272 = vmatprep.mubr.msk.f32.mxu1 %vm81_vm0, %v20140_v17  ;;  %v20401_v8 = vld [vmem:[#allocation2 + $0x178] sm:$0xff] }
 0x2bd   :  { %17147 = vmatprep.mubr.msk.f32.mxu0 %vm81_vm0, %v3573_v59  ;;  %v20411_v59 = vld [vmem:[#allocation2 + $0x180] sm:$0xff] }
 0x2bf   :  { %16273 = vmatmul.mubr.msk.f32.gmra.mrb[8].mxu1 %vm81_vm0, %v20148_v56 }
 0x2c0   :  { %17148 = vmatmul.mubr.msk.f32.gmra.mrb[28].mxu0 %vm81_vm0, %v10379_v18  ;;  %16275 = vmatprep.mubr.msk.f32.mxu1 %vm81_vm0, %v20150_v20  ;;  %v20454_v18 = vld [vmem:[%s21339_s2 + $0xc8] sm:$0xff] }
 0x2c1   :  { %17150 = vmatprep.mubr.msk.f32.mxu0 %vm81_vm0, %v10380_v61  ;;  %v20467_v61 = vld [vmem:[#allocation2 + $0x99] sm:$0xff] }
 0x2c3   :  { %16276 = vmatmul.mubr.msk.f32.gmra.mrb[10].mxu1 %vm81_vm0, %v20158_v28 }
 0x2c4   :  { %17151 = vmatmul.mubr.msk.f32.gmra.mrb[30].mxu0 %vm81_vm0, %v10381_v31  ;;  %16278 = vmatprep.mubr.msk.f32.mxu1 %vm81_vm0, %v20160_v33  ;;  %v20480_v31 = vld [vmem:[#allocation2 + $0xa9] sm:$0xff] }
 0x2c5   :  { %17153 = vmatprep.mubr.msk.f32.mxu0 %vm81_vm0, %v10382_v35  ;;  %v20492_v35 = vld [vmem:[#allocation2 + $0xb9] sm:$0xff] }
 0x2c7   :  { %16279 = vmatmul.mubr.msk.f32.gmra.mrb[12].mxu1 %vm81_vm0, %v20168_v37 }
 0x2c8   :  { %17154 = vmatmul.mubr.msk.f32.gmra.mrb[32].mxu0 %vm81_vm0, %v10383_v39  ;;  %16281 = vmatprep.mubr.msk.f32.mxu1 %vm81_vm0, %v20170_v41  ;;  %v20504_v39 = vld [vmem:[#allocation2 + $0xc9] sm:$0xff] }
 0x2c9   :  { %17156 = vmatprep.mubr.msk.f32.mxu0 %vm81_vm0, %v10384_v44  ;;  %v20516_v44 = vld [vmem:[#allocation2 + $0xd9] sm:$0xff] }
 0x2cb   :  { %16282 = vmatmul.mubr.msk.f32.gmra.mrb[14].mxu1 %vm81_vm0, %v20178_v46 }
 0x2cc   :  { %17157 = vmatmul.mubr.msk.f32.gmra.mrb[34].mxu0 %vm81_vm0, %v10385_v50  ;;  %16284 = vmatprep.mubr.msk.f32.mxu1 %vm81_vm0, %v20180_v55  ;;  %v20528_v50 = vld [vmem:[#allocation2 + $0xe9] sm:$0xff] }
 0x2cd   :  { %17159 = vmatprep.mubr.msk.f32.mxu0 %vm81_vm0, %v10386_v7  ;;  %v20540_v7 = vld [vmem:[#allocation2 + $0xf9] sm:$0xff] }
 0x2cf   :  { %16285 = vmatmul.mubr.msk.f32.gmra.mrb[16].mxu1 %vm81_vm0, %v20188_v9 }
 0x2d0   :  { %17160 = vmatmul.mubr.msk.f32.gmra.mrb[36].mxu0 %vm81_vm0, %v10387_v14  ;;  %16287 = vmatprep.mubr.msk.f32.mxu1 %vm81_vm0, %v20190_v16  ;;  %v20552_v14 = vld [vmem:[#allocation2 + $0x109] sm:$0xff] }
 0x2d1   :  { %17162 = vmatprep.mubr.msk.f32.mxu0 %vm81_vm0, %v10388_v22  ;;  %v4993_v22 = vld [vmem:[#allocation2 + $0x39] sm:$0xff] }
 0x2d3   :  { %16288 = vmatmul.mubr.msk.f32.gmra.mrb[18].mxu1 %vm81_vm0, %v20198_v27 }
 0x2d4   :  { %17163 = vmatmul.mubr.msk.f32.gmra.mrb[38].mxu0 %vm81_vm0, %v10389_v30  ;;  %16290 = vmatprep.mubr.msk.f32.mxu1 %vm81_vm0, %v20200_v23  ;;  %v4994_v30 = vld [vmem:[#allocation2 + $0x41] sm:$0xff] }
 0x2d5   :  { %17165 = vmatprep.mubr.msk.f32.mxu0 %vm81_vm0, %v10390_v34  ;;  %v4995_v34 = vld [vmem:[#allocation2 + $0x49] sm:$0xff] }
 0x2d7   :  { %16291 = vmatmul.mubr.msk.f32.gmra.mrb[20].mxu1 %vm81_vm0, %v20208_v38 }
 0x2d8   :  { %17166 = vmatmul.mubr.msk.f32.gmra.mrb[40].mxu0 %vm81_vm0, %v10391_v47  ;;  %16293 = vmatprep.mubr.msk.f32.mxu1 %vm81_vm0, %v20210_v42  ;;  %v20583_v47 = vld [vmem:[%s21339_s2 + $0x60] sm:$0xff] }
 0x2d9   :  { %17170 = vmatprep.mubr.msk.f32.mxu0 %vm81_vm0, %v20168_v37 }
 0x2db   :  { %16294 = vmatmul.mubr.msk.f32.gmra.mrb[22].mxu1 %vm81_vm0, %v20219_v19 }
 0x2dc   :  { %17171 = vmatmul.mubr.msk.f32.vlgmr.msra.gmra.mrb[0].mxu0 %vm81_vm0, %v20170_v41  ;;  %16296 = vmatprep.mubr.msk.f32.mxu1 %vm81_vm0, %v20221_v52 }
 0x2dd   :  { %17234 = vmatpush3.msra.mxu0 %v20069_v45  ;;  %17173 = vmatprep.mubr.msk.f32.mxu0 %vm81_vm0, %v20178_v46  ;;  %v20274_v45 = vld [vmem:[#allocation2 + $0x108] sm:$0xff] }
 0x2de   :  { %17298 = vmatprep.subr.mxu0 %v20226_v21 }
 0x2df   :  { %16297 = vmatmul.mubr.msk.f32.gmra.mrb[24].mxu1 %vm81_vm0, %v20235_v24 }
 0x2e0   :  { %17174 = vmatmul.mubr.msk.f32.gmra.mrb[2].mxu0 %vm81_vm0, %v20180_v55  ;;  %16299 = vmatprep.mubr.msk.f32.mxu1 %vm81_vm0, %v20239_v26 }
 0x2e1   :  { %17176 = vmatprep.mubr.msk.f32.mxu0 %vm81_vm0, %v20188_v9 }
 0x2e3   :  { %16300 = vmatmul.mubr.msk.f32.gmra.mrb[26].mxu1 %vm81_vm0, %v20250_v29 }
 0x2e4   :  { %17177 = vmatmul.mubr.msk.f32.gmra.mrb[4].mxu0 %vm81_vm0, %v20190_v16  ;;  %16302 = vmatprep.mubr.msk.f32.mxu1 %vm81_vm0, %v20252_v32 }
 0x2e5   :  { %17179 = vmatprep.mubr.msk.f32.mxu0 %vm81_vm0, %v20198_v27 }
 0x2e7   :  { %16303 = vmatmul.mubr.msk.f32.gmra.mrb[28].mxu1 %vm81_vm0, %v20262_v36 }
 0x2e8   :  { %17180 = vmatmul.mubr.msk.f32.gmra.mrb[6].mxu0 %vm81_vm0, %v20200_v23  ;;  %16305 = vmatprep.mubr.msk.f32.mxu1 %vm81_vm0, %v20264_v40 }
 0x2e9   :  { %17182 = vmatprep.mubr.msk.f32.mxu0 %vm81_vm0, %v20208_v38 }
 0x2eb   :  { %16306 = vmatmul.mubr.msk.f32.gmra.mrb[30].mxu1 %vm81_vm0, %v20274_v45 }
 0x2ec   :  { %17183 = vmatmul.mubr.msk.f32.gmra.mrb[8].mxu0 %vm81_vm0, %v20210_v42  ;;  %16308 = vmatprep.mubr.msk.f32.mxu1 %vm81_vm0, %v20276_v48 }
 0x2ed   :  { %17185 = vmatprep.mubr.msk.f32.mxu0 %vm81_vm0, %v20219_v19 }
 0x2ef   :  { %16309 = vmatmul.mubr.msk.f32.gmra.mrb[32].mxu1 %vm81_vm0, %v20286_v53 }
 0x2f0   :  { %17186 = vmatmul.mubr.msk.f32.gmra.mrb[10].mxu0 %vm81_vm0, %v20221_v52  ;;  %16311 = vmatprep.mubr.msk.f32.mxu1 %vm81_vm0, %v20288_v54 }
 0x2f1   :  { %17188 = vmatprep.mubr.msk.f32.mxu0 %vm81_vm0, %v20235_v24 }
 0x2f3   :  { %16312 = vmatmul.mubr.msk.f32.gmra.mrb[34].mxu1 %vm81_vm0, %v20298_v25 }
 0x2f4   :  { %17189 = vmatmul.mubr.msk.f32.gmra.mrb[12].mxu0 %vm81_vm0, %v20239_v26  ;;  %16314 = vmatprep.mubr.msk.f32.mxu1 %vm81_vm0, %v20300_v12 }
 0x2f5   :  { %17191 = vmatprep.mubr.msk.f32.mxu0 %vm81_vm0, %v20250_v29 }
 0x2f7   :  { %16315 = vmatmul.mubr.msk.f32.gmra.mrb[36].mxu1 %vm81_vm0, %v20310_v58 }
 0x2f8   :  { %17192 = vmatmul.mubr.msk.f32.gmra.mrb[14].mxu0 %vm81_vm0, %v20252_v32  ;;  %16317 = vmatprep.mubr.msk.f32.mxu1 %vm81_vm0, %v20312_v4 }
 0x2f9   :  { %17194 = vmatprep.mubr.msk.f32.mxu0 %vm81_vm0, %v20262_v36 }
 0x2fb   :  { %16318 = vmatmul.mubr.msk.f32.gmra.mrb[38].mxu1 %vm81_vm0, %v20326_v0 }
 0x2fc   :  { %17195 = vmatmul.mubr.msk.f32.gmra.mrb[16].mxu0 %vm81_vm0, %v20264_v40  ;;  %16320 = vmatprep.mubr.msk.f32.mxu1 %vm81_vm0, %v20328_v2 }
 0x2fd   :  { %17197 = vmatprep.mubr.msk.f32.mxu0 %vm81_vm0, %v20274_v45 }
 0x2ff   :  { %16321 = vmatmul.mubr.msk.f32.gmra.mrb[40].mxu1 %vm81_vm0, %v20338_v43 }
 0x300   :  { %17198 = vmatmul.mubr.msk.f32.gmra.mrb[18].mxu0 %vm81_vm0, %v20276_v48  ;;  %16325 = vmatprep.mubr.msk.f32.mxu1 %vm81_vm0, %v20128_v13  ;;  %v10877_v13 = vld [vmem:[#allocation2 + $0x1b8] sm:$0xff] }
 0x301   :  { %17200 = vmatprep.mubr.msk.f32.mxu0 %vm81_vm0, %v20286_v53 }
 0x303   :  { %16326 = vmatmul.mubr.msk.f32.vlgmr.msra.gmra.mrb[0].mxu1 %vm81_vm0, %v20130_v15  ;;  %v10878_v15 = vld [vmem:[#allocation2 + $0x1c0] sm:$0xff] }
 0x304   :  { %17201 = vmatmul.mubr.msk.f32.gmra.mrb[20].mxu0 %vm81_vm0, %v20288_v54  ;;  %16328 = vmatprep.mubr.msk.f32.mxu1 %vm81_vm0, %v20138_v6  ;;  %v20438_v6 = vld [vmem:[#allocation2 + $0x79] sm:$0xff] }
 0x305   :  { %17203 = vmatprep.mubr.msk.f32.mxu0 %vm81_vm0, %v20298_v25  ;;  %16389 = vmatpush3.msra.mxu1 %v20118_v3  ;;  %v10874_v3 = vld [vmem:[#allocation2 + $0x1a0] sm:$0xff] }
 0x306   :  { %16453 = vmatprep.subr.mxu1 %v20355_v5 }
 0x307   :  { %16329 = vmatmul.mubr.msk.f32.gmra.mrb[2].mxu1 %vm81_vm0, %v20140_v17  ;;  %v20447_v17 = vld [vmem:[#allocation2 + $0x81] sm:$0xff] }
 0x308   :  { %17204 = vmatmul.mubr.msk.f32.gmra.mrb[22].mxu0 %vm81_vm0, %v20300_v12  ;;  %16331 = vmatprep.mubr.msk.f32.mxu1 %vm81_vm0, %v20148_v56  ;;  %v20449_v56 = vld [vmem:[#allocation2 + $0x89] sm:$0xff] }
 0x309   :  { %17206 = vmatprep.mubr.msk.f32.mxu0 %vm81_vm0, %v20310_v58 }
 0x30b   :  { %16332 = vmatmul.mubr.msk.f32.gmra.mrb[4].mxu1 %vm81_vm0, %v20150_v20  ;;  %v20463_v20 = vld [vmem:[#allocation2 + $0x91] sm:$0xff] }
 0x30c   :  { %17207 = vmatmul.mubr.msk.f32.gmra.mrb[24].mxu0 %vm81_vm0, %v20312_v4  ;;  %16334 = vmatprep.mubr.msk.f32.mxu1 %vm81_vm0, %v20158_v28  ;;  %v20478_v28 = vld [vmem:[#allocation2 + $0xa1] sm:$0xff] }
 0x30d   :  { %17209 = vmatprep.mubr.msk.f32.mxu0 %vm81_vm0, %v20326_v0 }
 0x30f   :  { %16335 = vmatmul.mubr.msk.f32.gmra.mrb[6].mxu1 %vm81_vm0, %v20160_v33  ;;  %v20490_v33 = vld [vmem:[#allocation2 + $0xb1] sm:$0xff] }
 0x310   :  { %17210 = vmatmul.mubr.msk.f32.gmra.mrb[26].mxu0 %vm81_vm0, %v20328_v2  ;;  %16337 = vmatprep.mubr.msk.f32.mxu1 %vm81_vm0, %v20168_v37  ;;  %v20502_v37 = vld [vmem:[#allocation2 + $0xc1] sm:$0xff] }
 0x311   :  { %17212 = vmatprep.mubr.msk.f32.mxu0 %vm81_vm0, %v20338_v43 }
 0x313   :  { %16338 = vmatmul.mubr.msk.f32.gmra.mrb[8].mxu1 %vm81_vm0, %v20170_v41  ;;  %v20514_v41 = vld [vmem:[#allocation2 + $0xd1] sm:$0xff] }
 0x314   :  { %17213 = vmatmul.mubr.msk.f32.gmra.mrb[28].mxu0 %vm81_vm0, %v20387_v51  ;;  %16340 = vmatprep.mubr.msk.f32.mxu1 %vm81_vm0, %v20178_v46  ;;  %v20526_v46 = vld [vmem:[#allocation2 + $0xe1] sm:$0xff] }
 0x315   :  { %17215 = vmatprep.mubr.msk.f32.mxu0 %vm81_vm0, %v20389_v49 }
 0x317   :  { %16341 = vmatmul.mubr.msk.f32.gmra.mrb[10].mxu1 %vm81_vm0, %v20180_v55  ;;  %v20538_v55 = vld [vmem:[#allocation2 + $0xf1] sm:$0xff] }
 0x318   :  { %17216 = vmatmul.mubr.msk.f32.gmra.mrb[30].mxu0 %vm81_vm0, %v20399_v57  ;;  %16343 = vmatprep.mubr.msk.f32.mxu1 %vm81_vm0, %v20188_v9  ;;  %v20550_v9 = vld [vmem:[#allocation2 + $0x101] sm:$0xff] }
 0x319   :  { %17218 = vmatprep.mubr.msk.f32.mxu0 %vm81_vm0, %v20401_v8 }
 0x31b   :  { %16344 = vmatmul.mubr.msk.f32.gmra.mrb[12].mxu1 %vm81_vm0, %v20190_v16  ;;  %v20562_v16 = vld [vmem:[#allocation2 + $0x111] sm:$0xff] }
 0x31c   :  { %17219 = vmatmul.mubr.msk.f32.gmra.mrb[32].mxu0 %vm81_vm0, %v20411_v59  ;;  %16346 = vmatprep.mubr.msk.f32.mxu1 %vm81_vm0, %v20198_v27  ;;  %v20564_v27 = vld [vmem:[#allocation2 + $0x119] sm:$0xff] }
 0x31d   :  { %17221 = vmatprep.mubr.msk.f32.mxu0 %vm81_vm0, %v10871_v60  ;;  %v11814_v60 = vld [vmem:[#allocation2 + $0x96] sm:$0xff] }
 0x31f   :  { %16347 = vmatmul.mubr.msk.f32.gmra.mrb[14].mxu1 %vm81_vm0, %v20200_v23  ;;  %v20573_v23 = vld [vmem:[#allocation2 + $0x121] sm:$0xff] }
 0x320   :  { %17222 = vmatmul.mubr.msk.f32.gmra.mrb[34].mxu0 %vm81_vm0, %v10872_v63  ;;  %16349 = vmatprep.mubr.msk.f32.mxu1 %vm81_vm0, %v20208_v38  ;;  %v20575_v38 = vld [vmem:[#allocation2 + $0x129] sm:$0xff]  ;;  %v11815_v63 = vld [vmem:[#allocation2 + $0x9e] sm:$0xff] }
 0x321   :  { %17224 = vmatprep.mubr.msk.f32.mxu0 %vm81_vm0, %v10873_v1  ;;  %v11816_v1 = vld [vmem:[#allocation2 + $0xa6] sm:$0xff] }
 0x323   :  { %16350 = vmatmul.mubr.msk.f32.gmra.mrb[16].mxu1 %vm81_vm0, %v20210_v42  ;;  %v4996_v42 = vld [vmem:[#allocation2 + $0x51] sm:$0xff] }
 0x324   :  { %17225 = vmatmul.mubr.msk.f32.gmra.mrb[36].mxu0 %vm81_vm0, %v10874_v3  ;;  %16352 = vmatprep.mubr.msk.f32.mxu1 %vm81_vm0, %v20219_v19  ;;  %v20588_v19 = vld [vmem:[#allocation2 + $0x131] sm:$0xff] }
 0x325   :  { %17227 = vmatprep.mubr.msk.f32.mxu0 %vm81_vm0, %v10875_v10  ;;  %v11817_v3 = vld [vmem:[#allocation2 + $0xae] sm:$0xff]  ;;  %v11818_v10 = vld [vmem:[#allocation2 + $0xb6] sm:$0xff] }
 0x327   :  { %16353 = vmatmul.mubr.msk.f32.gmra.mrb[18].mxu1 %vm81_vm0, %v20221_v52  ;;  %v4997_v52 = vld [vmem:[#allocation2 + $0x59] sm:$0xff] }
 0x328   :  { %17228 = vmatmul.mubr.msk.f32.gmra.mrb[38].mxu0 %vm81_vm0, %v10876_v11  ;;  %16355 = vmatprep.mubr.msk.f32.mxu1 %vm81_vm0, %v20235_v24  ;;  %v4998_v24 = vld [vmem:[#allocation2 + $0x61] sm:$0xff] }
 0x329   :  { %17230 = vmatprep.mubr.msk.f32.mxu0 %vm81_vm0, %v10877_v13  ;;  %v11819_v11 = vld [vmem:[#allocation2 + $0xbe] sm:$0xff]  ;;  %v11820_v13 = vld [vmem:[#allocation2 + $0xc6] sm:$0xff] }
 0x32b   :  { %16356 = vmatmul.mubr.msk.f32.gmra.mrb[20].mxu1 %vm81_vm0, %v20239_v26  ;;  %v20600_v26 = vld [vmem:[#allocation2 + $0x141] sm:$0xff] }
 0x32c   :  { %17231 = vmatmul.mubr.msk.f32.gmra.mrb[40].mxu0 %vm81_vm0, %v10878_v15  ;;  %16358 = vmatprep.mubr.msk.f32.mxu1 %vm81_vm0, %v20250_v29  ;;  %v4999_v29 = vld [vmem:[#allocation2 + $0x69] sm:$0xff] }
 0x32d   :  { %17235 = vmatprep.mubr.msk.f32.mxu0 %vm81_vm0, %v20438_v6  ;;  %v11821_v15 = vld [vmem:[#allocation2 + $0xce] sm:$0xff] }
 0x32f   :  { %16359 = vmatmul.mubr.msk.f32.gmra.mrb[22].mxu1 %vm81_vm0, %v20252_v32  ;;  %v20602_v32 = vld [vmem:[#allocation2 + $0x149] sm:$0xff] }
 0x330   :  { %17236 = vmatmul.mubr.msk.f32.vlgmr.msra.gmra.mrb[0].mxu0 %vm81_vm0, %v20447_v17  ;;  %16361 = vmatprep.mubr.msk.f32.mxu1 %vm81_vm0, %v20262_v36  ;;  %v5000_v36 = vld [vmem:[#allocation2 + $0x71] sm:$0xff] }
 0x331   :  { %17299 = vmatpush3.msra.mxu0 %v20226_v21  ;;  %17238 = vmatprep.mubr.msk.f32.mxu0 %vm81_vm0, %v20449_v56  ;;  %v20591_v21 = vld [vmem:[#allocation2 + $0x139] sm:$0xff] }
 0x332   :  { %17363 = vmatprep.subr.mxu0 %v20454_v18 }
 0x333   :  { %16362 = vmatmul.mubr.msk.f32.gmra.mrb[24].mxu1 %vm81_vm0, %v20264_v40  ;;  %v20610_v40 = vld [vmem:[#allocation2 + $0x151] sm:$0xff] }
 0x334   :  { %17239 = vmatmul.mubr.msk.f32.gmra.mrb[2].mxu0 %vm81_vm0, %v20463_v20  ;;  %16364 = vmatprep.mubr.msk.f32.mxu1 %vm81_vm0, %v20274_v45  ;;  %v20612_v45 = vld [vmem:[#allocation2 + $0x159] sm:$0xff] }
 0x335   :  { %17241 = vmatprep.mubr.msk.f32.mxu0 %vm81_vm0, %v20467_v61 }
 0x337   :  { %16365 = vmatmul.mubr.msk.f32.gmra.mrb[26].mxu1 %vm81_vm0, %v20276_v48  ;;  %v20621_v48 = vld [vmem:[#allocation2 + $0x161] sm:$0xff] }
 0x338   :  { %17242 = vmatmul.mubr.msk.f32.gmra.mrb[4].mxu0 %vm81_vm0, %v20478_v28  ;;  %16367 = vmatprep.mubr.msk.f32.mxu1 %vm81_vm0, %v20286_v53  ;;  %v20623_v53 = vld [vmem:[#allocation2 + $0x169] sm:$0xff] }
 0x339   :  { %17244 = vmatprep.mubr.msk.f32.mxu0 %vm81_vm0, %v20480_v31 }
 0x33b   :  { %16368 = vmatmul.mubr.msk.f32.gmra.mrb[28].mxu1 %vm81_vm0, %v20288_v54  ;;  %v20633_v54 = vld [vmem:[#allocation2 + $0x171] sm:$0xff] }
 0x33c   :  { %17245 = vmatmul.mubr.msk.f32.gmra.mrb[6].mxu0 %vm81_vm0, %v20490_v33  ;;  %16370 = vmatprep.mubr.msk.f32.mxu1 %vm81_vm0, %v20298_v25  ;;  %v20635_v25 = vld [vmem:[#allocation2 + $0x179] sm:$0xff] }
 0x33d   :  { %17247 = vmatprep.mubr.msk.f32.mxu0 %vm81_vm0, %v20492_v35 }
 0x33f   :  { %16371 = vmatmul.mubr.msk.f32.gmra.mrb[30].mxu1 %vm81_vm0, %v20300_v12  ;;  %v20645_v12 = vld [vmem:[#allocation2 + $0x181] sm:$0xff] }
 0x340   :  { %17248 = vmatmul.mubr.msk.f32.gmra.mrb[8].mxu0 %vm81_vm0, %v20502_v37  ;;  %16373 = vmatprep.mubr.msk.f32.mxu1 %vm81_vm0, %v20310_v58  ;;  %v11358_v58 = vld [vmem:[#allocation2 + $0x189] sm:$0xff] }
 0x341   :  { %17250 = vmatprep.mubr.msk.f32.mxu0 %vm81_vm0, %v20504_v39 }
 0x343   :  { %16374 = vmatmul.mubr.msk.f32.gmra.mrb[32].mxu1 %vm81_vm0, %v20312_v4  ;;  %v11359_v4 = vld [vmem:[#allocation2 + $0x191] sm:$0xff] }
 0x344   :  { %17251 = vmatmul.mubr.msk.f32.gmra.mrb[10].mxu0 %vm81_vm0, %v20514_v41  ;;  %16376 = vmatprep.mubr.msk.f32.mxu1 %vm81_vm0, %v20326_v0  ;;  %v11361_v0 = vld [vmem:[#allocation2 + $0x1a1] sm:$0xff] }
 0x345   :  { %17253 = vmatprep.mubr.msk.f32.mxu0 %vm81_vm0, %v20516_v44 }
 0x347   :  { %16377 = vmatmul.mubr.msk.f32.gmra.mrb[34].mxu1 %vm81_vm0, %v20328_v2  ;;  %v11362_v2 = vld [vmem:[#allocation2 + $0x1a9] sm:$0xff] }
 0x348   :  { %17254 = vmatmul.mubr.msk.f32.gmra.mrb[12].mxu0 %vm81_vm0, %v20526_v46  ;;  %16379 = vmatprep.mubr.msk.f32.mxu1 %vm81_vm0, %v20338_v43  ;;  %v11363_v43 = vld [vmem:[#allocation2 + $0x1b1] sm:$0xff] }
 0x349   :  { %17256 = vmatprep.mubr.msk.f32.mxu0 %vm81_vm0, %v20528_v50 }
 0x34b   :  { %16380 = vmatmul.mubr.msk.f32.gmra.mrb[36].mxu1 %vm81_vm0, %v20387_v51  ;;  %v11365_v51 = vld [vmem:[#allocation2 + $0x1c1] sm:$0xff] }
 0x34c   :  { %17257 = vmatmul.mubr.msk.f32.gmra.mrb[14].mxu0 %vm81_vm0, %v20538_v55  ;;  %16382 = vmatprep.mubr.msk.f32.mxu1 %vm81_vm0, %v20389_v49  ;;  %v11811_v49 = vld [vmem:[#allocation2 + $0x7e] sm:$0xff] }
 0x34d   :  { %17259 = vmatprep.mubr.msk.f32.mxu0 %vm81_vm0, %v20540_v7 }
 0x34f   :  { %16383 = vmatmul.mubr.msk.f32.gmra.mrb[38].mxu1 %vm81_vm0, %v20399_v57  ;;  %v11812_v57 = vld [vmem:[#allocation2 + $0x86] sm:$0xff] }
 0x350   :  { %17260 = vmatmul.mubr.msk.f32.gmra.mrb[16].mxu0 %vm81_vm0, %v20550_v9  ;;  %16385 = vmatprep.mubr.msk.f32.mxu1 %vm81_vm0, %v20401_v8  ;;  %v11813_v8 = vld [vmem:[#allocation2 + $0x8e] sm:$0xff] }
 0x351   :  { %17262 = vmatprep.mubr.msk.f32.mxu0 %vm81_vm0, %v20552_v14 }
 0x353   :  { %16386 = vmatmul.mubr.msk.f32.gmra.mrb[40].mxu1 %vm81_vm0, %v20411_v59  ;;  %v20681_v59 = vld [vmem:[%s21339_s2 + $0xd0] sm:$0xff] }
 0x354   :  { %17263 = vmatmul.mubr.msk.f32.gmra.mrb[18].mxu0 %vm81_vm0, %v20562_v16  ;;  %16390 = vmatprep.mubr.msk.f32.mxu1 %vm81_vm0, %v4993_v22  ;;  %v11836_v22 = vld [vmem:[#allocation2 + $0x146] sm:$0xff] }
 0x355   :  { %17265 = vmatprep.mubr.msk.f32.mxu0 %vm81_vm0, %v20564_v27 }
 0x357   :  { %16391 = vmatmul.mubr.msk.f32.vlgmr.msra.gmra.mrb[0].mxu1 %vm81_vm0, %v4994_v30  ;;  %v11837_v30 = vld [vmem:[#allocation2 + $0x14e] sm:$0xff] }
 0x358   :  { %17266 = vmatmul.mubr.msk.f32.gmra.mrb[20].mxu0 %vm81_vm0, %v20573_v23  ;;  %16393 = vmatprep.mubr.msk.f32.mxu1 %vm81_vm0, %v4995_v34  ;;  %v11838_v34 = vld [vmem:[#allocation2 + $0x156] sm:$0xff] }
 0x359   :  { %17268 = vmatprep.mubr.msk.f32.mxu0 %vm81_vm0, %v20575_v38  ;;  %16454 = vmatpush3.msra.mxu1 %v20355_v5  ;;  %v11364_v5 = vld [vmem:[#allocation2 + $0x1b9] sm:$0xff] }
 0x35a   :  { %16518 = vmatprep.subr.mxu1 %v20583_v47 }
 0x35b   :  { %16394 = vmatmul.mubr.msk.f32.gmra.mrb[2].mxu1 %vm81_vm0, %v4996_v42  ;;  %v5489_v42 = vld [vmem:[#allocation2 + $0x82] sm:$0xff] }
 0x35c   :  { %17269 = vmatmul.mubr.msk.f32.gmra.mrb[22].mxu0 %vm81_vm0, %v20588_v19  ;;  %16396 = vmatprep.mubr.msk.f32.mxu1 %vm81_vm0, %v4997_v52  ;;  %v5490_v52 = vld [vmem:[#allocation2 + $0x8a] sm:$0xff] }
 0x35d   :  { %17271 = vmatprep.mubr.msk.f32.mxu0 %vm81_vm0, %v20591_v21 }
 0x35f   :  { %16397 = vmatmul.mubr.msk.f32.gmra.mrb[4].mxu1 %vm81_vm0, %v4998_v24  ;;  %v5491_v24 = vld [vmem:[#allocation2 + $0x92] sm:$0xff] }
 0x360   :  { %17272 = vmatmul.mubr.msk.f32.gmra.mrb[24].mxu0 %vm81_vm0, %v20600_v26  ;;  %16399 = vmatprep.mubr.msk.f32.mxu1 %vm81_vm0, %v4999_v29  ;;  %v5492_v29 = vld [vmem:[#allocation2 + $0x9a] sm:$0xff] }
 0x361   :  { %17274 = vmatprep.mubr.msk.f32.mxu0 %vm81_vm0, %v20602_v32 }
 0x363   :  { %16400 = vmatmul.mubr.msk.f32.gmra.mrb[6].mxu1 %vm81_vm0, %v5000_v36  ;;  %v5493_v36 = vld [vmem:[#allocation2 + $0xa2] sm:$0xff] }
 0x364   :  { %17275 = vmatmul.mubr.msk.f32.gmra.mrb[26].mxu0 %vm81_vm0, %v20610_v40  ;;  %16402 = vmatprep.mubr.msk.f32.mxu1 %vm81_vm0, %v20438_v6  ;;  %v11822_v6 = vld [vmem:[#allocation2 + $0xd6] sm:$0xff] }
 0x365   :  { %17277 = vmatprep.mubr.msk.f32.mxu0 %vm81_vm0, %v20612_v45 }
 0x367   :  { %16403 = vmatmul.mubr.msk.f32.gmra.mrb[8].mxu1 %vm81_vm0, %v20447_v17  ;;  %v11823_v17 = vld [vmem:[#allocation2 + $0xde] sm:$0xff] }
 0x368   :  { %17278 = vmatmul.mubr.msk.f32.gmra.mrb[28].mxu0 %vm81_vm0, %v20621_v48  ;;  %16405 = vmatprep.mubr.msk.f32.mxu1 %vm81_vm0, %v20449_v56  ;;  %v11824_v56 = vld [vmem:[#allocation2 + $0xe6] sm:$0xff] }
 0x369   :  { %17280 = vmatprep.mubr.msk.f32.mxu0 %vm81_vm0, %v20623_v53 }
 0x36b   :  { %16406 = vmatmul.mubr.msk.f32.gmra.mrb[10].mxu1 %vm81_vm0, %v20463_v20  ;;  %v11826_v20 = vld [vmem:[#allocation2 + $0xf6] sm:$0xff] }
 0x36c   :  { %17281 = vmatmul.mubr.msk.f32.gmra.mrb[30].mxu0 %vm81_vm0, %v20633_v54  ;;  %16408 = vmatprep.mubr.msk.f32.mxu1 %vm81_vm0, %v20467_v61  ;;  %v11827_v61 = vld [vmem:[#allocation2 + $0xfe] sm:$0xff] }
 0x36d   :  { %17283 = vmatprep.mubr.msk.f32.mxu0 %vm81_vm0, %v20635_v25 }
 0x36f   :  { %16409 = vmatmul.mubr.msk.f32.gmra.mrb[12].mxu1 %vm81_vm0, %v20478_v28  ;;  %v11828_v28 = vld [vmem:[#allocation2 + $0x106] sm:$0xff] }
 0x370   :  { %17284 = vmatmul.mubr.msk.f32.gmra.mrb[32].mxu0 %vm81_vm0, %v20645_v12  ;;  %16411 = vmatprep.mubr.msk.f32.mxu1 %vm81_vm0, %v20480_v31  ;;  %v11829_v31 = vld [vmem:[#allocation2 + $0x10e] sm:$0xff] }
 0x371   :  { %17286 = vmatprep.mubr.msk.f32.mxu0 %vm81_vm0, %v11358_v58  ;;  %v5497_v58 = vld [vmem:[#allocation2 + $0xc2] sm:$0xff] }
 0x373   :  { %16412 = vmatmul.mubr.msk.f32.gmra.mrb[14].mxu1 %vm81_vm0, %v20490_v33  ;;  %v11830_v33 = vld [vmem:[#allocation2 + $0x116] sm:$0xff] }
 0x374   :  { %17287 = vmatmul.mubr.msk.f32.gmra.mrb[34].mxu0 %vm81_vm0, %v11359_v4  ;;  %16414 = vmatprep.mubr.msk.f32.mxu1 %vm81_vm0, %v20492_v35  ;;  %v5480_v35 = vld [vmem:[#allocation2 + $0x3a] sm:$0xff]  ;;  %v11848_v4 = vld [vmem:[#allocation2 + $0x1a6] sm:$0xff] }
 0x375   :  { %17289 = vmatprep.mubr.msk.f32.mxu0 %vm81_vm0, %v11360_v62  ;;  %v5498_v62 = vld [vmem:[#allocation2 + $0xca] sm:$0xff] }
 0x377   :  { %16415 = vmatmul.mubr.msk.f32.gmra.mrb[16].mxu1 %vm81_vm0, %v20502_v37  ;;  %v11831_v37 = vld [vmem:[#allocation2 + $0x11e] sm:$0xff] }
 0x378   :  { %17290 = vmatmul.mubr.msk.f32.gmra.mrb[36].mxu0 %vm81_vm0, %v11361_v0  ;;  %16417 = vmatprep.mubr.msk.f32.mxu1 %vm81_vm0, %v20504_v39  ;;  %v5481_v39 = vld [vmem:[#allocation2 + $0x42] sm:$0xff]  ;;  %v11849_v0 = vld [vmem:[#allocation2 + $0x1ae] sm:$0xff] }
 0x379   :  { %17292 = vmatprep.mubr.msk.f32.mxu0 %vm81_vm0, %v11362_v2  ;;  %v5499_v2 = vld [vmem:[#allocation2 + $0xd2] sm:$0xff] }
 0x37b   :  { %16418 = vmatmul.mubr.msk.f32.gmra.mrb[18].mxu1 %vm81_vm0, %v20514_v41  ;;  %v11832_v41 = vld [vmem:[#allocation2 + $0x126] sm:$0xff] }
 0x37c   :  { %17293 = vmatmul.mubr.msk.f32.gmra.mrb[38].mxu0 %vm81_vm0, %v11363_v43  ;;  %16420 = vmatprep.mubr.msk.f32.mxu1 %vm81_vm0, %v20516_v44  ;;  %v5482_v44 = vld [vmem:[#allocation2 + $0x4a] sm:$0xff]  ;;  %v11850_v43 = vld [vmem:[#allocation2 + $0x1b6] sm:$0xff] }
 0x37d   :  { %17295 = vmatprep.mubr.msk.f32.mxu0 %vm81_vm0, %v11364_v5  ;;  %v5500_v5 = vld [vmem:[#allocation2 + $0xda] sm:$0xff] }
 0x37f   :  { %16421 = vmatmul.mubr.msk.f32.gmra.mrb[20].mxu1 %vm81_vm0, %v20526_v46  ;;  %v11833_v46 = vld [vmem:[#allocation2 + $0x12e] sm:$0xff] }
 0x380   :  { %17296 = vmatmul.mubr.msk.f32.gmra.mrb[40].mxu0 %vm81_vm0, %v11365_v51  ;;  %16423 = vmatprep.mubr.msk.f32.mxu1 %vm81_vm0, %v20528_v50  ;;  %v5483_v50 = vld [vmem:[#allocation2 + $0x52] sm:$0xff]  ;;  %v11851_v51 = vld [vmem:[#allocation2 + $0x1be] sm:$0xff] }
 0x381   :  { %17300 = vmatprep.mubr.msk.f32.mxu0 %vm81_vm0, %v11811_v49  ;;  %v5501_v49 = vld [vmem:[#allocation2 + $0xe2] sm:$0xff] }
 0x383   :  { %16424 = vmatmul.mubr.msk.f32.gmra.mrb[22].mxu1 %vm81_vm0, %v20538_v55  ;;  %v11834_v55 = vld [vmem:[#allocation2 + $0x136] sm:$0xff] }
 0x384   :  { %17301 = vmatmul.mubr.msk.f32.vlgmr.msra.gmra.mrb[0].mxu0 %vm81_vm0, %v11812_v57  ;;  %16426 = vmatprep.mubr.msk.f32.mxu1 %vm81_vm0, %v20540_v7  ;;  %v5484_v7 = vld [vmem:[#allocation2 + $0x5a] sm:$0xff]  ;;  %v11852_v57 = vld [vmem:[#allocation2 + $0x1c6] sm:$0xff] }
 0x385   :  { %17364 = vmatpush3.msra.mxu0 %v20454_v18  ;;  %17303 = vmatprep.mubr.msk.f32.mxu0 %vm81_vm0, %v11813_v8  ;;  %v11825_v18 = vld [vmem:[#allocation2 + $0xee] sm:$0xff] }
 0x386   :  { %17428 = vmatprep.subr.mxu0 %v20681_v59  ;;  %v5502_v8 = vld [vmem:[#allocation2 + $0xea] sm:$0xff] }
 0x387   :  { %16427 = vmatmul.mubr.msk.f32.gmra.mrb[24].mxu1 %vm81_vm0, %v20550_v9  ;;  %v11835_v9 = vld [vmem:[#allocation2 + $0x13e] sm:$0xff] }
 0x388   :  { %17304 = vmatmul.mubr.msk.f32.gmra.mrb[2].mxu0 %vm81_vm0, %v11814_v60  ;;  %16429 = vmatprep.mubr.msk.f32.mxu1 %vm81_vm0, %v20552_v14  ;;  %v20752_v14 = vld [vmem:[%s21339_s2 + $0x68] sm:$0xff]  ;;  %v20791_v60 = vld [vmem:[#allocation2 + $0x7f] sm:$0xff] }
 0x389   :  { %17306 = vmatprep.mubr.msk.f32.mxu0 %vm81_vm0, %v11815_v63  ;;  %v5503_v63 = vld [vmem:[#allocation2 + $0xf2] sm:$0xff] }
 0x38b   :  { %16430 = vmatmul.mubr.msk.f32.gmra.mrb[26].mxu1 %vm81_vm0, %v20562_v16  ;;  %v5485_v16 = vld [vmem:[#allocation2 + $0x62] sm:$0xff] }
 0x38c   :  { %17307 = vmatmul.mubr.msk.f32.gmra.mrb[4].mxu0 %vm81_vm0, %v11816_v1  ;;  %16432 = vmatprep.mubr.msk.f32.mxu1 %vm81_vm0, %v20564_v27  ;;  %v5486_v27 = vld [vmem:[#allocation2 + $0x6a] sm:$0xff] }
 0x38d   :  { %17309 = vmatprep.mubr.msk.f32.mxu0 %vm81_vm0, %v11817_v3  ;;  %v20798_v1 = vld [vmem:[#allocation2 + $0x87] sm:$0xff]  ;;  %v5504_v3 = vld [vmem:[#allocation2 + $0xfa] sm:$0xff] }
 0x38f   :  { %16433 = vmatmul.mubr.msk.f32.gmra.mrb[28].mxu1 %vm81_vm0, %v20573_v23  ;;  %v5487_v23 = vld [vmem:[#allocation2 + $0x72] sm:$0xff] }
 0x390   :  { %17310 = vmatmul.mubr.msk.f32.gmra.mrb[6].mxu0 %vm81_vm0, %v11818_v10  ;;  %16435 = vmatprep.mubr.msk.f32.mxu1 %vm81_vm0, %v20575_v38  ;;  %v5488_v38 = vld [vmem:[#allocation2 + $0x7a] sm:$0xff]  ;;  %v20800_v10 = vld [vmem:[#allocation2 + $0x8f] sm:$0xff] }
 0x391   :  { %17312 = vmatprep.mubr.msk.f32.mxu0 %vm81_vm0, %v11819_v11  ;;  %v5505_v11 = vld [vmem:[#allocation2 + $0x102] sm:$0xff] }
 0x393   :  { %16436 = vmatmul.mubr.msk.f32.gmra.mrb[30].mxu1 %vm81_vm0, %v20588_v19  ;;  %v11840_v19 = vld [vmem:[#allocation2 + $0x166] sm:$0xff] }
 0x394   :  { %17313 = vmatmul.mubr.msk.f32.gmra.mrb[8].mxu0 %vm81_vm0, %v11820_v13  ;;  %16438 = vmatprep.mubr.msk.f32.mxu1 %vm81_vm0, %v20591_v21  ;;  %v11841_v21 = vld [vmem:[#allocation2 + $0x16e] sm:$0xff]  ;;  %v20807_v13 = vld [vmem:[#allocation2 + $0x97] sm:$0xff] }
 0x395   :  { %17315 = vmatprep.mubr.msk.f32.mxu0 %vm81_vm0, %v11821_v15  ;;  %v5506_v15 = vld [vmem:[#allocation2 + $0x10a] sm:$0xff] }
 0x397   :  { %16439 = vmatmul.mubr.msk.f32.gmra.mrb[32].mxu1 %vm81_vm0, %v20600_v26  ;;  %v11842_v26 = vld [vmem:[#allocation2 + $0x176] sm:$0xff] }
 0x398   :  { %17316 = vmatmul.mubr.msk.f32.gmra.mrb[10].mxu0 %vm81_vm0, %v11822_v6  ;;  %16441 = vmatprep.mubr.msk.f32.mxu1 %vm81_vm0, %v20602_v32  ;;  %v11843_v32 = vld [vmem:[#allocation2 + $0x17e] sm:$0xff] }
 0x399   :  { %17318 = vmatprep.mubr.msk.f32.mxu0 %vm81_vm0, %v11823_v17  ;;  %v20811_v6 = vld [vmem:[#allocation2 + $0x9f] sm:$0xff]  ;;  %v20819_v17 = vld [vmem:[#allocation2 + $0xa7] sm:$0xff] }
 0x39b   :  { %16442 = vmatmul.mubr.msk.f32.gmra.mrb[34].mxu1 %vm81_vm0, %v20610_v40  ;;  %v11844_v40 = vld [vmem:[#allocation2 + $0x186] sm:$0xff] }
 0x39c   :  { %17319 = vmatmul.mubr.msk.f32.gmra.mrb[12].mxu0 %vm81_vm0, %v11824_v56  ;;  %16444 = vmatprep.mubr.msk.f32.mxu1 %vm81_vm0, %v20612_v45  ;;  %v5494_v45 = vld [vmem:[#allocation2 + $0xaa] sm:$0xff]  ;;  %v5508_v56 = vld [vmem:[#allocation2 + $0x11a] sm:$0xff] }
 0x39d   :  { %17321 = vmatprep.mubr.msk.f32.mxu0 %vm81_vm0, %v11825_v18  ;;  %v20821_v18 = vld [vmem:[#allocation2 + $0xaf] sm:$0xff] }
 0x39f   :  { %16445 = vmatmul.mubr.msk.f32.gmra.mrb[36].mxu1 %vm81_vm0, %v20621_v48  ;;  %v11845_v48 = vld [vmem:[#allocation2 + $0x18e] sm:$0xff] }
 0x3a0   :  { %17322 = vmatmul.mubr.msk.f32.gmra.mrb[14].mxu0 %vm81_vm0, %v11826_v20  ;;  %16447 = vmatprep.mubr.msk.f32.mxu1 %vm81_vm0, %v20623_v53  ;;  %v5495_v53 = vld [vmem:[#allocation2 + $0xb2] sm:$0xff]  ;;  %v5509_v20 = vld [vmem:[#allocation2 + $0x122] sm:$0xff] }
 0x3a1   :  { %17324 = vmatprep.mubr.msk.f32.mxu0 %vm81_vm0, %v11827_v61  ;;  %v20829_v61 = vld [vmem:[#allocation2 + $0xb7] sm:$0xff] }
 0x3a3   :  { %16448 = vmatmul.mubr.msk.f32.gmra.mrb[38].mxu1 %vm81_vm0, %v20633_v54  ;;  %v11846_v54 = vld [vmem:[#allocation2 + $0x196] sm:$0xff] }
 0x3a4   :  { %17325 = vmatmul.mubr.msk.f32.gmra.mrb[16].mxu0 %vm81_vm0, %v11828_v28  ;;  %16450 = vmatprep.mubr.msk.f32.mxu1 %vm81_vm0, %v20635_v25  ;;  %v5496_v25 = vld [vmem:[#allocation2 + $0xba] sm:$0xff]  ;;  %v5510_v28 = vld [vmem:[#allocation2 + $0x12a] sm:$0xff] }
 0x3a5   :  { %17327 = vmatprep.mubr.msk.f32.mxu0 %vm81_vm0, %v11829_v31  ;;  %v20831_v31 = vld [vmem:[#allocation2 + $0xbf] sm:$0xff] }
 0x3a7   :  { %16451 = vmatmul.mubr.msk.f32.gmra.mrb[40].mxu1 %vm81_vm0, %v20645_v12  ;;  %v11847_v12 = vld [vmem:[#allocation2 + $0x19e] sm:$0xff] }
 0x3a8   :  { %17328 = vmatmul.mubr.msk.f32.gmra.mrb[18].mxu0 %vm81_vm0, %v11830_v33  ;;  %16455 = vmatprep.mubr.msk.f32.mxu1 %vm81_vm0, %v5480_v35  ;;  %v5511_v33 = vld [vmem:[#allocation2 + $0x132] sm:$0xff]  ;;  %v20839_v35 = vld [vmem:[#allocation2 + $0xc7] sm:$0xff] }
 0x3a9   :  { %17330 = vmatprep.mubr.msk.f32.mxu0 %vm81_vm0, %v11831_v37  ;;  %v5512_v37 = vld [vmem:[#allocation2 + $0x13a] sm:$0xff] }
 0x3ab   :  { %16456 = vmatmul.mubr.msk.f32.vlgmr.msra.gmra.mrb[0].mxu1 %vm81_vm0, %v5481_v39  ;;  %v20841_v39 = vld [vmem:[#allocation2 + $0xcf] sm:$0xff] }
 0x3ac   :  { %17331 = vmatmul.mubr.msk.f32.gmra.mrb[20].mxu0 %vm81_vm0, %v11832_v41  ;;  %16458 = vmatprep.mubr.msk.f32.mxu1 %vm81_vm0, %v5482_v44  ;;  %v5513_v41 = vld [vmem:[#allocation2 + $0x142] sm:$0xff]  ;;  %v20849_v44 = vld [vmem:[#allocation2 + $0xd7] sm:$0xff] }
 0x3ad   :  { %17333 = vmatprep.mubr.msk.f32.mxu0 %vm81_vm0, %v11833_v46  ;;  %16519 = vmatpush3.msra.mxu1 %v20583_v47  ;;  %v11839_v47 = vld [vmem:[#allocation2 + $0x15e] sm:$0xff]  ;;  %v5514_v46 = vld [vmem:[#allocation2 + $0x14a] sm:$0xff] }
 0x3ae   :  { %17493 = vmatprep.subr.mxu1 %v20752_v14 }
 0x3af   :  { %16459 = vmatmul.mubr.msk.f32.gmra.mrb[2].mxu1 %vm81_vm0, %v5483_v50  ;;  %v20851_v50 = vld [vmem:[#allocation2 + $0xdf] sm:$0xff] }
 0x3b0   :  { %17334 = vmatmul.mubr.msk.f32.gmra.mrb[22].mxu0 %vm81_vm0, %v11834_v55  ;;  %16461 = vmatprep.mubr.msk.f32.mxu1 %vm81_vm0, %v5484_v7  ;;  %v5515_v55 = vld [vmem:[#allocation2 + $0x152] sm:$0xff]  ;;  %v20859_v7 = vld [vmem:[#allocation2 + $0xe7] sm:$0xff] }
 0x3b1   :  { %17336 = vmatprep.mubr.msk.f32.mxu0 %vm81_vm0, %v11835_v9  ;;  %v5516_v9 = vld [vmem:[#allocation2 + $0x15a] sm:$0xff] }
 0x3b3   :  { %16462 = vmatmul.mubr.msk.f32.gmra.mrb[4].mxu1 %vm81_vm0, %v5485_v16  ;;  %v20861_v16 = vld [vmem:[#allocation2 + $0xef] sm:$0xff] }
 0x3b4   :  { %17337 = vmatmul.mubr.msk.f32.gmra.mrb[24].mxu0 %vm81_vm0, %v11836_v22  ;;  %16464 = vmatprep.mubr.msk.f32.mxu1 %vm81_vm0, %v5486_v27  ;;  %v5517_v22 = vld [vmem:[#allocation2 + $0x162] sm:$0xff]  ;;  %v20869_v27 = vld [vmem:[#allocation2 + $0xf7] sm:$0xff] }
 0x3b5   :  { %17339 = vmatprep.mubr.msk.f32.mxu0 %vm81_vm0, %v11837_v30  ;;  %v5518_v30 = vld [vmem:[#allocation2 + $0x16a] sm:$0xff] }
 0x3b7   :  { %16465 = vmatmul.mubr.msk.f32.gmra.mrb[6].mxu1 %vm81_vm0, %v5487_v23  ;;  %v20871_v23 = vld [vmem:[#allocation2 + $0xff] sm:$0xff] }
 0x3b8   :  { %17340 = vmatmul.mubr.msk.f32.gmra.mrb[26].mxu0 %vm81_vm0, %v11838_v34  ;;  %16467 = vmatprep.mubr.msk.f32.mxu1 %vm81_vm0, %v5488_v38  ;;  %v5519_v34 = vld [vmem:[#allocation2 + $0x172] sm:$0xff]  ;;  %v20879_v38 = vld [vmem:[#allocation2 + $0x107] sm:$0xff] }
 0x3b9   :  { %17342 = vmatprep.mubr.msk.f32.mxu0 %vm81_vm0, %v11839_v47  ;;  %v5520_v47 = vld [vmem:[#allocation2 + $0x17a] sm:$0xff] }
 0x3bb   :  { %16468 = vmatmul.mubr.msk.f32.gmra.mrb[8].mxu1 %vm81_vm0, %v5489_v42  ;;  %v20881_v42 = vld [vmem:[#allocation2 + $0x10f] sm:$0xff] }
 0x3bc   :  { %17343 = vmatmul.mubr.msk.f32.gmra.mrb[28].mxu0 %vm81_vm0, %v11840_v19  ;;  %16470 = vmatprep.mubr.msk.f32.mxu1 %vm81_vm0, %v5490_v52  ;;  %v5521_v19 = vld [vmem:[#allocation2 + $0x182] sm:$0xff]  ;;  %v20889_v52 = vld [vmem:[#allocation2 + $0x117] sm:$0xff] }
 0x3bd   :  { %17345 = vmatprep.mubr.msk.f32.mxu0 %vm81_vm0, %v11841_v21  ;;  %v5967_v21 = vld [vmem:[#allocation2 + $0x3f] sm:$0xff] }
 0x3bf   :  { %16471 = vmatmul.mubr.msk.f32.gmra.mrb[10].mxu1 %vm81_vm0, %v5491_v24  ;;  %v20891_v24 = vld [vmem:[#allocation2 + $0x11f] sm:$0xff] }
 0x3c0   :  { %17346 = vmatmul.mubr.msk.f32.gmra.mrb[30].mxu0 %vm81_vm0, %v11842_v26  ;;  %16473 = vmatprep.mubr.msk.f32.mxu1 %vm81_vm0, %v5492_v29  ;;  %v5968_v26 = vld [vmem:[#allocation2 + $0x47] sm:$0xff] }
 0x3c1   :  { %17348 = vmatprep.mubr.msk.f32.mxu0 %vm81_vm0, %v11843_v32  ;;  %v20899_v29 = vld [vmem:[#allocation2 + $0x127] sm:$0xff]  ;;  %v5969_v32 = vld [vmem:[#allocation2 + $0x4f] sm:$0xff] }
 0x3c3   :  { %16474 = vmatmul.mubr.msk.f32.gmra.mrb[12].mxu1 %vm81_vm0, %v5493_v36  ;;  %v20901_v36 = vld [vmem:[#allocation2 + $0x12f] sm:$0xff] }
 0x3c4   :  { %17349 = vmatmul.mubr.msk.f32.gmra.mrb[32].mxu0 %vm81_vm0, %v11844_v40  ;;  %16476 = vmatprep.mubr.msk.f32.mxu1 %vm81_vm0, %v5494_v45  ;;  %v5970_v40 = vld [vmem:[#allocation2 + $0x57] sm:$0xff] }
 0x3c5   :  { %17351 = vmatprep.mubr.msk.f32.mxu0 %vm81_vm0, %v11845_v48  ;;  %v20909_v45 = vld [vmem:[#allocation2 + $0x137] sm:$0xff]  ;;  %v5971_v48 = vld [vmem:[#allocation2 + $0x5f] sm:$0xff] }
 0x3c7   :  { %16477 = vmatmul.mubr.msk.f32.gmra.mrb[14].mxu1 %vm81_vm0, %v5495_v53  ;;  %v20912_v53 = vld [vmem:[#allocation2 + $0x13f] sm:$0xff] }
 0x3c8   :  { %17352 = vmatmul.mubr.msk.f32.gmra.mrb[34].mxu0 %vm81_vm0, %v11846_v54  ;;  %16479 = vmatprep.mubr.msk.f32.mxu1 %vm81_vm0, %v5496_v25  ;;  %v5972_v54 = vld [vmem:[#allocation2 + $0x67] sm:$0xff] }
 0x3c9   :  { %17354 = vmatprep.mubr.msk.f32.mxu0 %vm81_vm0, %v11847_v12  ;;  %v20920_v25 = vld [vmem:[#allocation2 + $0x147] sm:$0xff]  ;;  %v5973_v12 = vld [vmem:[#allocation2 + $0x6f] sm:$0xff] }
 0x3cb   :  { %16480 = vmatmul.mubr.msk.f32.gmra.mrb[16].mxu1 %vm81_vm0, %v5497_v58  ;;  %v20922_v58 = vld [vmem:[#allocation2 + $0x14f] sm:$0xff] }
 0x3cc   :  { %17355 = vmatmul.mubr.msk.f32.gmra.mrb[36].mxu0 %vm81_vm0, %v11848_v4  ;;  %16482 = vmatprep.mubr.msk.f32.mxu1 %vm81_vm0, %v5498_v62  ;;  %v20930_v4 = vld [vmem:[#allocation2 + $0x157] sm:$0xff]  ;;  %v20932_v62 = vld [vmem:[#allocation2 + $0x15f] sm:$0xff] }
 0x3cd   :  { %17357 = vmatprep.mubr.msk.f32.mxu0 %vm81_vm0, %v11849_v0  ;;  %v20941_v0 = vld [vmem:[#allocation2 + $0x167] sm:$0xff] }
 0x3cf   :  { %16483 = vmatmul.mubr.msk.f32.gmra.mrb[18].mxu1 %vm81_vm0, %v5499_v2  ;;  %v20943_v2 = vld [vmem:[#allocation2 + $0x16f] sm:$0xff] }
 0x3d0   :  { %17358 = vmatmul.mubr.msk.f32.gmra.mrb[38].mxu0 %vm81_vm0, %v11850_v43  ;;  %16485 = vmatprep.mubr.msk.f32.mxu1 %vm81_vm0, %v5500_v5  ;;  %v20953_v43 = vld [vmem:[#allocation2 + $0x177] sm:$0xff]  ;;  %v20955_v5 = vld [vmem:[#allocation2 + $0x17f] sm:$0xff] }
 0x3d1   :  { %17360 = vmatprep.mubr.msk.f32.mxu0 %vm81_vm0, %v11851_v51  ;;  %v20965_v51 = vld [vmem:[#allocation2 + $0x187] sm:$0xff] }
 0x3d3   :  { %16486 = vmatmul.mubr.msk.f32.gmra.mrb[20].mxu1 %vm81_vm0, %v5501_v49  ;;  %v12332_v49 = vld [vmem:[#allocation2 + $0x18f] sm:$0xff] }
 0x3d4   :  { %17361 = vmatmul.mubr.msk.f32.gmra.mrb[40].mxu0 %vm81_vm0, %v11852_v57  ;;  %16488 = vmatprep.mubr.msk.f32.mxu1 %vm81_vm0, %v5502_v8  ;;  %v12333_v57 = vld [vmem:[#allocation2 + $0x197] sm:$0xff]  ;;  %v12334_v8 = vld [vmem:[#allocation2 + $0x19f] sm:$0xff] }
 0x3d5   :  { %17365 = vmatprep.mubr.msk.f32.mxu0 %vm81_vm0, %v20791_v60 }
 0x3d7   :  { %16489 = vmatmul.mubr.msk.f32.gmra.mrb[22].mxu1 %vm81_vm0, %v5503_v63  ;;  %v12336_v63 = vld [vmem:[#allocation2 + $0x1af] sm:$0xff] }
 0x3d8   :  { %17366 = vmatmul.mubr.msk.f32.vlgmr.msra.gmra.mrb[0].mxu0 %vm81_vm0, %v20798_v1  ;;  %16491 = vmatprep.mubr.msk.f32.mxu1 %vm81_vm0, %v5504_v3  ;;  %v12338_v3 = vld [vmem:[#allocation2 + $0x1bf] sm:$0xff] }
 0x3d9   :  { %17429 = vmatpush3.msra.mxu0 %v20681_v59  ;;  %17368 = vmatprep.mubr.msk.f32.mxu0 %vm81_vm0, %v20800_v10  ;;  %v5507_v59 = vld [vmem:[#allocation2 + $0x112] sm:$0xff] }
 0x3db   :  { %16492 = vmatmul.mubr.msk.f32.gmra.mrb[24].mxu1 %vm81_vm0, %v5505_v11  ;;  %v12785_v11 = vld [vmem:[#allocation2 + $0x80] sm:$0xff] }
 0x3dc   :  { %17369 = vmatmul.mubr.msk.f32.gmra.mrb[2].mxu0 %vm81_vm0, %v20807_v13  ;;  %16494 = vmatprep.mubr.msk.f32.mxu1 %vm81_vm0, %v5506_v15  ;;  %v12787_v15 = vld [vmem:[#allocation2 + $0x90] sm:$0xff] }
 0x3dd   :  { %17371 = vmatprep.mubr.msk.f32.mxu0 %vm81_vm0, %v20811_v6 }
 0x3df   :  { %16495 = vmatmul.mubr.msk.f32.gmra.mrb[26].mxu1 %vm81_vm0, %v5507_v59  ;;  %v12789_v59 = vld [vmem:[#allocation2 + $0xa0] sm:$0xff] }
 0x3e0   :  { %17372 = vmatmul.mubr.msk.f32.gmra.mrb[4].mxu0 %vm81_vm0, %v20819_v17  ;;  %16497 = vmatprep.mubr.msk.f32.mxu1 %vm81_vm0, %v5508_v56  ;;  %v12791_v56 = vld [vmem:[#allocation2 + $0xb0] sm:$0xff] }
 0x3e1   :  { %17374 = vmatprep.mubr.msk.f32.mxu0 %vm81_vm0, %v20821_v18 }
 0x3e3   :  { %16498 = vmatmul.mubr.msk.f32.gmra.mrb[28].mxu1 %vm81_vm0, %v5509_v20  ;;  %v12793_v20 = vld [vmem:[#allocation2 + $0xc0] sm:$0xff] }
 0x3e4   :  { %17375 = vmatmul.mubr.msk.f32.gmra.mrb[6].mxu0 %vm81_vm0, %v20829_v61  ;;  %16500 = vmatprep.mubr.msk.f32.mxu1 %vm81_vm0, %v5510_v28  ;;  %v12795_v28 = vld [vmem:[#allocation2 + $0xd0] sm:$0xff] }
 0x3e5   :  { %17377 = vmatprep.mubr.msk.f32.mxu0 %vm81_vm0, %v20831_v31 }
 0x3e7   :  { %16501 = vmatmul.mubr.msk.f32.gmra.mrb[30].mxu1 %vm81_vm0, %v5511_v33  ;;  %v12797_v33 = vld [vmem:[#allocation2 + $0xe0] sm:$0xff] }
 0x3e8   :  { %17378 = vmatmul.mubr.msk.f32.gmra.mrb[8].mxu0 %vm81_vm0, %v20839_v35  ;;  %16503 = vmatprep.mubr.msk.f32.mxu1 %vm81_vm0, %v5512_v37  ;;  %v12799_v37 = vld [vmem:[#allocation2 + $0xf0] sm:$0xff] }
 0x3e9   :  { %17380 = vmatprep.mubr.msk.f32.mxu0 %vm81_vm0, %v20841_v39 }
 0x3eb   :  { %16504 = vmatmul.mubr.msk.f32.gmra.mrb[32].mxu1 %vm81_vm0, %v5513_v41  ;;  %v12801_v41 = vld [vmem:[#allocation2 + $0x100] sm:$0xff] }
 0x3ec   :  { %17381 = vmatmul.mubr.msk.f32.gmra.mrb[10].mxu0 %vm81_vm0, %v20849_v44  ;;  %16506 = vmatprep.mubr.msk.f32.mxu1 %vm81_vm0, %v5514_v46  ;;  %v12803_v46 = vld [vmem:[#allocation2 + $0x110] sm:$0xff] }
 0x3ed   :  { %17383 = vmatprep.mubr.msk.f32.mxu0 %vm81_vm0, %v20851_v50 }
 0x3ef   :  { %16507 = vmatmul.mubr.msk.f32.gmra.mrb[34].mxu1 %vm81_vm0, %v5515_v55  ;;  %v12805_v55 = vld [vmem:[#allocation2 + $0x120] sm:$0xff] }
 0x3f0   :  { %17384 = vmatmul.mubr.msk.f32.gmra.mrb[12].mxu0 %vm81_vm0, %v20859_v7  ;;  %16509 = vmatprep.mubr.msk.f32.mxu1 %vm81_vm0, %v5516_v9  ;;  %v12807_v9 = vld [vmem:[#allocation2 + $0x130] sm:$0xff] }
 0x3f1   :  { %17386 = vmatprep.mubr.msk.f32.mxu0 %vm81_vm0, %v20861_v16 }
 0x3f3   :  { %16510 = vmatmul.mubr.msk.f32.gmra.mrb[36].mxu1 %vm81_vm0, %v5517_v22  ;;  %v12809_v22 = vld [vmem:[#allocation2 + $0x140] sm:$0xff] }
 0x3f4   :  { %17387 = vmatmul.mubr.msk.f32.gmra.mrb[14].mxu0 %vm81_vm0, %v20869_v27  ;;  %16512 = vmatprep.mubr.msk.f32.mxu1 %vm81_vm0, %v5518_v30  ;;  %v12811_v30 = vld [vmem:[#allocation2 + $0x150] sm:$0xff] }
 0x3f5   :  { %17389 = vmatprep.mubr.msk.f32.mxu0 %vm81_vm0, %v20871_v23 }
 0x3f7   :  { %16513 = vmatmul.mubr.msk.f32.gmra.mrb[38].mxu1 %vm81_vm0, %v5519_v34  ;;  %v12813_v34 = vld [vmem:[#allocation2 + $0x160] sm:$0xff] }
 0x3f8   :  { %17390 = vmatmul.mubr.msk.f32.gmra.mrb[16].mxu0 %vm81_vm0, %v20879_v38  ;;  %16515 = vmatprep.mubr.msk.f32.mxu1 %vm81_vm0, %v5520_v47  ;;  %v12815_v47 = vld [vmem:[#allocation2 + $0x170] sm:$0xff] }
 0x3f9   :  { %17392 = vmatprep.mubr.msk.f32.mxu0 %vm81_vm0, %v20881_v42 }
 0x3fb   :  { %16516 = vmatmul.mubr.msk.f32.gmra.mrb[40].mxu1 %vm81_vm0, %v5521_v19  ;;  %v12817_v19 = vld [vmem:[#allocation2 + $0x180] sm:$0xff] }
 0x3fc   :  { %17393 = vmatmul.mubr.msk.f32.gmra.mrb[18].mxu0 %vm81_vm0, %v20889_v52  ;;  %16520 = vmatprep.mubr.msk.f32.mxu1 %vm81_vm0, %v5967_v21  ;;  %v12819_v21 = vld [vmem:[#allocation2 + $0x190] sm:$0xff] }
 0x3fd   :  { %17395 = vmatprep.mubr.msk.f32.mxu0 %vm81_vm0, %v20891_v24 }
 0x3ff   :  { %16521 = vmatmul.mubr.msk.f32.vlgmr.msra.gmra.mrb[0].mxu1 %vm81_vm0, %v5968_v26  ;;  %v12821_v26 = vld [vmem:[#allocation2 + $0x1a0] sm:$0xff] }
 0x400   :  { %17396 = vmatmul.mubr.msk.f32.gmra.mrb[20].mxu0 %vm81_vm0, %v20899_v29  ;;  %16523 = vmatprep.mubr.msk.f32.mxu1 %vm81_vm0, %v5969_v32  ;;  %v12823_v32 = vld [vmem:[#allocation2 + $0x1b0] sm:$0xff] }
 0x401   :  { %17398 = vmatprep.mubr.msk.f32.mxu0 %vm81_vm0, %v20901_v36  ;;  %17494 = vmatpush3.msra.mxu1 %v20752_v14  ;;  %v5974_v14 = vld [vmem:[#allocation2 + $0x77] sm:$0xff] }
 0x403   :  { %16524 = vmatmul.mubr.msk.f32.gmra.mrb[2].mxu1 %vm81_vm0, %v5970_v40  ;;  %v12825_v40 = vld [vmem:[#allocation2 + $0x1c0] sm:$0xff] }
 0x404   :  { %17399 = vmatmul.mubr.msk.f32.gmra.mrb[22].mxu0 %vm81_vm0, %v20909_v45  ;;  %16526 = vmatprep.mubr.msk.f32.mxu1 %vm81_vm0, %v5971_v48 }
 0x405   :  { %17401 = vmatprep.mubr.msk.f32.mxu0 %vm81_vm0, %v20912_v53 }
 0x407   :  { %16527 = vmatmul.mubr.msk.f32.gmra.mrb[4].mxu1 %vm81_vm0, %v5972_v54 }
 0x408   :  { %17402 = vmatmul.mubr.msk.f32.gmra.mrb[24].mxu0 %vm81_vm0, %v20920_v25  ;;  %16529 = vmatprep.mubr.msk.f32.mxu1 %vm81_vm0, %v5973_v12 }
 0x409   :  { %17404 = vmatprep.mubr.msk.f32.mxu0 %vm81_vm0, %v20922_v58 }
 0x40b   :  { %16530 = vmatmul.mubr.msk.f32.gmra.mrb[6].mxu1 %vm81_vm0, %v5974_v14 }
 0x40c   :  { %17405 = vmatmul.mubr.msk.f32.gmra.mrb[26].mxu0 %vm81_vm0, %v20930_v4  ;;  %16532 = vmatprep.mubr.msk.f32.mxu1 %vm81_vm0, %v20791_v60  ;;  %v12335_v60 = vld [vmem:[#allocation2 + $0x1a7] sm:$0xff] }
 0x40d   :  { %17407 = vmatprep.mubr.msk.f32.mxu0 %vm81_vm0, %v20932_v62 }
 0x40f   :  { %16533 = vmatmul.mubr.msk.f32.gmra.mrb[8].mxu1 %vm81_vm0, %v20798_v1  ;;  %v12337_v1 = vld [vmem:[#allocation2 + $0x1b7] sm:$0xff] }
 0x410   :  { %17408 = vmatmul.mubr.msk.f32.gmra.mrb[28].mxu0 %vm81_vm0, %v20941_v0  ;;  %16535 = vmatprep.mubr.msk.f32.mxu1 %vm81_vm0, %v20800_v10  ;;  %v12339_v10 = vld [vmem:[#allocation2 + $0x1c7] sm:$0xff] }
 0x411   :  { %17410 = vmatprep.mubr.msk.f32.mxu0 %vm81_vm0, %v20943_v2 }
 0x413   :  { %16536 = vmatmul.mubr.msk.f32.gmra.mrb[10].mxu1 %vm81_vm0, %v20807_v13  ;;  %v12786_v13 = vld [vmem:[#allocation2 + $0x88] sm:$0xff] }
 0x414   :  { %17411 = vmatmul.mubr.msk.f32.gmra.mrb[30].mxu0 %vm81_vm0, %v20953_v43  ;;  %16538 = vmatprep.mubr.msk.f32.mxu1 %vm81_vm0, %v20811_v6  ;;  %v12788_v6 = vld [vmem:[#allocation2 + $0x98] sm:$0xff] }
 0x415   :  { %17413 = vmatprep.mubr.msk.f32.mxu0 %vm81_vm0, %v20955_v5 }
 0x417   :  { %16539 = vmatmul.mubr.msk.f32.gmra.mrb[12].mxu1 %vm81_vm0, %v20819_v17  ;;  %v12790_v17 = vld [vmem:[#allocation2 + $0xa8] sm:$0xff] }
 0x418   :  { %17414 = vmatmul.mubr.msk.f32.gmra.mrb[32].mxu0 %vm81_vm0, %v20965_v51  ;;  %16541 = vmatprep.mubr.msk.f32.mxu1 %vm81_vm0, %v20821_v18  ;;  %v12792_v18 = vld [vmem:[#allocation2 + $0xb8] sm:$0xff] }
 0x419   :  { %17416 = vmatprep.mubr.msk.f32.mxu0 %vm81_vm0, %v12332_v49 }
 0x41b   :  { %16542 = vmatmul.mubr.msk.f32.gmra.mrb[14].mxu1 %vm81_vm0, %v20829_v61  ;;  %v12794_v61 = vld [vmem:[#allocation2 + $0xc8] sm:$0xff] }
 0x41c   :  { %17417 = vmatmul.mubr.msk.f32.gmra.mrb[34].mxu0 %vm81_vm0, %v12333_v57  ;;  %16544 = vmatprep.mubr.msk.f32.mxu1 %vm81_vm0, %v20831_v31  ;;  %v12796_v31 = vld [vmem:[#allocation2 + $0xd8] sm:$0xff] }
 0x41d   :  { %17419 = vmatprep.mubr.msk.f32.mxu0 %vm81_vm0, %v12334_v8 }
 0x41f   :  { %16545 = vmatmul.mubr.msk.f32.gmra.mrb[16].mxu1 %vm81_vm0, %v20839_v35  ;;  %v12798_v35 = vld [vmem:[#allocation2 + $0xe8] sm:$0xff] }
 0x420   :  { %17420 = vmatmul.mubr.msk.f32.gmra.mrb[36].mxu0 %vm81_vm0, %v12335_v60  ;;  %16547 = vmatprep.mubr.msk.f32.mxu1 %vm81_vm0, %v20841_v39  ;;  %v12800_v39 = vld [vmem:[#allocation2 + $0xf8] sm:$0xff] }
 0x421   :  { %17422 = vmatprep.mubr.msk.f32.mxu0 %vm81_vm0, %v12336_v63 }
 0x423   :  { %16548 = vmatmul.mubr.msk.f32.gmra.mrb[18].mxu1 %vm81_vm0, %v20849_v44  ;;  %v12802_v44 = vld [vmem:[#allocation2 + $0x108] sm:$0xff] }
 0x424   :  { %17423 = vmatmul.mubr.msk.f32.gmra.mrb[38].mxu0 %vm81_vm0, %v12337_v1  ;;  %16550 = vmatprep.mubr.msk.f32.mxu1 %vm81_vm0, %v20851_v50  ;;  %v12804_v50 = vld [vmem:[#allocation2 + $0x118] sm:$0xff] }
 0x425   :  { %17425 = vmatprep.mubr.msk.f32.mxu0 %vm81_vm0, %v12338_v3 }
 0x427   :  { %16551 = vmatmul.mubr.msk.f32.gmra.mrb[20].mxu1 %vm81_vm0, %v20859_v7  ;;  %v12806_v7 = vld [vmem:[#allocation2 + $0x128] sm:$0xff] }
 0x428   :  { %17426 = vmatmul.mubr.msk.f32.gmra.mrb[40].mxu0 %vm81_vm0, %v12339_v10  ;;  %16553 = vmatprep.mubr.msk.f32.mxu1 %vm81_vm0, %v20861_v16  ;;  %v12808_v16 = vld [vmem:[#allocation2 + $0x138] sm:$0xff] }
 0x429   :  { %17430 = vmatprep.mubr.msk.f32.mxu0 %vm81_vm0, %v12785_v11 }
 0x42b   :  { %16554 = vmatmul.mubr.msk.f32.gmra.mrb[22].mxu1 %vm81_vm0, %v20869_v27  ;;  %v12810_v27 = vld [vmem:[#allocation2 + $0x148] sm:$0xff] }
 0x42c   :  { %17431 = vmatmul.mubr.msk.f32.vlgmr.msra.gmra.mrb[0].mxu0 %vm81_vm0, %v12786_v13  ;;  %16556 = vmatprep.mubr.msk.f32.mxu1 %vm81_vm0, %v20871_v23  ;;  %v12812_v23 = vld [vmem:[#allocation2 + $0x158] sm:$0xff]  ;;  %v21118_v13 = vld [vmem:[%s21342_s3] ss:$0 sm:$0xff] }
 0x42d   :  { %17433 = vmatprep.mubr.msk.f32.mxu0 %vm81_vm0, %v12787_v15 }
 0x42f   :  { %16557 = vmatmul.mubr.msk.f32.gmra.mrb[24].mxu1 %vm81_vm0, %v20879_v38  ;;  %v12814_v38 = vld [vmem:[#allocation2 + $0x168] sm:$0xff] }
 0x430   :  { %17434 = vmatmul.mubr.msk.f32.gmra.mrb[2].mxu0 %vm81_vm0, %v12788_v6  ;;  %16559 = vmatprep.mubr.msk.f32.mxu1 %vm81_vm0, %v20881_v42  ;;  %v12816_v42 = vld [vmem:[#allocation2 + $0x178] sm:$0xff] }
 0x431   :  { %17436 = vmatprep.mubr.msk.f32.mxu0 %vm81_vm0, %v12789_v59 }
 0x433   :  { %16560 = vmatmul.mubr.msk.f32.gmra.mrb[26].mxu1 %vm81_vm0, %v20889_v52  ;;  %v12818_v52 = vld [vmem:[#allocation2 + $0x188] sm:$0xff] }
 0x434   :  { %17437 = vmatmul.mubr.msk.f32.gmra.mrb[4].mxu0 %vm81_vm0, %v12790_v17  ;;  %16562 = vmatprep.mubr.msk.f32.mxu1 %vm81_vm0, %v20891_v24  ;;  %v12820_v24 = vld [vmem:[#allocation2 + $0x198] sm:$0xff] }
 0x435   :  { %17439 = vmatprep.mubr.msk.f32.mxu0 %vm81_vm0, %v12791_v56 }
 0x437   :  { %16563 = vmatmul.mubr.msk.f32.gmra.mrb[28].mxu1 %vm81_vm0, %v20899_v29  ;;  %v12822_v29 = vld [vmem:[#allocation2 + $0x1a8] sm:$0xff] }
 0x438   :  { %17440 = vmatmul.mubr.msk.f32.gmra.mrb[6].mxu0 %vm81_vm0, %v12792_v18  ;;  %16565 = vmatprep.mubr.msk.f32.mxu1 %vm81_vm0, %v20901_v36  ;;  %v12824_v36 = vld [vmem:[#allocation2 + $0x1b8] sm:$0xff] }
 0x439   :  { %17442 = vmatprep.mubr.msk.f32.mxu0 %vm81_vm0, %v12793_v20 }
 0x43b   :  { %16566 = vmatmul.mubr.msk.f32.gmra.mrb[30].mxu1 %vm81_vm0, %v20909_v45  ;;  %v12826_v45 = vld [vmem:[#allocation2 + $0x1c8] sm:$0xff] }
 0x43c   :  { %17443 = vmatmul.mubr.msk.f32.gmra.mrb[8].mxu0 %vm81_vm0, %v12794_v61  ;;  %16568 = vmatprep.mubr.msk.f32.mxu1 %vm81_vm0, %v20912_v53 }
 0x43d   :  { %17445 = vmatprep.mubr.msk.f32.mxu0 %vm81_vm0, %v12795_v28 }
 0x43f   :  { %16569 = vmatmul.mubr.msk.f32.gmra.mrb[32].mxu1 %vm81_vm0, %v20920_v25 }
 0x440   :  { %17446 = vmatmul.mubr.msk.f32.gmra.mrb[10].mxu0 %vm81_vm0, %v12796_v31  ;;  %16571 = vmatprep.mubr.msk.f32.mxu1 %vm81_vm0, %v20922_v58 }
 0x441   :  { %17448 = vmatprep.mubr.msk.f32.mxu0 %vm81_vm0, %v12797_v33 }
 0x443   :  { %16572 = vmatmul.mubr.msk.f32.gmra.mrb[34].mxu1 %vm81_vm0, %v20930_v4 }
 0x444   :  { %17449 = vmatmul.mubr.msk.f32.gmra.mrb[12].mxu0 %vm81_vm0, %v12798_v35  ;;  %16574 = vmatprep.mubr.msk.f32.mxu1 %vm81_vm0, %v20932_v62 }
 0x445   :  { %17451 = vmatprep.mubr.msk.f32.mxu0 %vm81_vm0, %v12799_v37 }
 0x447   :  { %16575 = vmatmul.mubr.msk.f32.gmra.mrb[36].mxu1 %vm81_vm0, %v20941_v0 }
 0x448   :  { %17452 = vmatmul.mubr.msk.f32.gmra.mrb[14].mxu0 %vm81_vm0, %v12800_v39  ;;  %16577 = vmatprep.mubr.msk.f32.mxu1 %vm81_vm0, %v20943_v2 }
 0x449   :  { %17454 = vmatprep.mubr.msk.f32.mxu0 %vm81_vm0, %v12801_v41 }
 0x44b   :  { %16578 = vmatmul.mubr.msk.f32.gmra.mrb[38].mxu1 %vm81_vm0, %v20953_v43 }
 0x44c   :  { %17455 = vmatmul.mubr.msk.f32.gmra.mrb[16].mxu0 %vm81_vm0, %v12802_v44  ;;  %16580 = vmatprep.mubr.msk.f32.mxu1 %vm81_vm0, %v20955_v5 }
 0x44d   :  { %17457 = vmatprep.mubr.msk.f32.mxu0 %vm81_vm0, %v12803_v46 }
 0x44f   :  { %16581 = vmatmul.mubr.msk.f32.gmra.mrb[40].mxu1 %vm81_vm0, %v20965_v51 }
 0x450   :  { %17458 = vmatmul.mubr.msk.f32.gmra.mrb[18].mxu0 %vm81_vm0, %v12804_v50  ;;  %16618 = vmatprep.mubr.msk.f32.mxu1 %vm81_vm0, %v12799_v37 }
 0x451   :  { %17460 = vmatprep.mubr.msk.f32.mxu0 %vm81_vm0, %v12805_v55 }
 0x453   :  { %16619 = vmatmul.mubr.msk.f32.vlgmr.msra.gmra.mrb[22].mxu1 %vm81_vm0, %v12800_v39 }
 0x454   :  { %17461 = vmatmul.mubr.msk.f32.gmra.mrb[20].mxu0 %vm81_vm0, %v12806_v7  ;;  %16621 = vmatprep.mubr.msk.f32.mxu1 %vm81_vm0, %v12801_v41 }
 0x455   :  { %17463 = vmatprep.mubr.msk.f32.mxu0 %vm81_vm0, %v12807_v9 }
 0x457   :  { %16622 = vmatmul.mubr.msk.f32.gmra.mrb[24].mxu1 %vm81_vm0, %v12802_v44 }
 0x458   :  { %17464 = vmatmul.mubr.msk.f32.gmra.mrb[22].mxu0 %vm81_vm0, %v12808_v16  ;;  %16624 = vmatprep.mubr.msk.f32.mxu1 %vm81_vm0, %v12803_v46 }
 0x459   :  { %17466 = vmatprep.mubr.msk.f32.mxu0 %vm81_vm0, %v12809_v22 }
 0x45b   :  { %16625 = vmatmul.mubr.msk.f32.gmra.mrb[26].mxu1 %vm81_vm0, %v12804_v50 }
 0x45c   :  { %17467 = vmatmul.mubr.msk.f32.gmra.mrb[24].mxu0 %vm81_vm0, %v12810_v27  ;;  %16627 = vmatprep.mubr.msk.f32.mxu1 %vm81_vm0, %v12805_v55 }
 0x45d   :  { %17469 = vmatprep.mubr.msk.f32.mxu0 %vm81_vm0, %v12811_v30 }
 0x45f   :  { %16628 = vmatmul.mubr.msk.f32.gmra.mrb[28].mxu1 %vm81_vm0, %v12806_v7 }
 0x460   :  { %17470 = vmatmul.mubr.msk.f32.gmra.mrb[26].mxu0 %vm81_vm0, %v12812_v23  ;;  %16630 = vmatprep.mubr.msk.f32.mxu1 %vm81_vm0, %v12807_v9 }
 0x461   :  { %17472 = vmatprep.mubr.msk.f32.mxu0 %vm81_vm0, %v12813_v34 }
 0x463   :  { %16631 = vmatmul.mubr.msk.f32.gmra.mrb[30].mxu1 %vm81_vm0, %v12808_v16 }
 0x464   :  { %17473 = vmatmul.mubr.msk.f32.gmra.mrb[28].mxu0 %vm81_vm0, %v12814_v38  ;;  %16633 = vmatprep.mubr.msk.f32.mxu1 %vm81_vm0, %v12809_v22 }
 0x465   :  { %17475 = vmatprep.mubr.msk.f32.mxu0 %vm81_vm0, %v12815_v47 }
 0x467   :  { %16634 = vmatmul.mubr.msk.f32.gmra.mrb[32].mxu1 %vm81_vm0, %v12810_v27 }
 0x468   :  { %17476 = vmatmul.mubr.msk.f32.gmra.mrb[30].mxu0 %vm81_vm0, %v12816_v42  ;;  %16636 = vmatprep.mubr.msk.f32.mxu1 %vm81_vm0, %v12811_v30 }
 0x469   :  { %17478 = vmatprep.mubr.msk.f32.mxu0 %vm81_vm0, %v12817_v19 }
 0x46b   :  { %16637 = vmatmul.mubr.msk.f32.gmra.mrb[34].mxu1 %vm81_vm0, %v12812_v23 }
 0x46c   :  { %17479 = vmatmul.mubr.msk.f32.gmra.mrb[32].mxu0 %vm81_vm0, %v12818_v52  ;;  %16639 = vmatprep.mubr.msk.f32.mxu1 %vm81_vm0, %v12813_v34 }
 0x46d   :  { %17481 = vmatprep.mubr.msk.f32.mxu0 %vm81_vm0, %v12819_v21 }
 0x46f   :  { %16640 = vmatmul.mubr.msk.f32.gmra.mrb[36].mxu1 %vm81_vm0, %v12814_v38 }
 0x470   :  { %17482 = vmatmul.mubr.msk.f32.gmra.mrb[34].mxu0 %vm81_vm0, %v12820_v24  ;;  %16642 = vmatprep.mubr.msk.f32.mxu1 %vm81_vm0, %v12815_v47 }
 0x471   :  { %17484 = vmatprep.mubr.msk.f32.mxu0 %vm81_vm0, %v12821_v26 }
 0x473   :  { %16643 = vmatmul.mubr.msk.f32.gmra.mrb[38].mxu1 %vm81_vm0, %v12816_v42 }
 0x474   :  { %17485 = vmatmul.mubr.msk.f32.gmra.mrb[36].mxu0 %vm81_vm0, %v12822_v29  ;;  %16645 = vmatprep.mubr.msk.f32.mxu1 %vm81_vm0, %v12817_v19 }
 0x475   :  { %17487 = vmatprep.mubr.msk.f32.mxu0 %vm81_vm0, %v12823_v32 }
 0x477   :  { %16646 = vmatmul.mubr.msk.f32.gmra.mrb[40].mxu1 %vm81_vm0, %v12818_v52 }
 0x478   :  { %17488 = vmatmul.mubr.msk.f32.gmra.mrb[38].mxu0 %vm81_vm0, %v12824_v36 }
 0x479   :  { %17490 = vmatprep.mubr.msk.f32.mxu0 %vm81_vm0, %v12825_v40 }
 0x47c   :  { %17491 = vmatmul.mubr.msk.f32.gmra.mrb[40].mxu0 %vm81_vm0, %v12826_v45 }
 0x4d2   :  { %v16522_v48 = vpop.f32.mrb[0].mxu1 }
 0x4d3   :  { %v6203_v53 = vpop.f32.mrb[1].mxu1 }
 0x4d6   :  { %v16525_v54 = vpop.f32.mrb[2].mxu1 }
 0x4d7   :  { %v6213_v25 = vpop.f32.mrb[3].mxu1 }
 0x4da   :  { %v16528_v12 = vpop.f32.mrb[4].mxu1 }
 0x4db   :  { %v6223_v58 = vpop.f32.mrb[5].mxu1 }
 0x4de   :  { %v16531_v14 = vpop.f32.mrb[6].mxu1 }
 0x4df   :  { %v6233_v4 = vpop.f32.mrb[7].mxu1 }
 0x4e2   :  { %v16534_v62 = vpop.f32.mrb[8].mxu1 }
 0x4e3   :  { %v6243_v0 = vpop.f32.mrb[9].mxu1 }
 0x4e6   :  { %v16537_v2 = vpop.f32.mrb[10].mxu1 }
 0x4e7   :  { %v6253_v43 = vpop.f32.mrb[11].mxu1 }
 0x4ea   :  { %v16540_v5 = vpop.f32.mrb[12].mxu1 }
 0x4eb   :  { %v21097_v51 = vpop.f32.mrb[13].mxu1 }
 0x4ee   :  { %v21099_v49 = vpop.f32.mrb[14].mxu1 }
 0x4ef   :  { %v21101_v57 = vpop.f32.mrb[15].mxu1 }
 0x4f2   :  { %v21103_v8 = vpop.f32.mrb[16].mxu1 }
 0x4f3   :  { %v21105_v60 = vpop.f32.mrb[17].mxu1 }
 0x4f6   :  { %v21107_v63 = vpop.f32.mrb[18].mxu1 }
 0x4f7   :  { %v21109_v1 = vpop.f32.mrb[19].mxu1 }
 0x4fa   :  { %v21111_v3 = vpop.f32.mrb[20].mxu1 }
 0x4fb   :  { %v21113_v10 = vpop.f32.mrb[21].mxu1 }
 0x4ff   :  { %v17432_v11 = vpop.f32.mrb[0].mxu0 }
 0x500   :  { %v17495_v15 = vadd.f32 %v17432_v11, %v16522_v48  ;;  %v13021_v6 = vpop.f32.mrb[1].mxu0 }
 0x501   :  { %v17496_v59 = vadd.f32 %v13021_v6, %v6203_v53 }
 0x502   :  { %v13280_v17 = vadd.f32 %v17495_v15, %v21118_v13 }
 0x503   :  { %v13279_v56 = vadd.f32 %v17496_v59, %v21118_v13  ;;  %v17435_v18 = vpop.f32.mrb[2].mxu0 }
 0x504   :  { %13323 = vst.msk [vmem:[%s21343_s4 + $0x8] sm:$0xff] %vm13321_vm1, %v13280_v17  ;;  %v17497_v20 = vadd.f32 %v17435_v18, %v16525_v54  ;;  %v13031_v61 = vpop.f32.mrb[3].mxu0 }
 0x505   :  { %13322 = vst.msk [vmem:[%s21343_s4] sm:$0xff] %vm13321_vm1, %v13279_v56  ;;  %v17498_v28 = vadd.f32 %v13031_v61, %v6213_v25 }
 0x506   :  { %v13282_v31 = vadd.f32 %v17497_v20, %v21118_v13 }
 0x507   :  { %v13281_v33 = vadd.f32 %v17498_v28, %v21118_v13  ;;  %v17438_v35 = vpop.f32.mrb[4].mxu0 }
 0x508   :  { %13325 = vst.msk [vmem:[%s21343_s4 + $0x18] sm:$0xff] %vm13321_vm1, %v13282_v31  ;;  %v17499_v37 = vadd.f32 %v17438_v35, %v16528_v12  ;;  %v13041_v39 = vpop.f32.mrb[5].mxu0 }
 0x509   :  { %13324 = vst.msk [vmem:[%s21343_s4 + $0x10] sm:$0xff] %vm13321_vm1, %v13281_v33  ;;  %v17500_v41 = vadd.f32 %v13041_v39, %v6223_v58 }
 0x50a   :  { %v13284_v44 = vadd.f32 %v17499_v37, %v21118_v13 }
 0x50b   :  { %v13283_v46 = vadd.f32 %v17500_v41, %v21118_v13  ;;  %v17441_v50 = vpop.f32.mrb[6].mxu0 }
 0x50c   :  { %13327 = vst.msk [vmem:[%s21343_s4 + $0x28] sm:$0xff] %vm13321_vm1, %v13284_v44  ;;  %v17501_v55 = vadd.f32 %v17441_v50, %v16531_v14  ;;  %v13051_v7 = vpop.f32.mrb[7].mxu0 }
 0x50d   :  { %13326 = vst.msk [vmem:[%s21343_s4 + $0x20] sm:$0xff] %vm13321_vm1, %v13283_v46  ;;  %v17502_v9 = vadd.f32 %v13051_v7, %v6233_v4 }
 0x50e   :  { %v13286_v16 = vadd.f32 %v17501_v55, %v21118_v13 }
 0x50f   :  { %v13285_v22 = vadd.f32 %v17502_v9, %v21118_v13  ;;  %v17444_v27 = vpop.f32.mrb[8].mxu0 }
 0x510   :  { %13329 = vst.msk [vmem:[%s21343_s4 + $0x38] sm:$0xff] %vm13321_vm1, %v13286_v16  ;;  %v17503_v30 = vadd.f32 %v17444_v27, %v16534_v62  ;;  %v13061_v23 = vpop.f32.mrb[9].mxu0 }
 0x511   :  { %13328 = vst.msk [vmem:[%s21343_s4 + $0x30] sm:$0xff] %vm13321_vm1, %v13285_v22  ;;  %v17504_v34 = vadd.f32 %v13061_v23, %v6243_v0 }
 0x512   :  { %v13288_v38 = vadd.f32 %v17503_v30, %v21118_v13 }
 0x513   :  { %v13287_v47 = vadd.f32 %v17504_v34, %v21118_v13  ;;  %v17447_v42 = vpop.f32.mrb[10].mxu0 }
 0x514   :  { %13331 = vst.msk [vmem:[%s21343_s4 + $0x48] sm:$0xff] %vm13321_vm1, %v13288_v38  ;;  %v17505_v19 = vadd.f32 %v17447_v42, %v16537_v2  ;;  %v13071_v52 = vpop.f32.mrb[11].mxu0 }
 0x515   :  { %13330 = vst.msk [vmem:[%s21343_s4 + $0x40] sm:$0xff] %vm13321_vm1, %v13287_v47  ;;  %v17506_v21 = vadd.f32 %v13071_v52, %v6253_v43 }
 0x516   :  { %v13290_v24 = vadd.f32 %v17505_v19, %v21118_v13 }
 0x517   :  { %v13289_v26 = vadd.f32 %v17506_v21, %v21118_v13  ;;  %v17450_v29 = vpop.f32.mrb[12].mxu0 }
 0x518   :  { %13333 = vst.msk [vmem:[%s21343_s4 + $0x58] sm:$0xff] %vm13321_vm1, %v13290_v24  ;;  %v17507_v32 = vadd.f32 %v17450_v29, %v16540_v5  ;;  %v13081_v36 = vpop.f32.mrb[13].mxu0 }
 0x519   :  { %13332 = vst.msk [vmem:[%s21343_s4 + $0x50] sm:$0xff] %vm13321_vm1, %v13289_v26  ;;  %v17508_v40 = vadd.f32 %v13081_v36, %v21097_v51 }
 0x51a   :  { %v13292_v45 = vadd.f32 %v17507_v32, %v21118_v13 }
 0x51b   :  { %v13291_v48 = vadd.f32 %v17508_v40, %v21118_v13  ;;  %v17453_v53 = vpop.f32.mrb[14].mxu0 }
 0x51c   :  { %13335 = vst.msk [vmem:[%s21343_s4 + $0x68] sm:$0xff] %vm13321_vm1, %v13292_v45  ;;  %v17509_v54 = vadd.f32 %v17453_v53, %v21099_v49  ;;  %v13091_v25 = vpop.f32.mrb[15].mxu0 }
 0x51d   :  { %13334 = vst.msk [vmem:[%s21343_s4 + $0x60] sm:$0xff] %vm13321_vm1, %v13291_v48  ;;  %v17510_v12 = vadd.f32 %v13091_v25, %v21101_v57 }
 0x51e   :  { %v13294_v58 = vadd.f32 %v17509_v54, %v21118_v13 }
 0x51f   :  { %v13293_v14 = vadd.f32 %v17510_v12, %v21118_v13  ;;  %v17456_v4 = vpop.f32.mrb[16].mxu0 }
 0x520   :  { %13337 = vst.msk [vmem:[%s21343_s4 + $0x78] sm:$0xff] %vm13321_vm1, %v13294_v58  ;;  %v17511_v62 = vadd.f32 %v17456_v4, %v21103_v8  ;;  %v13101_v0 = vpop.f32.mrb[17].mxu0 }
 0x521   :  { %13336 = vst.msk [vmem:[%s21343_s4 + $0x70] sm:$0xff] %vm13321_vm1, %v13293_v14  ;;  %v17512_v2 = vadd.f32 %v13101_v0, %v21105_v60 }
 0x522   :  { %v13296_v43 = vadd.f32 %v17511_v62, %v21118_v13 }
 0x523   :  { %v13295_v5 = vadd.f32 %v17512_v2, %v21118_v13  ;;  %v17459_v51 = vpop.f32.mrb[18].mxu0 }
 0x524   :  { %13339 = vst.msk [vmem:[%s21343_s4 + $0x88] sm:$0xff] %vm13321_vm1, %v13296_v43  ;;  %v17513_v49 = vadd.f32 %v17459_v51, %v21107_v63  ;;  %v13111_v57 = vpop.f32.mrb[19].mxu0 }
 0x525   :  { %13338 = vst.msk [vmem:[%s21343_s4 + $0x80] sm:$0xff] %vm13321_vm1, %v13295_v5  ;;  %v17514_v8 = vadd.f32 %v13111_v57, %v21109_v1 }
 0x526   :  { %v13298_v60 = vadd.f32 %v17513_v49, %v21118_v13  ;;  %v16620_v15 = vpop.f32.mrb[22].mxu1 }
 0x527   :  { %v13297_v11 = vadd.f32 %v17514_v8, %v21118_v13  ;;  %v17462_v6 = vpop.f32.mrb[20].mxu0  ;;  %v6800_v59 = vpop.f32.mrb[23].mxu1 }
 0x528   :  { %13341 = vst.msk [vmem:[%s21343_s4 + $0x98] sm:$0xff] %vm13321_vm1, %v13298_v60  ;;  %v17515_v63 = vadd.f32 %v17462_v6, %v21111_v3  ;;  %v13121_v17 = vpop.f32.mrb[21].mxu0 }
 0x529   :  { %13340 = vst.msk [vmem:[%s21343_s4 + $0x90] sm:$0xff] %vm13321_vm1, %v13297_v11  ;;  %v17516_v1 = vadd.f32 %v13121_v17, %v21113_v10 }
 0x52a   :  { %v13300_v56 = vadd.f32 %v17515_v63, %v21118_v13  ;;  %v16623_v20 = vpop.f32.mrb[24].mxu1 }
 0x52b   :  { %v13299_v18 = vadd.f32 %v17516_v1, %v21118_v13  ;;  %v17465_v61 = vpop.f32.mrb[22].mxu0  ;;  %v6810_v28 = vpop.f32.mrb[25].mxu1 }
 0x52c   :  { %13343 = vst.msk [vmem:[%s21343_s4 + $0xa8] sm:$0xff] %vm13321_vm1, %v13300_v56  ;;  %v17517_v3 = vadd.f32 %v17465_v61, %v16620_v15  ;;  %v13131_v31 = vpop.f32.mrb[23].mxu0 }
 0x52d   :  { %13342 = vst.msk [vmem:[%s21343_s4 + $0xa0] sm:$0xff] %vm13321_vm1, %v13299_v18  ;;  %v17518_v10 = vadd.f32 %v13131_v31, %v6800_v59 }
 0x52e   :  { %v13302_v33 = vadd.f32 %v17517_v3, %v21118_v13  ;;  %v16626_v37 = vpop.f32.mrb[26].mxu1 }
 0x52f   :  { %v13301_v35 = vadd.f32 %v17518_v10, %v21118_v13  ;;  %v17468_v39 = vpop.f32.mrb[24].mxu0  ;;  %v6820_v44 = vpop.f32.mrb[27].mxu1 }
 0x530   :  { %13345 = vst.msk [vmem:[%s21343_s4 + $0xb8] sm:$0xff] %vm13321_vm1, %v13302_v33  ;;  %v17519_v41 = vadd.f32 %v17468_v39, %v16623_v20  ;;  %v13141_v46 = vpop.f32.mrb[25].mxu0 }
 0x531   :  { %13344 = vst.msk [vmem:[%s21343_s4 + $0xb0] sm:$0xff] %vm13321_vm1, %v13301_v35  ;;  %v17520_v50 = vadd.f32 %v13141_v46, %v6810_v28 }
 0x532   :  { %v13304_v55 = vadd.f32 %v17519_v41, %v21118_v13  ;;  %v16629_v9 = vpop.f32.mrb[28].mxu1 }
 0x533   :  { %v13303_v7 = vadd.f32 %v17520_v50, %v21118_v13  ;;  %v17471_v16 = vpop.f32.mrb[26].mxu0  ;;  %v6830_v27 = vpop.f32.mrb[29].mxu1 }
 0x534   :  { %13347 = vst.msk [vmem:[%s21343_s4 + $0xc8] sm:$0xff] %vm13321_vm1, %v13304_v55  ;;  %v17521_v22 = vadd.f32 %v17471_v16, %v16626_v37  ;;  %v13151_v30 = vpop.f32.mrb[27].mxu0 }
 0x535   :  { %13346 = vst.msk [vmem:[%s21343_s4 + $0xc0] sm:$0xff] %vm13321_vm1, %v13303_v7  ;;  %v17522_v23 = vadd.f32 %v13151_v30, %v6820_v44 }
 0x536   :  { %v13306_v34 = vadd.f32 %v17521_v22, %v21118_v13  ;;  %v16632_v47 = vpop.f32.mrb[30].mxu1 }
 0x537   :  { %v13305_v38 = vadd.f32 %v17522_v23, %v21118_v13  ;;  %v17474_v42 = vpop.f32.mrb[28].mxu0  ;;  %v6840_v52 = vpop.f32.mrb[31].mxu1 }
 0x538   :  { %13349 = vst.msk [vmem:[%s21343_s4 + $0xd8] sm:$0xff] %vm13321_vm1, %v13306_v34  ;;  %v17523_v19 = vadd.f32 %v17474_v42, %v16629_v9  ;;  %v13161_v21 = vpop.f32.mrb[29].mxu0 }
 0x539   :  { %13348 = vst.msk [vmem:[%s21343_s4 + $0xd0] sm:$0xff] %vm13321_vm1, %v13305_v38  ;;  %v17524_v24 = vadd.f32 %v13161_v21, %v6830_v27 }
 0x53a   :  { %v13308_v26 = vadd.f32 %v17523_v19, %v21118_v13  ;;  %v16635_v32 = vpop.f32.mrb[32].mxu1 }
 0x53b   :  { %v13307_v29 = vadd.f32 %v17524_v24, %v21118_v13  ;;  %v17477_v36 = vpop.f32.mrb[30].mxu0  ;;  %v6850_v45 = vpop.f32.mrb[33].mxu1 }
 0x53c   :  { %13351 = vst.msk [vmem:[%s21343_s4 + $0xe8] sm:$0xff] %vm13321_vm1, %v13308_v26  ;;  %v17525_v40 = vadd.f32 %v17477_v36, %v16632_v47  ;;  %v13171_v48 = vpop.f32.mrb[31].mxu0 }
 0x53d   :  { %13350 = vst.msk [vmem:[%s21343_s4 + $0xe0] sm:$0xff] %vm13321_vm1, %v13307_v29  ;;  %v17526_v53 = vadd.f32 %v13171_v48, %v6840_v52 }
 0x53e   :  { %v13310_v54 = vadd.f32 %v17525_v40, %v21118_v13  ;;  %v16638_v12 = vpop.f32.mrb[34].mxu1 }
 0x53f   :  { %v13309_v25 = vadd.f32 %v17526_v53, %v21118_v13  ;;  %v17480_v58 = vpop.f32.mrb[32].mxu0  ;;  %v6860_v4 = vpop.f32.mrb[35].mxu1 }
 0x540   :  { %13353 = vst.msk [vmem:[%s21343_s4 + $0xf8] sm:$0xff] %vm13321_vm1, %v13310_v54  ;;  %v17527_v14 = vadd.f32 %v17480_v58, %v16635_v32  ;;  %v13181_v62 = vpop.f32.mrb[33].mxu0 }
 0x541   :  { %13352 = vst.msk [vmem:[%s21343_s4 + $0xf0] sm:$0xff] %vm13321_vm1, %v13309_v25  ;;  %v17528_v0 = vadd.f32 %v13181_v62, %v6850_v45 }
 0x542   :  { %v13312_v2 = vadd.f32 %v17527_v14, %v21118_v13  ;;  %v16641_v5 = vpop.f32.mrb[36].mxu1 }
 0x543   :  { %v13311_v43 = vadd.f32 %v17528_v0, %v21118_v13  ;;  %v17483_v51 = vpop.f32.mrb[34].mxu0  ;;  %v6870_v57 = vpop.f32.mrb[37].mxu1 }
 0x544   :  { %13355 = vst.msk [vmem:[%s21343_s4 + $0x108] sm:$0xff] %vm13321_vm1, %v13312_v2  ;;  %v17529_v49 = vadd.f32 %v17483_v51, %v16638_v12  ;;  %v13191_v8 = vpop.f32.mrb[35].mxu0 }
 0x545   :  { %13354 = vst.msk [vmem:[%s21343_s4 + $0x100] sm:$0xff] %vm13321_vm1, %v13311_v43  ;;  %v17530_v60 = vadd.f32 %v13191_v8, %v6860_v4 }
 0x546   :  { %v13314_v11 = vadd.f32 %v17529_v49, %v21118_v13  ;;  %v16644_v6 = vpop.f32.mrb[38].mxu1 }
 0x547   :  { %v13313_v15 = vadd.f32 %v17530_v60, %v21118_v13  ;;  %v17486_v63 = vpop.f32.mrb[36].mxu0  ;;  %v6880_v17 = vpop.f32.mrb[39].mxu1 }
 0x548   :  { %13357 = vst.msk [vmem:[%s21343_s4 + $0x118] sm:$0xff] %vm13321_vm1, %v13314_v11  ;;  %v17531_v59 = vadd.f32 %v17486_v63, %v16641_v5  ;;  %v13201_v1 = vpop.f32.mrb[37].mxu0 }
 0x549   :  { %13356 = vst.msk [vmem:[%s21343_s4 + $0x110] sm:$0xff] %vm13321_vm1, %v13313_v15  ;;  %v17532_v56 = vadd.f32 %v13201_v1, %v6870_v57 }
 0x54a   :  { %v13316_v18 = vadd.f32 %v17531_v59, %v21118_v13  ;;  %v16647_v61 = vpop.f32.mrb[40].mxu1 }
 0x54b   :  { %v13315_v20 = vadd.f32 %v17532_v56, %v21118_v13  ;;  %v17489_v3 = vpop.f32.mrb[38].mxu0  ;;  %v6890_v31 = vpop.f32.mrb[41].mxu1 }
 0x54c   :  { %13359 = vst.msk [vmem:[%s21343_s4 + $0x128] sm:$0xff] %vm13321_vm1, %v13316_v18  ;;  %v17533_v28 = vadd.f32 %v17489_v3, %v16644_v6  ;;  %v13211_v10 = vpop.f32.mrb[39].mxu0 }
 0x54d   :  { %13358 = vst.msk [vmem:[%s21343_s4 + $0x120] sm:$0xff] %vm13321_vm1, %v13315_v20  ;;  %v17534_v33 = vadd.f32 %v13211_v10, %v6880_v17 }
 0x54e   :  { %v13318_v35 = vadd.f32 %v17533_v28, %v21118_v13 }
 0x54f   :  { %v13317_v37 = vadd.f32 %v17534_v33, %v21118_v13  ;;  %v17492_v39 = vpop.f32.mrb[40].mxu0 }
 0x550   :  { %13361 = vst.msk [vmem:[%s21343_s4 + $0x138] sm:$0xff] %vm13321_vm1, %v13318_v35  ;;  %v17535_v41 = vadd.f32 %v17492_v39, %v16647_v61  ;;  %v13221_v44 = vpop.f32.mrb[41].mxu0 }
 0x551   :  { %13360 = vst.msk [vmem:[%s21343_s4 + $0x130] sm:$0xff] %vm13321_vm1, %v13317_v37  ;;  %v17536_v46 = vadd.f32 %v13221_v44, %v6890_v31 }
 0x552   :  { %v13320_v50 = vadd.f32 %v17535_v41, %v21118_v13 }
 0x553   :  { %v13319_v55 = vadd.f32 %v17536_v46, %v21118_v13 }
 0x554   :  { %13363 = vst.msk [vmem:[%s21343_s4 + $0x148] sm:$0xff] %vm13321_vm1, %v13320_v50 }
 0x555   :  { %13362 = vst.msk [vmem:[%s21343_s4 + $0x140] sm:$0xff] %vm13321_vm1, %v13319_v55 }

</bundles_post_ra>
